<compile_context>
chip_gen: v7x
topology: tpu7x:2x2x1
jax: 0.10.0
libtpu: 0.0.40
codegen_flags: <defaults>
</compile_context>

<pallas_src>
import math

import jax
import jax.numpy as jnp
from jax.experimental import pallas as pl
from jax.experimental.pallas import tpu as pltpu

# ----------------------------- configuration -----------------------------
B = 2               # batch
S = 8               # number of trials
D_SUBJ = 16         # dim_data_subj
D_EMB_SUBJ = 32     # dim_emb_subj
D_TRIAL = 16        # dim_data_trial
D_EMB_TRIAL = 32    # dim_emb_trial
D_OUT = 4           # dim_output
AGG_HEADS = 8       # agg_num_heads
AGG_LAYERS = 2      # agg_num_layers (small for the demo)
NCON = 128          # ncon (condition dim)
T_DIFF = 100        # diffusion steps
TIME_EMB_DIM = 128  # time_emb_dim
HID_ENC = 64        # hidden width of the MLP encoders
DHID = 256          # hidden width of the diffusion denoise net
BETA_START, BETA_END = 1e-4, 2e-2


# ----------------------------- fused Pallas kernel -----------------------------
def _fused_kernel(
    # activations / precomputed small tensors
    xs_ref, xtf_ref, bias_ref, sel_ref, xt_ref, eps_ref, temb_ref,
    # subject encoder (Linear-ReLU-Linear)
    esw1_ref, esb1_ref, esw2_ref, esb2_ref,
    # trial encoder (Linear-ReLU-Linear)
    etw1_ref, etb1_ref, etw2_ref, etb2_ref,
    # aggregator: head-major stacks (L,H,D,dh)/(L,H,dh,D) + LayerNorm params
    wq_ref, wk_ref, wv_ref, wo_ref, gam_ref, bet_ref,
    # decoder (concat expressed as split weights)
    dws_ref, dwa_ref, db_ref,
    # diffusion denoise net (first layer split along the concat axis)
    w1x_ref, w1c_ref, w1t_ref, b1_ref, w2_ref, b2_ref, w3_ref, b3_ref,
    # output
    loss_ref):
  dot = lambda a, b: jnp.dot(a, b, preferred_element_type=jnp.float32)

  # ---- subject encoder : MLPDecoder2(D_SUBJ -> D_EMB_SUBJ) ----
  h = jnp.maximum(dot(xs_ref[...], esw1_ref[...]) + esb1_ref[...], 0.0)
  x_subj = dot(h, esw2_ref[...]) + esb2_ref[...]               # (B, D_EMB_SUBJ)

  # ---- trial encoder applied to flattened (B*S, D_TRIAL) ----
  h = jnp.maximum(dot(xtf_ref[...], etw1_ref[...]) + etb1_ref[...], 0.0)
  y = dot(h, etw2_ref[...]) + etb2_ref[...]                    # (BS, D)

  num_layers, num_heads, _, dh = wq_ref.shape
  scale = 1.0 / math.sqrt(dh)
  bias = bias_ref[...]                                         # (BS, BS) additive mask

  # ---- masked multi-head self-attention + residual + LayerNorm layers ----
  for l in range(num_layers):
    attn = None
    for hd in range(num_heads):
      qh = dot(y, wq_ref[l, hd])                               # (BS, dh)
      kh = dot(y, wk_ref[l, hd])                               # (BS, dh)
      vh = dot(y, wv_ref[l, hd])                               # (BS, dh)
      s = dot(qh, kh.T) * scale + bias                         # (BS, BS)
      s = s - jnp.max(s, axis=-1, keepdims=True)
      p = jnp.exp(s)
      p = p * pl.reciprocal(jnp.sum(p, axis=-1, keepdims=True), approx=True)
      o = dot(dot(p, vh), wo_ref[l, hd])                       # (BS, D)
      attn = o if attn is None else attn + o
    yr = y + attn
    mu = jnp.mean(yr, axis=-1, keepdims=True)
    var = jnp.mean((yr - mu) * (yr - mu), axis=-1, keepdims=True)
    y = (yr - mu) * jax.lax.rsqrt(var + 1e-5)
    y = y * gam_ref[l] + bet_ref[l]

  # ---- masked mean pooling per batch element ----
  sel = sel_ref[...]                                           # (B, BS)
  cnt = jnp.maximum(jnp.sum(sel, axis=-1, keepdims=True), 1.0)
  x_agg = dot(sel, y) * pl.reciprocal(cnt, approx=True)        # (B, D)

  # ---- decoder -> diffusion condition ([x_subj | x_agg] @ W as split sum) ----
  cond = dot(x_subj, dws_ref[...]) + dot(x_agg, dwa_ref[...]) + db_ref[...]

  # ---- denoise net: eps prediction ([x_t | cond | t_emb] @ W1 as split sum) ----
  h1 = jnp.maximum(dot(xt_ref[...], w1x_ref[...]) + dot(cond, w1c_ref[...])
                   + dot(temb_ref[...], w1t_ref[...]) + b1_ref[...], 0.0)
  h2 = jnp.maximum(dot(h1, w2_ref[...]) + b2_ref[...], 0.0)
  eps_pred = dot(h2, w3_ref[...]) + b3_ref[...]                # (B, D_OUT)

  # ---- epsilon-prediction MSE loss (only scalar leaves the kernel) ----
  d = eps_pred - eps_ref[...]
  loss_ref[...] = jnp.sum(d * d, keepdims=True) * (1.0 / d.size)


# ----------------------------- model (glue) -----------------------------
def sinusoidal_embedding(t, dim):
  half = dim // 2
  freqs = jnp.exp(-math.log(10000.0) * jnp.arange(half, dtype=jnp.float32) / half)
  args = t.astype(jnp.float32)[:, None] * freqs[None, :]
  return jnp.concatenate([jnp.sin(args), jnp.cos(args)], axis=-1)


def init_params(key):
  keys = iter(jax.random.split(key, 32))

  def w(shape, scale=0.02):
    return (scale * jax.random.normal(next(keys), shape)).astype(jnp.float32)

  zr = lambda n: jnp.zeros((1, n), jnp.float32)
  dh = D_EMB_TRIAL // AGG_HEADS
  return {
      "enc_subj": dict(w1=w((D_SUBJ, HID_ENC)), b1=zr(HID_ENC),
                       w2=w((HID_ENC, D_EMB_SUBJ)), b2=zr(D_EMB_SUBJ)),
      "enc_trial": dict(w1=w((D_TRIAL, HID_ENC)), b1=zr(HID_ENC),
                        w2=w((HID_ENC, D_EMB_TRIAL)), b2=zr(D_EMB_TRIAL)),
      # head-major stacks so the kernel never lane-slices or lane-concats
      "agg": dict(wq=w((AGG_LAYERS, AGG_HEADS, D_EMB_TRIAL, dh)),
                  wk=w((AGG_LAYERS, AGG_HEADS, D_EMB_TRIAL, dh)),
                  wv=w((AGG_LAYERS, AGG_HEADS, D_EMB_TRIAL, dh)),
                  wo=w((AGG_LAYERS, AGG_HEADS, dh, D_EMB_TRIAL)),
                  gamma=jnp.ones((AGG_LAYERS, 1, D_EMB_TRIAL), jnp.float32),
                  beta=jnp.zeros((AGG_LAYERS, 1, D_EMB_TRIAL), jnp.float32)),
      # decoder: concat([x_subj, x_agg]) @ W  ==  x_subj@Ws + x_agg@Wa
      "dec": dict(ws=w((D_EMB_SUBJ, NCON)), wa=w((D_EMB_TRIAL, NCON)), b=zr(NCON)),
      # denoise net first layer split along concat axis [x_t | cond | t_emb]
      "dnet": dict(w1x=w((D_OUT, DHID)), w1c=w((NCON, DHID)),
                   w1t=w((TIME_EMB_DIM, DHID)), b1=zr(DHID),
                   w2=w((DHID, DHID)), b2=zr(DHID),
                   w3=w((DHID, D_OUT)), b3=zr(D_OUT)),
  }


def forward(params, X_subj, X, mask, labels, noise_key):
  Bb, Ss, Dt = X.shape
  BS = Bb * Ss
  xtf = X.reshape(BS, Dt)
  maskf = mask.astype(jnp.float32).reshape(1, BS)

  # precompute tiny layout helpers outside the kernel (pure plumbing):
  #   attn_bias: block-diagonal-over-batch + key-validity additive mask
  #   pool_sel : (B, BS) masked-mean selector matrix
  batch_ids = jnp.repeat(jnp.arange(Bb, dtype=jnp.int32), Ss)           # (BS,)
  same_b = batch_ids[:, None] == batch_ids[None, :]                     # (BS, BS)
  attn_bias = jnp.where(same_b & (maskf > 0.5), 0.0, -1e9).astype(jnp.float32)
  pool_sel = jnp.where(
      jnp.arange(Bb, dtype=jnp.int32)[:, None] == batch_ids[None, :],
      maskf, 0.0).astype(jnp.float32)                                   # (B, BS)

  # ConditionalDiffusion noising (randomness + schedule kept outside the kernel)
  k_t, k_eps = jax.random.split(noise_key)
  t = jax.random.randint(k_t, (Bb,), 0, T_DIFF)
  eps = jax.random.normal(k_eps, labels.shape, dtype=jnp.float32)
  betas = jnp.linspace(BETA_START, BETA_END, T_DIFF, dtype=jnp.float32)
  alpha_bar = jnp.cumprod(1.0 - betas)
  ab_t = alpha_bar[t][:, None]
  x_t = jnp.sqrt(ab_t) * labels + jnp.sqrt(1.0 - ab_t) * eps
  t_emb = sinusoidal_embedding(t, TIME_EMB_DIM)

  es, et, ag, de, dn = (params["enc_subj"], params["enc_trial"],
                        params["agg"], params["dec"], params["dnet"])
  args = [
      X_subj, xtf, attn_bias, pool_sel, x_t, eps, t_emb,
      es["w1"], es["b1"], es["w2"], es["b2"],
      et["w1"], et["b1"], et["w2"], et["b2"],
      ag["wq"], ag["wk"], ag["wv"], ag["wo"], ag["gamma"], ag["beta"],
      de["ws"], de["wa"], de["b"],
      dn["w1x"], dn["w1c"], dn["w1t"], dn["b1"],
      dn["w2"], dn["b2"], dn["w3"], dn["b3"],
  ]
  vmem = pl.BlockSpec(memory_space=pltpu.MemorySpace.VMEM)
  loss = pl.pallas_call(
      _fused_kernel,
      out_shape=jax.ShapeDtypeStruct((1, 1), jnp.float32),
      in_specs=[vmem] * len(args),
      out_specs=vmem,
  )(*args)
  return loss[0, 0]


# ----------------------------- main -----------------------------
if __name__ == "__main__":
  key = jax.random.PRNGKey(0)
  kp, kx1, kx2, km, ky, kn = jax.random.split(key, 6)
  params = init_params(kp)

  X_subj = jax.random.normal(kx1, (B, D_SUBJ), dtype=jnp.float32)
  X = jax.random.normal(kx2, (B, S, D_TRIAL), dtype=jnp.float32)
  mask = (jax.random.uniform(km, (B, S)) > 0.3).astype(jnp.float32)
  mask = mask.at[:, 0].set(1.0)  # ensure at least one valid trial per batch
  labels = jax.random.normal(ky, (B, D_OUT), dtype=jnp.float32)

  loss = jax.jit(forward)(params, X_subj, X, mask, labels, kn)
  jax.block_until_ready(loss)
  print("KERNEL_OK")
</pallas_src>

<mosaic_0001>
module attributes {stable_mosaic.version = 11 : i64} {
  func.func @_fused_kernel(%arg0: memref<2x16xf32, #tpu.memory_space<vmem>>, %arg1: memref<16x16xf32, #tpu.memory_space<vmem>>, %arg2: memref<16x16xf32, #tpu.memory_space<vmem>>, %arg3: memref<2x16xf32, #tpu.memory_space<vmem>>, %arg4: memref<2x4xf32, #tpu.memory_space<vmem>>, %arg5: memref<2x4xf32, #tpu.memory_space<vmem>>, %arg6: memref<2x128xf32, #tpu.memory_space<vmem>>, %arg7: memref<16x64xf32, #tpu.memory_space<vmem>>, %arg8: memref<1x64xf32, #tpu.memory_space<vmem>>, %arg9: memref<64x32xf32, #tpu.memory_space<vmem>>, %arg10: memref<1x32xf32, #tpu.memory_space<vmem>>, %arg11: memref<16x64xf32, #tpu.memory_space<vmem>>, %arg12: memref<1x64xf32, #tpu.memory_space<vmem>>, %arg13: memref<64x32xf32, #tpu.memory_space<vmem>>, %arg14: memref<1x32xf32, #tpu.memory_space<vmem>>, %arg15: memref<2x8x32x4xf32, #tpu.memory_space<vmem>>, %arg16: memref<2x8x32x4xf32, #tpu.memory_space<vmem>>, %arg17: memref<2x8x32x4xf32, #tpu.memory_space<vmem>>, %arg18: memref<2x8x4x32xf32, #tpu.memory_space<vmem>>, %arg19: memref<2x1x32xf32, #tpu.memory_space<vmem>>, %arg20: memref<2x1x32xf32, #tpu.memory_space<vmem>>, %arg21: memref<32x128xf32, #tpu.memory_space<vmem>>, %arg22: memref<32x128xf32, #tpu.memory_space<vmem>>, %arg23: memref<1x128xf32, #tpu.memory_space<vmem>>, %arg24: memref<4x256xf32, #tpu.memory_space<vmem>>, %arg25: memref<128x256xf32, #tpu.memory_space<vmem>>, %arg26: memref<128x256xf32, #tpu.memory_space<vmem>>, %arg27: memref<1x256xf32, #tpu.memory_space<vmem>>, %arg28: memref<256x256xf32, #tpu.memory_space<vmem>>, %arg29: memref<1x256xf32, #tpu.memory_space<vmem>>, %arg30: memref<256x4xf32, #tpu.memory_space<vmem>>, %arg31: memref<1x4xf32, #tpu.memory_space<vmem>>, %arg32: memref<1x1xf32, #tpu.memory_space<vmem>>) attributes {dimension_semantics = [], scalar_prefetch = 0 : i64, scratch_operands = 0 : i64, tpu.core_type = #tpu.core_type<tc>} {
    %c0 = arith.constant 0 : index
    %c0_0 = arith.constant 0 : index
    %0 = vector.load %arg0[%c0, %c0_0] : memref<2x16xf32, #tpu.memory_space<vmem>>, vector<2x16xf32>
    %c0_1 = arith.constant 0 : index
    %c0_2 = arith.constant 0 : index
    %1 = vector.load %arg7[%c0_1, %c0_2] : memref<16x64xf32, #tpu.memory_space<vmem>>, vector<16x64xf32>
    %cst = arith.constant dense<0.000000e+00> : vector<2x64xf32>
    %2 = tpu.matmul %0, %1, %cst {dimension_numbers = #tpu.dot_dimension_numbers<[1], [0], [0], [1], [0, 0, 1, 1], [], []>} : vector<2x16xf32>, vector<16x64xf32>, vector<2x64xf32> -> vector<2x64xf32>
    %c0_3 = arith.constant 0 : index
    %c0_4 = arith.constant 0 : index
    %3 = vector.load %arg8[%c0_3, %c0_4] : memref<1x64xf32, #tpu.memory_space<vmem>>, vector<1x64xf32>
    %4 = vector.broadcast %3 : vector<1x64xf32> to vector<2x64xf32>
    %5 = arith.addf %2, %4 : vector<2x64xf32>
    %cst_5 = arith.constant 0.000000e+00 : f32
    %6 = vector.broadcast %cst_5 : f32 to vector<2x64xf32>
    %7 = arith.maximumf %5, %6 : vector<2x64xf32>
    %c0_6 = arith.constant 0 : index
    %c0_7 = arith.constant 0 : index
    %8 = vector.load %arg9[%c0_6, %c0_7] : memref<64x32xf32, #tpu.memory_space<vmem>>, vector<64x32xf32>
    %cst_8 = arith.constant dense<0.000000e+00> : vector<2x32xf32>
    %9 = tpu.matmul %7, %8, %cst_8 {dimension_numbers = #tpu.dot_dimension_numbers<[1], [0], [0], [1], [0, 0, 1, 1], [], []>} : vector<2x64xf32>, vector<64x32xf32>, vector<2x32xf32> -> vector<2x32xf32>
    %c0_9 = arith.constant 0 : index
    %c0_10 = arith.constant 0 : index
    %10 = vector.load %arg10[%c0_9, %c0_10] : memref<1x32xf32, #tpu.memory_space<vmem>>, vector<1x32xf32>
    %11 = vector.broadcast %10 : vector<1x32xf32> to vector<2x32xf32>
    %12 = arith.addf %9, %11 : vector<2x32xf32>
    %c0_11 = arith.constant 0 : index
    %c0_12 = arith.constant 0 : index
    %13 = vector.load %arg1[%c0_11, %c0_12] : memref<16x16xf32, #tpu.memory_space<vmem>>, vector<16x16xf32>
    %c0_13 = arith.constant 0 : index
    %c0_14 = arith.constant 0 : index
    %14 = vector.load %arg11[%c0_13, %c0_14] : memref<16x64xf32, #tpu.memory_space<vmem>>, vector<16x64xf32>
    %cst_15 = arith.constant dense<0.000000e+00> : vector<16x64xf32>
    %15 = tpu.matmul %13, %14, %cst_15 {dimension_numbers = #tpu.dot_dimension_numbers<[1], [0], [0], [1], [0, 0, 1, 1], [], []>} : vector<16x16xf32>, vector<16x64xf32>, vector<16x64xf32> -> vector<16x64xf32>
    %c0_16 = arith.constant 0 : index
    %c0_17 = arith.constant 0 : index
    %16 = vector.load %arg12[%c0_16, %c0_17] : memref<1x64xf32, #tpu.memory_space<vmem>>, vector<1x64xf32>
    %17 = vector.broadcast %16 : vector<1x64xf32> to vector<16x64xf32>
    %18 = arith.addf %15, %17 : vector<16x64xf32>
    %cst_18 = arith.constant 0.000000e+00 : f32
    %19 = vector.broadcast %cst_18 : f32 to vector<16x64xf32>
    %20 = arith.maximumf %18, %19 : vector<16x64xf32>
    %c0_19 = arith.constant 0 : index
    %c0_20 = arith.constant 0 : index
    %21 = vector.load %arg13[%c0_19, %c0_20] : memref<64x32xf32, #tpu.memory_space<vmem>>, vector<64x32xf32>
    %cst_21 = arith.constant dense<0.000000e+00> : vector<16x32xf32>
    %22 = tpu.matmul %20, %21, %cst_21 {dimension_numbers = #tpu.dot_dimension_numbers<[1], [0], [0], [1], [0, 0, 1, 1], [], []>} : vector<16x64xf32>, vector<64x32xf32>, vector<16x32xf32> -> vector<16x32xf32>
    %c0_22 = arith.constant 0 : index
    %c0_23 = arith.constant 0 : index
    %23 = vector.load %arg14[%c0_22, %c0_23] : memref<1x32xf32, #tpu.memory_space<vmem>>, vector<1x32xf32>
    %24 = vector.broadcast %23 : vector<1x32xf32> to vector<16x32xf32>
    %25 = arith.addf %22, %24 : vector<16x32xf32>
    %c0_24 = arith.constant 0 : index
    %c0_25 = arith.constant 0 : index
    %26 = vector.load %arg2[%c0_24, %c0_25] : memref<16x16xf32, #tpu.memory_space<vmem>>, vector<16x16xf32>
    %c0_26 = arith.constant 0 : index
    %c0_27 = arith.constant 0 : index
    %c0_28 = arith.constant 0 : index
    %c0_29 = arith.constant 0 : index
    %27 = vector.load %arg15[%c0_26, %c0_27, %c0_28, %c0_29] : memref<2x8x32x4xf32, #tpu.memory_space<vmem>>, vector<1x1x32x4xf32>
    %28 = vector.shape_cast %27 : vector<1x1x32x4xf32> to vector<32x4xf32>
    %cst_30 = arith.constant dense<0.000000e+00> : vector<16x4xf32>
    %29 = tpu.matmul %25, %28, %cst_30 {dimension_numbers = #tpu.dot_dimension_numbers<[1], [0], [0], [1], [0, 0, 1, 1], [], []>} : vector<16x32xf32>, vector<32x4xf32>, vector<16x4xf32> -> vector<16x4xf32>
    %c0_31 = arith.constant 0 : index
    %c0_32 = arith.constant 0 : index
    %c0_33 = arith.constant 0 : index
    %c0_34 = arith.constant 0 : index
    %30 = vector.load %arg16[%c0_31, %c0_32, %c0_33, %c0_34] : memref<2x8x32x4xf32, #tpu.memory_space<vmem>>, vector<1x1x32x4xf32>
    %31 = vector.shape_cast %30 : vector<1x1x32x4xf32> to vector<32x4xf32>
    %cst_35 = arith.constant dense<0.000000e+00> : vector<16x4xf32>
    %32 = tpu.matmul %25, %31, %cst_35 {dimension_numbers = #tpu.dot_dimension_numbers<[1], [0], [0], [1], [0, 0, 1, 1], [], []>} : vector<16x32xf32>, vector<32x4xf32>, vector<16x4xf32> -> vector<16x4xf32>
    %c0_36 = arith.constant 0 : index
    %c0_37 = arith.constant 0 : index
    %c0_38 = arith.constant 0 : index
    %c0_39 = arith.constant 0 : index
    %33 = vector.load %arg17[%c0_36, %c0_37, %c0_38, %c0_39] : memref<2x8x32x4xf32, #tpu.memory_space<vmem>>, vector<1x1x32x4xf32>
    %34 = vector.shape_cast %33 : vector<1x1x32x4xf32> to vector<32x4xf32>
    %cst_40 = arith.constant dense<0.000000e+00> : vector<16x4xf32>
    %35 = tpu.matmul %25, %34, %cst_40 {dimension_numbers = #tpu.dot_dimension_numbers<[1], [0], [0], [1], [0, 0, 1, 1], [], []>} : vector<16x32xf32>, vector<32x4xf32>, vector<16x4xf32> -> vector<16x4xf32>
    %36 = tpu.transpose %32, [1, 0] : vector<16x4xf32> -> vector<4x16xf32>
    %cst_41 = arith.constant dense<0.000000e+00> : vector<16x16xf32>
    %37 = tpu.matmul %29, %36, %cst_41 {dimension_numbers = #tpu.dot_dimension_numbers<[1], [0], [0], [1], [0, 0, 1, 1], [], []>} : vector<16x4xf32>, vector<4x16xf32>, vector<16x16xf32> -> vector<16x16xf32>
    %cst_42 = arith.constant 5.000000e-01 : f32
    %38 = vector.broadcast %cst_42 : f32 to vector<16x16xf32>
    %39 = arith.mulf %37, %38 : vector<16x16xf32>
    %40 = arith.addf %39, %26 : vector<16x16xf32>
    %cst_43 = arith.constant dense<0xFF800000> : vector<16xf32>
    %41 = vector.multi_reduction <maximumf>, %40, %cst_43 [1] : vector<16x16xf32> to vector<16xf32>
    %42 = vector.shape_cast %41 : vector<16xf32> to vector<16x1xf32>
    %43 = vector.broadcast %42 : vector<16x1xf32> to vector<16x16xf32>
    %44 = arith.subf %40, %43 : vector<16x16xf32>
    %45 = math.exp %44 : vector<16x16xf32>
    %cst_44 = arith.constant dense<0.000000e+00> : vector<16xf32>
    %46 = vector.multi_reduction <add>, %45, %cst_44 [1] : vector<16x16xf32> to vector<16xf32>
    %47 = vector.shape_cast %46 : vector<16xf32> to vector<16x1xf32>
    %48 = tpu.reciprocal %47 {approx = true} : vector<16x1xf32> -> vector<16x1xf32>
    %49 = vector.broadcast %48 : vector<16x1xf32> to vector<16x16xf32>
    %50 = arith.mulf %45, %49 : vector<16x16xf32>
    %cst_45 = arith.constant dense<0.000000e+00> : vector<16x4xf32>
    %51 = tpu.matmul %50, %35, %cst_45 {dimension_numbers = #tpu.dot_dimension_numbers<[1], [0], [0], [1], [0, 0, 1, 1], [], []>} : vector<16x16xf32>, vector<16x4xf32>, vector<16x4xf32> -> vector<16x4xf32>
    %c0_46 = arith.constant 0 : index
    %c0_47 = arith.constant 0 : index
    %c0_48 = arith.constant 0 : index
    %c0_49 = arith.constant 0 : index
    %52 = vector.load %arg18[%c0_46, %c0_47, %c0_48, %c0_49] : memref<2x8x4x32xf32, #tpu.memory_space<vmem>>, vector<1x1x4x32xf32>
    %53 = vector.shape_cast %52 : vector<1x1x4x32xf32> to vector<4x32xf32>
    %cst_50 = arith.constant dense<0.000000e+00> : vector<16x32xf32>
    %54 = tpu.matmul %51, %53, %cst_50 {dimension_numbers = #tpu.dot_dimension_numbers<[1], [0], [0], [1], [0, 0, 1, 1], [], []>} : vector<16x4xf32>, vector<4x32xf32>, vector<16x32xf32> -> vector<16x32xf32>
    %c0_51 = arith.constant 0 : index
    %c1 = arith.constant 1 : index
    %c0_52 = arith.constant 0 : index
    %c0_53 = arith.constant 0 : index
    %55 = vector.load %arg15[%c0_51, %c1, %c0_52, %c0_53] : memref<2x8x32x4xf32, #tpu.memory_space<vmem>>, vector<1x1x32x4xf32>
    %56 = vector.shape_cast %55 : vector<1x1x32x4xf32> to vector<32x4xf32>
    %cst_54 = arith.constant dense<0.000000e+00> : vector<16x4xf32>
    %57 = tpu.matmul %25, %56, %cst_54 {dimension_numbers = #tpu.dot_dimension_numbers<[1], [0], [0], [1], [0, 0, 1, 1], [], []>} : vector<16x32xf32>, vector<32x4xf32>, vector<16x4xf32> -> vector<16x4xf32>
    %c0_55 = arith.constant 0 : index
    %c1_56 = arith.constant 1 : index
    %c0_57 = arith.constant 0 : index
    %c0_58 = arith.constant 0 : index
    %58 = vector.load %arg16[%c0_55, %c1_56, %c0_57, %c0_58] : memref<2x8x32x4xf32, #tpu.memory_space<vmem>>, vector<1x1x32x4xf32>
    %59 = vector.shape_cast %58 : vector<1x1x32x4xf32> to vector<32x4xf32>
    %cst_59 = arith.constant dense<0.000000e+00> : vector<16x4xf32>
    %60 = tpu.matmul %25, %59, %cst_59 {dimension_numbers = #tpu.dot_dimension_numbers<[1], [0], [0], [1], [0, 0, 1, 1], [], []>} : vector<16x32xf32>, vector<32x4xf32>, vector<16x4xf32> -> vector<16x4xf32>
    %c0_60 = arith.constant 0 : index
    %c1_61 = arith.constant 1 : index
    %c0_62 = arith.constant 0 : index
    %c0_63 = arith.constant 0 : index
    %61 = vector.load %arg17[%c0_60, %c1_61, %c0_62, %c0_63] : memref<2x8x32x4xf32, #tpu.memory_space<vmem>>, vector<1x1x32x4xf32>
    %62 = vector.shape_cast %61 : vector<1x1x32x4xf32> to vector<32x4xf32>
    %cst_64 = arith.constant dense<0.000000e+00> : vector<16x4xf32>
    %63 = tpu.matmul %25, %62, %cst_64 {dimension_numbers = #tpu.dot_dimension_numbers<[1], [0], [0], [1], [0, 0, 1, 1], [], []>} : vector<16x32xf32>, vector<32x4xf32>, vector<16x4xf32> -> vector<16x4xf32>
    %64 = tpu.transpose %60, [1, 0] : vector<16x4xf32> -> vector<4x16xf32>
    %cst_65 = arith.constant dense<0.000000e+00> : vector<16x16xf32>
    %65 = tpu.matmul %57, %64, %cst_65 {dimension_numbers = #tpu.dot_dimension_numbers<[1], [0], [0], [1], [0, 0, 1, 1], [], []>} : vector<16x4xf32>, vector<4x16xf32>, vector<16x16xf32> -> vector<16x16xf32>
    %cst_66 = arith.constant 5.000000e-01 : f32
    %66 = vector.broadcast %cst_66 : f32 to vector<16x16xf32>
    %67 = arith.mulf %65, %66 : vector<16x16xf32>
    %68 = arith.addf %67, %26 : vector<16x16xf32>
    %cst_67 = arith.constant dense<0xFF800000> : vector<16xf32>
    %69 = vector.multi_reduction <maximumf>, %68, %cst_67 [1] : vector<16x16xf32> to vector<16xf32>
    %70 = vector.shape_cast %69 : vector<16xf32> to vector<16x1xf32>
    %71 = vector.broadcast %70 : vector<16x1xf32> to vector<16x16xf32>
    %72 = arith.subf %68, %71 : vector<16x16xf32>
    %73 = math.exp %72 : vector<16x16xf32>
    %cst_68 = arith.constant dense<0.000000e+00> : vector<16xf32>
    %74 = vector.multi_reduction <add>, %73, %cst_68 [1] : vector<16x16xf32> to vector<16xf32>
    %75 = vector.shape_cast %74 : vector<16xf32> to vector<16x1xf32>
    %76 = tpu.reciprocal %75 {approx = true} : vector<16x1xf32> -> vector<16x1xf32>
    %77 = vector.broadcast %76 : vector<16x1xf32> to vector<16x16xf32>
    %78 = arith.mulf %73, %77 : vector<16x16xf32>
    %cst_69 = arith.constant dense<0.000000e+00> : vector<16x4xf32>
    %79 = tpu.matmul %78, %63, %cst_69 {dimension_numbers = #tpu.dot_dimension_numbers<[1], [0], [0], [1], [0, 0, 1, 1], [], []>} : vector<16x16xf32>, vector<16x4xf32>, vector<16x4xf32> -> vector<16x4xf32>
    %c0_70 = arith.constant 0 : index
    %c1_71 = arith.constant 1 : index
    %c0_72 = arith.constant 0 : index
    %c0_73 = arith.constant 0 : index
    %80 = vector.load %arg18[%c0_70, %c1_71, %c0_72, %c0_73] : memref<2x8x4x32xf32, #tpu.memory_space<vmem>>, vector<1x1x4x32xf32>
    %81 = vector.shape_cast %80 : vector<1x1x4x32xf32> to vector<4x32xf32>
    %cst_74 = arith.constant dense<0.000000e+00> : vector<16x32xf32>
    %82 = tpu.matmul %79, %81, %cst_74 {dimension_numbers = #tpu.dot_dimension_numbers<[1], [0], [0], [1], [0, 0, 1, 1], [], []>} : vector<16x4xf32>, vector<4x32xf32>, vector<16x32xf32> -> vector<16x32xf32>
    %83 = arith.addf %54, %82 : vector<16x32xf32>
    %c0_75 = arith.constant 0 : index
    %c2 = arith.constant 2 : index
    %c0_76 = arith.constant 0 : index
    %c0_77 = arith.constant 0 : index
    %84 = vector.load %arg15[%c0_75, %c2, %c0_76, %c0_77] : memref<2x8x32x4xf32, #tpu.memory_space<vmem>>, vector<1x1x32x4xf32>
    %85 = vector.shape_cast %84 : vector<1x1x32x4xf32> to vector<32x4xf32>
    %cst_78 = arith.constant dense<0.000000e+00> : vector<16x4xf32>
    %86 = tpu.matmul %25, %85, %cst_78 {dimension_numbers = #tpu.dot_dimension_numbers<[1], [0], [0], [1], [0, 0, 1, 1], [], []>} : vector<16x32xf32>, vector<32x4xf32>, vector<16x4xf32> -> vector<16x4xf32>
    %c0_79 = arith.constant 0 : index
    %c2_80 = arith.constant 2 : index
    %c0_81 = arith.constant 0 : index
    %c0_82 = arith.constant 0 : index
    %87 = vector.load %arg16[%c0_79, %c2_80, %c0_81, %c0_82] : memref<2x8x32x4xf32, #tpu.memory_space<vmem>>, vector<1x1x32x4xf32>
    %88 = vector.shape_cast %87 : vector<1x1x32x4xf32> to vector<32x4xf32>
    %cst_83 = arith.constant dense<0.000000e+00> : vector<16x4xf32>
    %89 = tpu.matmul %25, %88, %cst_83 {dimension_numbers = #tpu.dot_dimension_numbers<[1], [0], [0], [1], [0, 0, 1, 1], [], []>} : vector<16x32xf32>, vector<32x4xf32>, vector<16x4xf32> -> vector<16x4xf32>
    %c0_84 = arith.constant 0 : index
    %c2_85 = arith.constant 2 : index
    %c0_86 = arith.constant 0 : index
    %c0_87 = arith.constant 0 : index
    %90 = vector.load %arg17[%c0_84, %c2_85, %c0_86, %c0_87] : memref<2x8x32x4xf32, #tpu.memory_space<vmem>>, vector<1x1x32x4xf32>
    %91 = vector.shape_cast %90 : vector<1x1x32x4xf32> to vector<32x4xf32>
    %cst_88 = arith.constant dense<0.000000e+00> : vector<16x4xf32>
    %92 = tpu.matmul %25, %91, %cst_88 {dimension_numbers = #tpu.dot_dimension_numbers<[1], [0], [0], [1], [0, 0, 1, 1], [], []>} : vector<16x32xf32>, vector<32x4xf32>, vector<16x4xf32> -> vector<16x4xf32>
    %93 = tpu.transpose %89, [1, 0] : vector<16x4xf32> -> vector<4x16xf32>
    %cst_89 = arith.constant dense<0.000000e+00> : vector<16x16xf32>
    %94 = tpu.matmul %86, %93, %cst_89 {dimension_numbers = #tpu.dot_dimension_numbers<[1], [0], [0], [1], [0, 0, 1, 1], [], []>} : vector<16x4xf32>, vector<4x16xf32>, vector<16x16xf32> -> vector<16x16xf32>
    %cst_90 = arith.constant 5.000000e-01 : f32
    %95 = vector.broadcast %cst_90 : f32 to vector<16x16xf32>
    %96 = arith.mulf %94, %95 : vector<16x16xf32>
    %97 = arith.addf %96, %26 : vector<16x16xf32>
    %cst_91 = arith.constant dense<0xFF800000> : vector<16xf32>
    %98 = vector.multi_reduction <maximumf>, %97, %cst_91 [1] : vector<16x16xf32> to vector<16xf32>
    %99 = vector.shape_cast %98 : vector<16xf32> to vector<16x1xf32>
    %100 = vector.broadcast %99 : vector<16x1xf32> to vector<16x16xf32>
    %101 = arith.subf %97, %100 : vector<16x16xf32>
    %102 = math.exp %101 : vector<16x16xf32>
    %cst_92 = arith.constant dense<0.000000e+00> : vector<16xf32>
    %103 = vector.multi_reduction <add>, %102, %cst_92 [1] : vector<16x16xf32> to vector<16xf32>
    %104 = vector.shape_cast %103 : vector<16xf32> to vector<16x1xf32>
    %105 = tpu.reciprocal %104 {approx = true} : vector<16x1xf32> -> vector<16x1xf32>
    %106 = vector.broadcast %105 : vector<16x1xf32> to vector<16x16xf32>
    %107 = arith.mulf %102, %106 : vector<16x16xf32>
    %cst_93 = arith.constant dense<0.000000e+00> : vector<16x4xf32>
    %108 = tpu.matmul %107, %92, %cst_93 {dimension_numbers = #tpu.dot_dimension_numbers<[1], [0], [0], [1], [0, 0, 1, 1], [], []>} : vector<16x16xf32>, vector<16x4xf32>, vector<16x4xf32> -> vector<16x4xf32>
    %c0_94 = arith.constant 0 : index
    %c2_95 = arith.constant 2 : index
    %c0_96 = arith.constant 0 : index
    %c0_97 = arith.constant 0 : index
    %109 = vector.load %arg18[%c0_94, %c2_95, %c0_96, %c0_97] : memref<2x8x4x32xf32, #tpu.memory_space<vmem>>, vector<1x1x4x32xf32>
    %110 = vector.shape_cast %109 : vector<1x1x4x32xf32> to vector<4x32xf32>
    %cst_98 = arith.constant dense<0.000000e+00> : vector<16x32xf32>
    %111 = tpu.matmul %108, %110, %cst_98 {dimension_numbers = #tpu.dot_dimension_numbers<[1], [0], [0], [1], [0, 0, 1, 1], [], []>} : vector<16x4xf32>, vector<4x32xf32>, vector<16x32xf32> -> vector<16x32xf32>
    %112 = arith.addf %83, %111 : vector<16x32xf32>
    %c0_99 = arith.constant 0 : index
    %c3 = arith.constant 3 : index
    %c0_100 = arith.constant 0 : index
    %c0_101 = arith.constant 0 : index
    %113 = vector.load %arg15[%c0_99, %c3, %c0_100, %c0_101] : memref<2x8x32x4xf32, #tpu.memory_space<vmem>>, vector<1x1x32x4xf32>
    %114 = vector.shape_cast %113 : vector<1x1x32x4xf32> to vector<32x4xf32>
    %cst_102 = arith.constant dense<0.000000e+00> : vector<16x4xf32>
    %115 = tpu.matmul %25, %114, %cst_102 {dimension_numbers = #tpu.dot_dimension_numbers<[1], [0], [0], [1], [0, 0, 1, 1], [], []>} : vector<16x32xf32>, vector<32x4xf32>, vector<16x4xf32> -> vector<16x4xf32>
    %c0_103 = arith.constant 0 : index
    %c3_104 = arith.constant 3 : index
    %c0_105 = arith.constant 0 : index
    %c0_106 = arith.constant 0 : index
    %116 = vector.load %arg16[%c0_103, %c3_104, %c0_105, %c0_106] : memref<2x8x32x4xf32, #tpu.memory_space<vmem>>, vector<1x1x32x4xf32>
    %117 = vector.shape_cast %116 : vector<1x1x32x4xf32> to vector<32x4xf32>
    %cst_107 = arith.constant dense<0.000000e+00> : vector<16x4xf32>
    %118 = tpu.matmul %25, %117, %cst_107 {dimension_numbers = #tpu.dot_dimension_numbers<[1], [0], [0], [1], [0, 0, 1, 1], [], []>} : vector<16x32xf32>, vector<32x4xf32>, vector<16x4xf32> -> vector<16x4xf32>
    %c0_108 = arith.constant 0 : index
    %c3_109 = arith.constant 3 : index
    %c0_110 = arith.constant 0 : index
    %c0_111 = arith.constant 0 : index
    %119 = vector.load %arg17[%c0_108, %c3_109, %c0_110, %c0_111] : memref<2x8x32x4xf32, #tpu.memory_space<vmem>>, vector<1x1x32x4xf32>
    %120 = vector.shape_cast %119 : vector<1x1x32x4xf32> to vector<32x4xf32>
    %cst_112 = arith.constant dense<0.000000e+00> : vector<16x4xf32>
    %121 = tpu.matmul %25, %120, %cst_112 {dimension_numbers = #tpu.dot_dimension_numbers<[1], [0], [0], [1], [0, 0, 1, 1], [], []>} : vector<16x32xf32>, vector<32x4xf32>, vector<16x4xf32> -> vector<16x4xf32>
    %122 = tpu.transpose %118, [1, 0] : vector<16x4xf32> -> vector<4x16xf32>
    %cst_113 = arith.constant dense<0.000000e+00> : vector<16x16xf32>
    %123 = tpu.matmul %115, %122, %cst_113 {dimension_numbers = #tpu.dot_dimension_numbers<[1], [0], [0], [1], [0, 0, 1, 1], [], []>} : vector<16x4xf32>, vector<4x16xf32>, vector<16x16xf32> -> vector<16x16xf32>
    %cst_114 = arith.constant 5.000000e-01 : f32
    %124 = vector.broadcast %cst_114 : f32 to vector<16x16xf32>
    %125 = arith.mulf %123, %124 : vector<16x16xf32>
    %126 = arith.addf %125, %26 : vector<16x16xf32>
    %cst_115 = arith.constant dense<0xFF800000> : vector<16xf32>
    %127 = vector.multi_reduction <maximumf>, %126, %cst_115 [1] : vector<16x16xf32> to vector<16xf32>
    %128 = vector.shape_cast %127 : vector<16xf32> to vector<16x1xf32>
    %129 = vector.broadcast %128 : vector<16x1xf32> to vector<16x16xf32>
    %130 = arith.subf %126, %129 : vector<16x16xf32>
    %131 = math.exp %130 : vector<16x16xf32>
    %cst_116 = arith.constant dense<0.000000e+00> : vector<16xf32>
    %132 = vector.multi_reduction <add>, %131, %cst_116 [1] : vector<16x16xf32> to vector<16xf32>
    %133 = vector.shape_cast %132 : vector<16xf32> to vector<16x1xf32>
    %134 = tpu.reciprocal %133 {approx = true} : vector<16x1xf32> -> vector<16x1xf32>
    %135 = vector.broadcast %134 : vector<16x1xf32> to vector<16x16xf32>
    %136 = arith.mulf %131, %135 : vector<16x16xf32>
    %cst_117 = arith.constant dense<0.000000e+00> : vector<16x4xf32>
    %137 = tpu.matmul %136, %121, %cst_117 {dimension_numbers = #tpu.dot_dimension_numbers<[1], [0], [0], [1], [0, 0, 1, 1], [], []>} : vector<16x16xf32>, vector<16x4xf32>, vector<16x4xf32> -> vector<16x4xf32>
    %c0_118 = arith.constant 0 : index
    %c3_119 = arith.constant 3 : index
    %c0_120 = arith.constant 0 : index
    %c0_121 = arith.constant 0 : index
    %138 = vector.load %arg18[%c0_118, %c3_119, %c0_120, %c0_121] : memref<2x8x4x32xf32, #tpu.memory_space<vmem>>, vector<1x1x4x32xf32>
    %139 = vector.shape_cast %138 : vector<1x1x4x32xf32> to vector<4x32xf32>
    %cst_122 = arith.constant dense<0.000000e+00> : vector<16x32xf32>
    %140 = tpu.matmul %137, %139, %cst_122 {dimension_numbers = #tpu.dot_dimension_numbers<[1], [0], [0], [1], [0, 0, 1, 1], [], []>} : vector<16x4xf32>, vector<4x32xf32>, vector<16x32xf32> -> vector<16x32xf32>
    %141 = arith.addf %112, %140 : vector<16x32xf32>
    %c0_123 = arith.constant 0 : index
    %c4 = arith.constant 4 : index
    %c0_124 = arith.constant 0 : index
    %c0_125 = arith.constant 0 : index
    %142 = vector.load %arg15[%c0_123, %c4, %c0_124, %c0_125] : memref<2x8x32x4xf32, #tpu.memory_space<vmem>>, vector<1x1x32x4xf32>
    %143 = vector.shape_cast %142 : vector<1x1x32x4xf32> to vector<32x4xf32>
    %cst_126 = arith.constant dense<0.000000e+00> : vector<16x4xf32>
    %144 = tpu.matmul %25, %143, %cst_126 {dimension_numbers = #tpu.dot_dimension_numbers<[1], [0], [0], [1], [0, 0, 1, 1], [], []>} : vector<16x32xf32>, vector<32x4xf32>, vector<16x4xf32> -> vector<16x4xf32>
    %c0_127 = arith.constant 0 : index
    %c4_128 = arith.constant 4 : index
    %c0_129 = arith.constant 0 : index
    %c0_130 = arith.constant 0 : index
    %145 = vector.load %arg16[%c0_127, %c4_128, %c0_129, %c0_130] : memref<2x8x32x4xf32, #tpu.memory_space<vmem>>, vector<1x1x32x4xf32>
    %146 = vector.shape_cast %145 : vector<1x1x32x4xf32> to vector<32x4xf32>
    %cst_131 = arith.constant dense<0.000000e+00> : vector<16x4xf32>
    %147 = tpu.matmul %25, %146, %cst_131 {dimension_numbers = #tpu.dot_dimension_numbers<[1], [0], [0], [1], [0, 0, 1, 1], [], []>} : vector<16x32xf32>, vector<32x4xf32>, vector<16x4xf32> -> vector<16x4xf32>
    %c0_132 = arith.constant 0 : index
    %c4_133 = arith.constant 4 : index
    %c0_134 = arith.constant 0 : index
    %c0_135 = arith.constant 0 : index
    %148 = vector.load %arg17[%c0_132, %c4_133, %c0_134, %c0_135] : memref<2x8x32x4xf32, #tpu.memory_space<vmem>>, vector<1x1x32x4xf32>
    %149 = vector.shape_cast %148 : vector<1x1x32x4xf32> to vector<32x4xf32>
    %cst_136 = arith.constant dense<0.000000e+00> : vector<16x4xf32>
    %150 = tpu.matmul %25, %149, %cst_136 {dimension_numbers = #tpu.dot_dimension_numbers<[1], [0], [0], [1], [0, 0, 1, 1], [], []>} : vector<16x32xf32>, vector<32x4xf32>, vector<16x4xf32> -> vector<16x4xf32>
    %151 = tpu.transpose %147, [1, 0] : vector<16x4xf32> -> vector<4x16xf32>
    %cst_137 = arith.constant dense<0.000000e+00> : vector<16x16xf32>
    %152 = tpu.matmul %144, %151, %cst_137 {dimension_numbers = #tpu.dot_dimension_numbers<[1], [0], [0], [1], [0, 0, 1, 1], [], []>} : vector<16x4xf32>, vector<4x16xf32>, vector<16x16xf32> -> vector<16x16xf32>
    %cst_138 = arith.constant 5.000000e-01 : f32
    %153 = vector.broadcast %cst_138 : f32 to vector<16x16xf32>
    %154 = arith.mulf %152, %153 : vector<16x16xf32>
    %155 = arith.addf %154, %26 : vector<16x16xf32>
    %cst_139 = arith.constant dense<0xFF800000> : vector<16xf32>
    %156 = vector.multi_reduction <maximumf>, %155, %cst_139 [1] : vector<16x16xf32> to vector<16xf32>
    %157 = vector.shape_cast %156 : vector<16xf32> to vector<16x1xf32>
    %158 = vector.broadcast %157 : vector<16x1xf32> to vector<16x16xf32>
    %159 = arith.subf %155, %158 : vector<16x16xf32>
    %160 = math.exp %159 : vector<16x16xf32>
    %cst_140 = arith.constant dense<0.000000e+00> : vector<16xf32>
    %161 = vector.multi_reduction <add>, %160, %cst_140 [1] : vector<16x16xf32> to vector<16xf32>
    %162 = vector.shape_cast %161 : vector<16xf32> to vector<16x1xf32>
    %163 = tpu.reciprocal %162 {approx = true} : vector<16x1xf32> -> vector<16x1xf32>
    %164 = vector.broadcast %163 : vector<16x1xf32> to vector<16x16xf32>
    %165 = arith.mulf %160, %164 : vector<16x16xf32>
    %cst_141 = arith.constant dense<0.000000e+00> : vector<16x4xf32>
    %166 = tpu.matmul %165, %150, %cst_141 {dimension_numbers = #tpu.dot_dimension_numbers<[1], [0], [0], [1], [0, 0, 1, 1], [], []>} : vector<16x16xf32>, vector<16x4xf32>, vector<16x4xf32> -> vector<16x4xf32>
    %c0_142 = arith.constant 0 : index
    %c4_143 = arith.constant 4 : index
    %c0_144 = arith.constant 0 : index
    %c0_145 = arith.constant 0 : index
    %167 = vector.load %arg18[%c0_142, %c4_143, %c0_144, %c0_145] : memref<2x8x4x32xf32, #tpu.memory_space<vmem>>, vector<1x1x4x32xf32>
    %168 = vector.shape_cast %167 : vector<1x1x4x32xf32> to vector<4x32xf32>
    %cst_146 = arith.constant dense<0.000000e+00> : vector<16x32xf32>
    %169 = tpu.matmul %166, %168, %cst_146 {dimension_numbers = #tpu.dot_dimension_numbers<[1], [0], [0], [1], [0, 0, 1, 1], [], []>} : vector<16x4xf32>, vector<4x32xf32>, vector<16x32xf32> -> vector<16x32xf32>
    %170 = arith.addf %141, %169 : vector<16x32xf32>
    %c0_147 = arith.constant 0 : index
    %c5 = arith.constant 5 : index
    %c0_148 = arith.constant 0 : index
    %c0_149 = arith.constant 0 : index
    %171 = vector.load %arg15[%c0_147, %c5, %c0_148, %c0_149] : memref<2x8x32x4xf32, #tpu.memory_space<vmem>>, vector<1x1x32x4xf32>
    %172 = vector.shape_cast %171 : vector<1x1x32x4xf32> to vector<32x4xf32>
    %cst_150 = arith.constant dense<0.000000e+00> : vector<16x4xf32>
    %173 = tpu.matmul %25, %172, %cst_150 {dimension_numbers = #tpu.dot_dimension_numbers<[1], [0], [0], [1], [0, 0, 1, 1], [], []>} : vector<16x32xf32>, vector<32x4xf32>, vector<16x4xf32> -> vector<16x4xf32>
    %c0_151 = arith.constant 0 : index
    %c5_152 = arith.constant 5 : index
    %c0_153 = arith.constant 0 : index
    %c0_154 = arith.constant 0 : index
    %174 = vector.load %arg16[%c0_151, %c5_152, %c0_153, %c0_154] : memref<2x8x32x4xf32, #tpu.memory_space<vmem>>, vector<1x1x32x4xf32>
    %175 = vector.shape_cast %174 : vector<1x1x32x4xf32> to vector<32x4xf32>
    %cst_155 = arith.constant dense<0.000000e+00> : vector<16x4xf32>
    %176 = tpu.matmul %25, %175, %cst_155 {dimension_numbers = #tpu.dot_dimension_numbers<[1], [0], [0], [1], [0, 0, 1, 1], [], []>} : vector<16x32xf32>, vector<32x4xf32>, vector<16x4xf32> -> vector<16x4xf32>
    %c0_156 = arith.constant 0 : index
    %c5_157 = arith.constant 5 : index
    %c0_158 = arith.constant 0 : index
    %c0_159 = arith.constant 0 : index
    %177 = vector.load %arg17[%c0_156, %c5_157, %c0_158, %c0_159] : memref<2x8x32x4xf32, #tpu.memory_space<vmem>>, vector<1x1x32x4xf32>
    %178 = vector.shape_cast %177 : vector<1x1x32x4xf32> to vector<32x4xf32>
    %cst_160 = arith.constant dense<0.000000e+00> : vector<16x4xf32>
    %179 = tpu.matmul %25, %178, %cst_160 {dimension_numbers = #tpu.dot_dimension_numbers<[1], [0], [0], [1], [0, 0, 1, 1], [], []>} : vector<16x32xf32>, vector<32x4xf32>, vector<16x4xf32> -> vector<16x4xf32>
    %180 = tpu.transpose %176, [1, 0] : vector<16x4xf32> -> vector<4x16xf32>
    %cst_161 = arith.constant dense<0.000000e+00> : vector<16x16xf32>
    %181 = tpu.matmul %173, %180, %cst_161 {dimension_numbers = #tpu.dot_dimension_numbers<[1], [0], [0], [1], [0, 0, 1, 1], [], []>} : vector<16x4xf32>, vector<4x16xf32>, vector<16x16xf32> -> vector<16x16xf32>
    %cst_162 = arith.constant 5.000000e-01 : f32
    %182 = vector.broadcast %cst_162 : f32 to vector<16x16xf32>
    %183 = arith.mulf %181, %182 : vector<16x16xf32>
    %184 = arith.addf %183, %26 : vector<16x16xf32>
    %cst_163 = arith.constant dense<0xFF800000> : vector<16xf32>
    %185 = vector.multi_reduction <maximumf>, %184, %cst_163 [1] : vector<16x16xf32> to vector<16xf32>
    %186 = vector.shape_cast %185 : vector<16xf32> to vector<16x1xf32>
    %187 = vector.broadcast %186 : vector<16x1xf32> to vector<16x16xf32>
    %188 = arith.subf %184, %187 : vector<16x16xf32>
    %189 = math.exp %188 : vector<16x16xf32>
    %cst_164 = arith.constant dense<0.000000e+00> : vector<16xf32>
    %190 = vector.multi_reduction <add>, %189, %cst_164 [1] : vector<16x16xf32> to vector<16xf32>
    %191 = vector.shape_cast %190 : vector<16xf32> to vector<16x1xf32>
    %192 = tpu.reciprocal %191 {approx = true} : vector<16x1xf32> -> vector<16x1xf32>
    %193 = vector.broadcast %192 : vector<16x1xf32> to vector<16x16xf32>
    %194 = arith.mulf %189, %193 : vector<16x16xf32>
    %cst_165 = arith.constant dense<0.000000e+00> : vector<16x4xf32>
    %195 = tpu.matmul %194, %179, %cst_165 {dimension_numbers = #tpu.dot_dimension_numbers<[1], [0], [0], [1], [0, 0, 1, 1], [], []>} : vector<16x16xf32>, vector<16x4xf32>, vector<16x4xf32> -> vector<16x4xf32>
    %c0_166 = arith.constant 0 : index
    %c5_167 = arith.constant 5 : index
    %c0_168 = arith.constant 0 : index
    %c0_169 = arith.constant 0 : index
    %196 = vector.load %arg18[%c0_166, %c5_167, %c0_168, %c0_169] : memref<2x8x4x32xf32, #tpu.memory_space<vmem>>, vector<1x1x4x32xf32>
    %197 = vector.shape_cast %196 : vector<1x1x4x32xf32> to vector<4x32xf32>
    %cst_170 = arith.constant dense<0.000000e+00> : vector<16x32xf32>
    %198 = tpu.matmul %195, %197, %cst_170 {dimension_numbers = #tpu.dot_dimension_numbers<[1], [0], [0], [1], [0, 0, 1, 1], [], []>} : vector<16x4xf32>, vector<4x32xf32>, vector<16x32xf32> -> vector<16x32xf32>
    %199 = arith.addf %170, %198 : vector<16x32xf32>
    %c0_171 = arith.constant 0 : index
    %c6 = arith.constant 6 : index
    %c0_172 = arith.constant 0 : index
    %c0_173 = arith.constant 0 : index
    %200 = vector.load %arg15[%c0_171, %c6, %c0_172, %c0_173] : memref<2x8x32x4xf32, #tpu.memory_space<vmem>>, vector<1x1x32x4xf32>
    %201 = vector.shape_cast %200 : vector<1x1x32x4xf32> to vector<32x4xf32>
    %cst_174 = arith.constant dense<0.000000e+00> : vector<16x4xf32>
    %202 = tpu.matmul %25, %201, %cst_174 {dimension_numbers = #tpu.dot_dimension_numbers<[1], [0], [0], [1], [0, 0, 1, 1], [], []>} : vector<16x32xf32>, vector<32x4xf32>, vector<16x4xf32> -> vector<16x4xf32>
    %c0_175 = arith.constant 0 : index
    %c6_176 = arith.constant 6 : index
    %c0_177 = arith.constant 0 : index
    %c0_178 = arith.constant 0 : index
    %203 = vector.load %arg16[%c0_175, %c6_176, %c0_177, %c0_178] : memref<2x8x32x4xf32, #tpu.memory_space<vmem>>, vector<1x1x32x4xf32>
    %204 = vector.shape_cast %203 : vector<1x1x32x4xf32> to vector<32x4xf32>
    %cst_179 = arith.constant dense<0.000000e+00> : vector<16x4xf32>
    %205 = tpu.matmul %25, %204, %cst_179 {dimension_numbers = #tpu.dot_dimension_numbers<[1], [0], [0], [1], [0, 0, 1, 1], [], []>} : vector<16x32xf32>, vector<32x4xf32>, vector<16x4xf32> -> vector<16x4xf32>
    %c0_180 = arith.constant 0 : index
    %c6_181 = arith.constant 6 : index
    %c0_182 = arith.constant 0 : index
    %c0_183 = arith.constant 0 : index
    %206 = vector.load %arg17[%c0_180, %c6_181, %c0_182, %c0_183] : memref<2x8x32x4xf32, #tpu.memory_space<vmem>>, vector<1x1x32x4xf32>
    %207 = vector.shape_cast %206 : vector<1x1x32x4xf32> to vector<32x4xf32>
    %cst_184 = arith.constant dense<0.000000e+00> : vector<16x4xf32>
    %208 = tpu.matmul %25, %207, %cst_184 {dimension_numbers = #tpu.dot_dimension_numbers<[1], [0], [0], [1], [0, 0, 1, 1], [], []>} : vector<16x32xf32>, vector<32x4xf32>, vector<16x4xf32> -> vector<16x4xf32>
    %209 = tpu.transpose %205, [1, 0] : vector<16x4xf32> -> vector<4x16xf32>
    %cst_185 = arith.constant dense<0.000000e+00> : vector<16x16xf32>
    %210 = tpu.matmul %202, %209, %cst_185 {dimension_numbers = #tpu.dot_dimension_numbers<[1], [0], [0], [1], [0, 0, 1, 1], [], []>} : vector<16x4xf32>, vector<4x16xf32>, vector<16x16xf32> -> vector<16x16xf32>
    %cst_186 = arith.constant 5.000000e-01 : f32
    %211 = vector.broadcast %cst_186 : f32 to vector<16x16xf32>
    %212 = arith.mulf %210, %211 : vector<16x16xf32>
    %213 = arith.addf %212, %26 : vector<16x16xf32>
    %cst_187 = arith.constant dense<0xFF800000> : vector<16xf32>
    %214 = vector.multi_reduction <maximumf>, %213, %cst_187 [1] : vector<16x16xf32> to vector<16xf32>
    %215 = vector.shape_cast %214 : vector<16xf32> to vector<16x1xf32>
    %216 = vector.broadcast %215 : vector<16x1xf32> to vector<16x16xf32>
    %217 = arith.subf %213, %216 : vector<16x16xf32>
    %218 = math.exp %217 : vector<16x16xf32>
    %cst_188 = arith.constant dense<0.000000e+00> : vector<16xf32>
    %219 = vector.multi_reduction <add>, %218, %cst_188 [1] : vector<16x16xf32> to vector<16xf32>
    %220 = vector.shape_cast %219 : vector<16xf32> to vector<16x1xf32>
    %221 = tpu.reciprocal %220 {approx = true} : vector<16x1xf32> -> vector<16x1xf32>
    %222 = vector.broadcast %221 : vector<16x1xf32> to vector<16x16xf32>
    %223 = arith.mulf %218, %222 : vector<16x16xf32>
    %cst_189 = arith.constant dense<0.000000e+00> : vector<16x4xf32>
    %224 = tpu.matmul %223, %208, %cst_189 {dimension_numbers = #tpu.dot_dimension_numbers<[1], [0], [0], [1], [0, 0, 1, 1], [], []>} : vector<16x16xf32>, vector<16x4xf32>, vector<16x4xf32> -> vector<16x4xf32>
    %c0_190 = arith.constant 0 : index
    %c6_191 = arith.constant 6 : index
    %c0_192 = arith.constant 0 : index
    %c0_193 = arith.constant 0 : index
    %225 = vector.load %arg18[%c0_190, %c6_191, %c0_192, %c0_193] : memref<2x8x4x32xf32, #tpu.memory_space<vmem>>, vector<1x1x4x32xf32>
    %226 = vector.shape_cast %225 : vector<1x1x4x32xf32> to vector<4x32xf32>
    %cst_194 = arith.constant dense<0.000000e+00> : vector<16x32xf32>
    %227 = tpu.matmul %224, %226, %cst_194 {dimension_numbers = #tpu.dot_dimension_numbers<[1], [0], [0], [1], [0, 0, 1, 1], [], []>} : vector<16x4xf32>, vector<4x32xf32>, vector<16x32xf32> -> vector<16x32xf32>
    %228 = arith.addf %199, %227 : vector<16x32xf32>
    %c0_195 = arith.constant 0 : index
    %c7 = arith.constant 7 : index
    %c0_196 = arith.constant 0 : index
    %c0_197 = arith.constant 0 : index
    %229 = vector.load %arg15[%c0_195, %c7, %c0_196, %c0_197] : memref<2x8x32x4xf32, #tpu.memory_space<vmem>>, vector<1x1x32x4xf32>
    %230 = vector.shape_cast %229 : vector<1x1x32x4xf32> to vector<32x4xf32>
    %cst_198 = arith.constant dense<0.000000e+00> : vector<16x4xf32>
    %231 = tpu.matmul %25, %230, %cst_198 {dimension_numbers = #tpu.dot_dimension_numbers<[1], [0], [0], [1], [0, 0, 1, 1], [], []>} : vector<16x32xf32>, vector<32x4xf32>, vector<16x4xf32> -> vector<16x4xf32>
    %c0_199 = arith.constant 0 : index
    %c7_200 = arith.constant 7 : index
    %c0_201 = arith.constant 0 : index
    %c0_202 = arith.constant 0 : index
    %232 = vector.load %arg16[%c0_199, %c7_200, %c0_201, %c0_202] : memref<2x8x32x4xf32, #tpu.memory_space<vmem>>, vector<1x1x32x4xf32>
    %233 = vector.shape_cast %232 : vector<1x1x32x4xf32> to vector<32x4xf32>
    %cst_203 = arith.constant dense<0.000000e+00> : vector<16x4xf32>
    %234 = tpu.matmul %25, %233, %cst_203 {dimension_numbers = #tpu.dot_dimension_numbers<[1], [0], [0], [1], [0, 0, 1, 1], [], []>} : vector<16x32xf32>, vector<32x4xf32>, vector<16x4xf32> -> vector<16x4xf32>
    %c0_204 = arith.constant 0 : index
    %c7_205 = arith.constant 7 : index
    %c0_206 = arith.constant 0 : index
    %c0_207 = arith.constant 0 : index
    %235 = vector.load %arg17[%c0_204, %c7_205, %c0_206, %c0_207] : memref<2x8x32x4xf32, #tpu.memory_space<vmem>>, vector<1x1x32x4xf32>
    %236 = vector.shape_cast %235 : vector<1x1x32x4xf32> to vector<32x4xf32>
    %cst_208 = arith.constant dense<0.000000e+00> : vector<16x4xf32>
    %237 = tpu.matmul %25, %236, %cst_208 {dimension_numbers = #tpu.dot_dimension_numbers<[1], [0], [0], [1], [0, 0, 1, 1], [], []>} : vector<16x32xf32>, vector<32x4xf32>, vector<16x4xf32> -> vector<16x4xf32>
    %238 = tpu.transpose %234, [1, 0] : vector<16x4xf32> -> vector<4x16xf32>
    %cst_209 = arith.constant dense<0.000000e+00> : vector<16x16xf32>
    %239 = tpu.matmul %231, %238, %cst_209 {dimension_numbers = #tpu.dot_dimension_numbers<[1], [0], [0], [1], [0, 0, 1, 1], [], []>} : vector<16x4xf32>, vector<4x16xf32>, vector<16x16xf32> -> vector<16x16xf32>
    %cst_210 = arith.constant 5.000000e-01 : f32
    %240 = vector.broadcast %cst_210 : f32 to vector<16x16xf32>
    %241 = arith.mulf %239, %240 : vector<16x16xf32>
    %242 = arith.addf %241, %26 : vector<16x16xf32>
    %cst_211 = arith.constant dense<0xFF800000> : vector<16xf32>
    %243 = vector.multi_reduction <maximumf>, %242, %cst_211 [1] : vector<16x16xf32> to vector<16xf32>
    %244 = vector.shape_cast %243 : vector<16xf32> to vector<16x1xf32>
    %245 = vector.broadcast %244 : vector<16x1xf32> to vector<16x16xf32>
    %246 = arith.subf %242, %245 : vector<16x16xf32>
    %247 = math.exp %246 : vector<16x16xf32>
    %cst_212 = arith.constant dense<0.000000e+00> : vector<16xf32>
    %248 = vector.multi_reduction <add>, %247, %cst_212 [1] : vector<16x16xf32> to vector<16xf32>
    %249 = vector.shape_cast %248 : vector<16xf32> to vector<16x1xf32>
    %250 = tpu.reciprocal %249 {approx = true} : vector<16x1xf32> -> vector<16x1xf32>
    %251 = vector.broadcast %250 : vector<16x1xf32> to vector<16x16xf32>
    %252 = arith.mulf %247, %251 : vector<16x16xf32>
    %cst_213 = arith.constant dense<0.000000e+00> : vector<16x4xf32>
    %253 = tpu.matmul %252, %237, %cst_213 {dimension_numbers = #tpu.dot_dimension_numbers<[1], [0], [0], [1], [0, 0, 1, 1], [], []>} : vector<16x16xf32>, vector<16x4xf32>, vector<16x4xf32> -> vector<16x4xf32>
    %c0_214 = arith.constant 0 : index
    %c7_215 = arith.constant 7 : index
    %c0_216 = arith.constant 0 : index
    %c0_217 = arith.constant 0 : index
    %254 = vector.load %arg18[%c0_214, %c7_215, %c0_216, %c0_217] : memref<2x8x4x32xf32, #tpu.memory_space<vmem>>, vector<1x1x4x32xf32>
    %255 = vector.shape_cast %254 : vector<1x1x4x32xf32> to vector<4x32xf32>
    %cst_218 = arith.constant dense<0.000000e+00> : vector<16x32xf32>
    %256 = tpu.matmul %253, %255, %cst_218 {dimension_numbers = #tpu.dot_dimension_numbers<[1], [0], [0], [1], [0, 0, 1, 1], [], []>} : vector<16x4xf32>, vector<4x32xf32>, vector<16x32xf32> -> vector<16x32xf32>
    %257 = arith.addf %228, %256 : vector<16x32xf32>
    %258 = arith.addf %25, %257 : vector<16x32xf32>
    %cst_219 = arith.constant dense<0.000000e+00> : vector<16xf32>
    %259 = vector.multi_reduction <add>, %258, %cst_219 [1] : vector<16x32xf32> to vector<16xf32>
    %260 = vector.shape_cast %259 : vector<16xf32> to vector<16x1xf32>
    %cst_220 = arith.constant 3.200000e+01 : f32
    %261 = vector.broadcast %cst_220 : f32 to vector<16x1xf32>
    %262 = arith.divf %260, %261 : vector<16x1xf32>
    %263 = vector.broadcast %262 : vector<16x1xf32> to vector<16x32xf32>
    %264 = arith.subf %258, %263 : vector<16x32xf32>
    %265 = vector.broadcast %262 : vector<16x1xf32> to vector<16x32xf32>
    %266 = arith.subf %258, %265 : vector<16x32xf32>
    %267 = arith.mulf %264, %266 : vector<16x32xf32>
    %cst_221 = arith.constant dense<0.000000e+00> : vector<16xf32>
    %268 = vector.multi_reduction <add>, %267, %cst_221 [1] : vector<16x32xf32> to vector<16xf32>
    %269 = vector.shape_cast %268 : vector<16xf32> to vector<16x1xf32>
    %cst_222 = arith.constant 3.200000e+01 : f32
    %270 = vector.broadcast %cst_222 : f32 to vector<16x1xf32>
    %271 = arith.divf %269, %270 : vector<16x1xf32>
    %272 = vector.broadcast %262 : vector<16x1xf32> to vector<16x32xf32>
    %273 = arith.subf %258, %272 : vector<16x32xf32>
    %cst_223 = arith.constant 9.99999974E-6 : f32
    %274 = vector.broadcast %cst_223 : f32 to vector<16x1xf32>
    %275 = arith.addf %271, %274 : vector<16x1xf32>
    %276 = math.rsqrt %275 : vector<16x1xf32>
    %277 = vector.broadcast %276 : vector<16x1xf32> to vector<16x32xf32>
    %278 = arith.mulf %273, %277 : vector<16x32xf32>
    %c0_224 = arith.constant 0 : index
    %c0_225 = arith.constant 0 : index
    %c0_226 = arith.constant 0 : index
    %279 = vector.load %arg19[%c0_224, %c0_225, %c0_226] : memref<2x1x32xf32, #tpu.memory_space<vmem>>, vector<1x1x32xf32>
    %280 = vector.shape_cast %279 : vector<1x1x32xf32> to vector<1x32xf32>
    %281 = vector.broadcast %280 : vector<1x32xf32> to vector<16x32xf32>
    %282 = arith.mulf %278, %281 : vector<16x32xf32>
    %c0_227 = arith.constant 0 : index
    %c0_228 = arith.constant 0 : index
    %c0_229 = arith.constant 0 : index
    %283 = vector.load %arg20[%c0_227, %c0_228, %c0_229] : memref<2x1x32xf32, #tpu.memory_space<vmem>>, vector<1x1x32xf32>
    %284 = vector.shape_cast %283 : vector<1x1x32xf32> to vector<1x32xf32>
    %285 = vector.broadcast %284 : vector<1x32xf32> to vector<16x32xf32>
    %286 = arith.addf %282, %285 : vector<16x32xf32>
    %c1_230 = arith.constant 1 : index
    %c0_231 = arith.constant 0 : index
    %c0_232 = arith.constant 0 : index
    %c0_233 = arith.constant 0 : index
    %287 = vector.load %arg15[%c1_230, %c0_231, %c0_232, %c0_233] : memref<2x8x32x4xf32, #tpu.memory_space<vmem>>, vector<1x1x32x4xf32>
    %288 = vector.shape_cast %287 : vector<1x1x32x4xf32> to vector<32x4xf32>
    %cst_234 = arith.constant dense<0.000000e+00> : vector<16x4xf32>
    %289 = tpu.matmul %286, %288, %cst_234 {dimension_numbers = #tpu.dot_dimension_numbers<[1], [0], [0], [1], [0, 0, 1, 1], [], []>} : vector<16x32xf32>, vector<32x4xf32>, vector<16x4xf32> -> vector<16x4xf32>
    %c1_235 = arith.constant 1 : index
    %c0_236 = arith.constant 0 : index
    %c0_237 = arith.constant 0 : index
    %c0_238 = arith.constant 0 : index
    %290 = vector.load %arg16[%c1_235, %c0_236, %c0_237, %c0_238] : memref<2x8x32x4xf32, #tpu.memory_space<vmem>>, vector<1x1x32x4xf32>
    %291 = vector.shape_cast %290 : vector<1x1x32x4xf32> to vector<32x4xf32>
    %cst_239 = arith.constant dense<0.000000e+00> : vector<16x4xf32>
    %292 = tpu.matmul %286, %291, %cst_239 {dimension_numbers = #tpu.dot_dimension_numbers<[1], [0], [0], [1], [0, 0, 1, 1], [], []>} : vector<16x32xf32>, vector<32x4xf32>, vector<16x4xf32> -> vector<16x4xf32>
    %c1_240 = arith.constant 1 : index
    %c0_241 = arith.constant 0 : index
    %c0_242 = arith.constant 0 : index
    %c0_243 = arith.constant 0 : index
    %293 = vector.load %arg17[%c1_240, %c0_241, %c0_242, %c0_243] : memref<2x8x32x4xf32, #tpu.memory_space<vmem>>, vector<1x1x32x4xf32>
    %294 = vector.shape_cast %293 : vector<1x1x32x4xf32> to vector<32x4xf32>
    %cst_244 = arith.constant dense<0.000000e+00> : vector<16x4xf32>
    %295 = tpu.matmul %286, %294, %cst_244 {dimension_numbers = #tpu.dot_dimension_numbers<[1], [0], [0], [1], [0, 0, 1, 1], [], []>} : vector<16x32xf32>, vector<32x4xf32>, vector<16x4xf32> -> vector<16x4xf32>
    %296 = tpu.transpose %292, [1, 0] : vector<16x4xf32> -> vector<4x16xf32>
    %cst_245 = arith.constant dense<0.000000e+00> : vector<16x16xf32>
    %297 = tpu.matmul %289, %296, %cst_245 {dimension_numbers = #tpu.dot_dimension_numbers<[1], [0], [0], [1], [0, 0, 1, 1], [], []>} : vector<16x4xf32>, vector<4x16xf32>, vector<16x16xf32> -> vector<16x16xf32>
    %cst_246 = arith.constant 5.000000e-01 : f32
    %298 = vector.broadcast %cst_246 : f32 to vector<16x16xf32>
    %299 = arith.mulf %297, %298 : vector<16x16xf32>
    %300 = arith.addf %299, %26 : vector<16x16xf32>
    %cst_247 = arith.constant dense<0xFF800000> : vector<16xf32>
    %301 = vector.multi_reduction <maximumf>, %300, %cst_247 [1] : vector<16x16xf32> to vector<16xf32>
    %302 = vector.shape_cast %301 : vector<16xf32> to vector<16x1xf32>
    %303 = vector.broadcast %302 : vector<16x1xf32> to vector<16x16xf32>
    %304 = arith.subf %300, %303 : vector<16x16xf32>
    %305 = math.exp %304 : vector<16x16xf32>
    %cst_248 = arith.constant dense<0.000000e+00> : vector<16xf32>
    %306 = vector.multi_reduction <add>, %305, %cst_248 [1] : vector<16x16xf32> to vector<16xf32>
    %307 = vector.shape_cast %306 : vector<16xf32> to vector<16x1xf32>
    %308 = tpu.reciprocal %307 {approx = true} : vector<16x1xf32> -> vector<16x1xf32>
    %309 = vector.broadcast %308 : vector<16x1xf32> to vector<16x16xf32>
    %310 = arith.mulf %305, %309 : vector<16x16xf32>
    %cst_249 = arith.constant dense<0.000000e+00> : vector<16x4xf32>
    %311 = tpu.matmul %310, %295, %cst_249 {dimension_numbers = #tpu.dot_dimension_numbers<[1], [0], [0], [1], [0, 0, 1, 1], [], []>} : vector<16x16xf32>, vector<16x4xf32>, vector<16x4xf32> -> vector<16x4xf32>
    %c1_250 = arith.constant 1 : index
    %c0_251 = arith.constant 0 : index
    %c0_252 = arith.constant 0 : index
    %c0_253 = arith.constant 0 : index
    %312 = vector.load %arg18[%c1_250, %c0_251, %c0_252, %c0_253] : memref<2x8x4x32xf32, #tpu.memory_space<vmem>>, vector<1x1x4x32xf32>
    %313 = vector.shape_cast %312 : vector<1x1x4x32xf32> to vector<4x32xf32>
    %cst_254 = arith.constant dense<0.000000e+00> : vector<16x32xf32>
    %314 = tpu.matmul %311, %313, %cst_254 {dimension_numbers = #tpu.dot_dimension_numbers<[1], [0], [0], [1], [0, 0, 1, 1], [], []>} : vector<16x4xf32>, vector<4x32xf32>, vector<16x32xf32> -> vector<16x32xf32>
    %c1_255 = arith.constant 1 : index
    %c1_256 = arith.constant 1 : index
    %c0_257 = arith.constant 0 : index
    %c0_258 = arith.constant 0 : index
    %315 = vector.load %arg15[%c1_255, %c1_256, %c0_257, %c0_258] : memref<2x8x32x4xf32, #tpu.memory_space<vmem>>, vector<1x1x32x4xf32>
    %316 = vector.shape_cast %315 : vector<1x1x32x4xf32> to vector<32x4xf32>
    %cst_259 = arith.constant dense<0.000000e+00> : vector<16x4xf32>
    %317 = tpu.matmul %286, %316, %cst_259 {dimension_numbers = #tpu.dot_dimension_numbers<[1], [0], [0], [1], [0, 0, 1, 1], [], []>} : vector<16x32xf32>, vector<32x4xf32>, vector<16x4xf32> -> vector<16x4xf32>
    %c1_260 = arith.constant 1 : index
    %c1_261 = arith.constant 1 : index
    %c0_262 = arith.constant 0 : index
    %c0_263 = arith.constant 0 : index
    %318 = vector.load %arg16[%c1_260, %c1_261, %c0_262, %c0_263] : memref<2x8x32x4xf32, #tpu.memory_space<vmem>>, vector<1x1x32x4xf32>
    %319 = vector.shape_cast %318 : vector<1x1x32x4xf32> to vector<32x4xf32>
    %cst_264 = arith.constant dense<0.000000e+00> : vector<16x4xf32>
    %320 = tpu.matmul %286, %319, %cst_264 {dimension_numbers = #tpu.dot_dimension_numbers<[1], [0], [0], [1], [0, 0, 1, 1], [], []>} : vector<16x32xf32>, vector<32x4xf32>, vector<16x4xf32> -> vector<16x4xf32>
    %c1_265 = arith.constant 1 : index
    %c1_266 = arith.constant 1 : index
    %c0_267 = arith.constant 0 : index
    %c0_268 = arith.constant 0 : index
    %321 = vector.load %arg17[%c1_265, %c1_266, %c0_267, %c0_268] : memref<2x8x32x4xf32, #tpu.memory_space<vmem>>, vector<1x1x32x4xf32>
    %322 = vector.shape_cast %321 : vector<1x1x32x4xf32> to vector<32x4xf32>
    %cst_269 = arith.constant dense<0.000000e+00> : vector<16x4xf32>
    %323 = tpu.matmul %286, %322, %cst_269 {dimension_numbers = #tpu.dot_dimension_numbers<[1], [0], [0], [1], [0, 0, 1, 1], [], []>} : vector<16x32xf32>, vector<32x4xf32>, vector<16x4xf32> -> vector<16x4xf32>
    %324 = tpu.transpose %320, [1, 0] : vector<16x4xf32> -> vector<4x16xf32>
    %cst_270 = arith.constant dense<0.000000e+00> : vector<16x16xf32>
    %325 = tpu.matmul %317, %324, %cst_270 {dimension_numbers = #tpu.dot_dimension_numbers<[1], [0], [0], [1], [0, 0, 1, 1], [], []>} : vector<16x4xf32>, vector<4x16xf32>, vector<16x16xf32> -> vector<16x16xf32>
    %cst_271 = arith.constant 5.000000e-01 : f32
    %326 = vector.broadcast %cst_271 : f32 to vector<16x16xf32>
    %327 = arith.mulf %325, %326 : vector<16x16xf32>
    %328 = arith.addf %327, %26 : vector<16x16xf32>
    %cst_272 = arith.constant dense<0xFF800000> : vector<16xf32>
    %329 = vector.multi_reduction <maximumf>, %328, %cst_272 [1] : vector<16x16xf32> to vector<16xf32>
    %330 = vector.shape_cast %329 : vector<16xf32> to vector<16x1xf32>
    %331 = vector.broadcast %330 : vector<16x1xf32> to vector<16x16xf32>
    %332 = arith.subf %328, %331 : vector<16x16xf32>
    %333 = math.exp %332 : vector<16x16xf32>
    %cst_273 = arith.constant dense<0.000000e+00> : vector<16xf32>
    %334 = vector.multi_reduction <add>, %333, %cst_273 [1] : vector<16x16xf32> to vector<16xf32>
    %335 = vector.shape_cast %334 : vector<16xf32> to vector<16x1xf32>
    %336 = tpu.reciprocal %335 {approx = true} : vector<16x1xf32> -> vector<16x1xf32>
    %337 = vector.broadcast %336 : vector<16x1xf32> to vector<16x16xf32>
    %338 = arith.mulf %333, %337 : vector<16x16xf32>
    %cst_274 = arith.constant dense<0.000000e+00> : vector<16x4xf32>
    %339 = tpu.matmul %338, %323, %cst_274 {dimension_numbers = #tpu.dot_dimension_numbers<[1], [0], [0], [1], [0, 0, 1, 1], [], []>} : vector<16x16xf32>, vector<16x4xf32>, vector<16x4xf32> -> vector<16x4xf32>
    %c1_275 = arith.constant 1 : index
    %c1_276 = arith.constant 1 : index
    %c0_277 = arith.constant 0 : index
    %c0_278 = arith.constant 0 : index
    %340 = vector.load %arg18[%c1_275, %c1_276, %c0_277, %c0_278] : memref<2x8x4x32xf32, #tpu.memory_space<vmem>>, vector<1x1x4x32xf32>
    %341 = vector.shape_cast %340 : vector<1x1x4x32xf32> to vector<4x32xf32>
    %cst_279 = arith.constant dense<0.000000e+00> : vector<16x32xf32>
    %342 = tpu.matmul %339, %341, %cst_279 {dimension_numbers = #tpu.dot_dimension_numbers<[1], [0], [0], [1], [0, 0, 1, 1], [], []>} : vector<16x4xf32>, vector<4x32xf32>, vector<16x32xf32> -> vector<16x32xf32>
    %343 = arith.addf %314, %342 : vector<16x32xf32>
    %c1_280 = arith.constant 1 : index
    %c2_281 = arith.constant 2 : index
    %c0_282 = arith.constant 0 : index
    %c0_283 = arith.constant 0 : index
    %344 = vector.load %arg15[%c1_280, %c2_281, %c0_282, %c0_283] : memref<2x8x32x4xf32, #tpu.memory_space<vmem>>, vector<1x1x32x4xf32>
    %345 = vector.shape_cast %344 : vector<1x1x32x4xf32> to vector<32x4xf32>
    %cst_284 = arith.constant dense<0.000000e+00> : vector<16x4xf32>
    %346 = tpu.matmul %286, %345, %cst_284 {dimension_numbers = #tpu.dot_dimension_numbers<[1], [0], [0], [1], [0, 0, 1, 1], [], []>} : vector<16x32xf32>, vector<32x4xf32>, vector<16x4xf32> -> vector<16x4xf32>
    %c1_285 = arith.constant 1 : index
    %c2_286 = arith.constant 2 : index
    %c0_287 = arith.constant 0 : index
    %c0_288 = arith.constant 0 : index
    %347 = vector.load %arg16[%c1_285, %c2_286, %c0_287, %c0_288] : memref<2x8x32x4xf32, #tpu.memory_space<vmem>>, vector<1x1x32x4xf32>
    %348 = vector.shape_cast %347 : vector<1x1x32x4xf32> to vector<32x4xf32>
    %cst_289 = arith.constant dense<0.000000e+00> : vector<16x4xf32>
    %349 = tpu.matmul %286, %348, %cst_289 {dimension_numbers = #tpu.dot_dimension_numbers<[1], [0], [0], [1], [0, 0, 1, 1], [], []>} : vector<16x32xf32>, vector<32x4xf32>, vector<16x4xf32> -> vector<16x4xf32>
    %c1_290 = arith.constant 1 : index
    %c2_291 = arith.constant 2 : index
    %c0_292 = arith.constant 0 : index
    %c0_293 = arith.constant 0 : index
    %350 = vector.load %arg17[%c1_290, %c2_291, %c0_292, %c0_293] : memref<2x8x32x4xf32, #tpu.memory_space<vmem>>, vector<1x1x32x4xf32>
    %351 = vector.shape_cast %350 : vector<1x1x32x4xf32> to vector<32x4xf32>
    %cst_294 = arith.constant dense<0.000000e+00> : vector<16x4xf32>
    %352 = tpu.matmul %286, %351, %cst_294 {dimension_numbers = #tpu.dot_dimension_numbers<[1], [0], [0], [1], [0, 0, 1, 1], [], []>} : vector<16x32xf32>, vector<32x4xf32>, vector<16x4xf32> -> vector<16x4xf32>
    %353 = tpu.transpose %349, [1, 0] : vector<16x4xf32> -> vector<4x16xf32>
    %cst_295 = arith.constant dense<0.000000e+00> : vector<16x16xf32>
    %354 = tpu.matmul %346, %353, %cst_295 {dimension_numbers = #tpu.dot_dimension_numbers<[1], [0], [0], [1], [0, 0, 1, 1], [], []>} : vector<16x4xf32>, vector<4x16xf32>, vector<16x16xf32> -> vector<16x16xf32>
    %cst_296 = arith.constant 5.000000e-01 : f32
    %355 = vector.broadcast %cst_296 : f32 to vector<16x16xf32>
    %356 = arith.mulf %354, %355 : vector<16x16xf32>
    %357 = arith.addf %356, %26 : vector<16x16xf32>
    %cst_297 = arith.constant dense<0xFF800000> : vector<16xf32>
    %358 = vector.multi_reduction <maximumf>, %357, %cst_297 [1] : vector<16x16xf32> to vector<16xf32>
    %359 = vector.shape_cast %358 : vector<16xf32> to vector<16x1xf32>
    %360 = vector.broadcast %359 : vector<16x1xf32> to vector<16x16xf32>
    %361 = arith.subf %357, %360 : vector<16x16xf32>
    %362 = math.exp %361 : vector<16x16xf32>
    %cst_298 = arith.constant dense<0.000000e+00> : vector<16xf32>
    %363 = vector.multi_reduction <add>, %362, %cst_298 [1] : vector<16x16xf32> to vector<16xf32>
    %364 = vector.shape_cast %363 : vector<16xf32> to vector<16x1xf32>
    %365 = tpu.reciprocal %364 {approx = true} : vector<16x1xf32> -> vector<16x1xf32>
    %366 = vector.broadcast %365 : vector<16x1xf32> to vector<16x16xf32>
    %367 = arith.mulf %362, %366 : vector<16x16xf32>
    %cst_299 = arith.constant dense<0.000000e+00> : vector<16x4xf32>
    %368 = tpu.matmul %367, %352, %cst_299 {dimension_numbers = #tpu.dot_dimension_numbers<[1], [0], [0], [1], [0, 0, 1, 1], [], []>} : vector<16x16xf32>, vector<16x4xf32>, vector<16x4xf32> -> vector<16x4xf32>
    %c1_300 = arith.constant 1 : index
    %c2_301 = arith.constant 2 : index
    %c0_302 = arith.constant 0 : index
    %c0_303 = arith.constant 0 : index
    %369 = vector.load %arg18[%c1_300, %c2_301, %c0_302, %c0_303] : memref<2x8x4x32xf32, #tpu.memory_space<vmem>>, vector<1x1x4x32xf32>
    %370 = vector.shape_cast %369 : vector<1x1x4x32xf32> to vector<4x32xf32>
    %cst_304 = arith.constant dense<0.000000e+00> : vector<16x32xf32>
    %371 = tpu.matmul %368, %370, %cst_304 {dimension_numbers = #tpu.dot_dimension_numbers<[1], [0], [0], [1], [0, 0, 1, 1], [], []>} : vector<16x4xf32>, vector<4x32xf32>, vector<16x32xf32> -> vector<16x32xf32>
    %372 = arith.addf %343, %371 : vector<16x32xf32>
    %c1_305 = arith.constant 1 : index
    %c3_306 = arith.constant 3 : index
    %c0_307 = arith.constant 0 : index
    %c0_308 = arith.constant 0 : index
    %373 = vector.load %arg15[%c1_305, %c3_306, %c0_307, %c0_308] : memref<2x8x32x4xf32, #tpu.memory_space<vmem>>, vector<1x1x32x4xf32>
    %374 = vector.shape_cast %373 : vector<1x1x32x4xf32> to vector<32x4xf32>
    %cst_309 = arith.constant dense<0.000000e+00> : vector<16x4xf32>
    %375 = tpu.matmul %286, %374, %cst_309 {dimension_numbers = #tpu.dot_dimension_numbers<[1], [0], [0], [1], [0, 0, 1, 1], [], []>} : vector<16x32xf32>, vector<32x4xf32>, vector<16x4xf32> -> vector<16x4xf32>
    %c1_310 = arith.constant 1 : index
    %c3_311 = arith.constant 3 : index
    %c0_312 = arith.constant 0 : index
    %c0_313 = arith.constant 0 : index
    %376 = vector.load %arg16[%c1_310, %c3_311, %c0_312, %c0_313] : memref<2x8x32x4xf32, #tpu.memory_space<vmem>>, vector<1x1x32x4xf32>
    %377 = vector.shape_cast %376 : vector<1x1x32x4xf32> to vector<32x4xf32>
    %cst_314 = arith.constant dense<0.000000e+00> : vector<16x4xf32>
    %378 = tpu.matmul %286, %377, %cst_314 {dimension_numbers = #tpu.dot_dimension_numbers<[1], [0], [0], [1], [0, 0, 1, 1], [], []>} : vector<16x32xf32>, vector<32x4xf32>, vector<16x4xf32> -> vector<16x4xf32>
    %c1_315 = arith.constant 1 : index
    %c3_316 = arith.constant 3 : index
    %c0_317 = arith.constant 0 : index
    %c0_318 = arith.constant 0 : index
    %379 = vector.load %arg17[%c1_315, %c3_316, %c0_317, %c0_318] : memref<2x8x32x4xf32, #tpu.memory_space<vmem>>, vector<1x1x32x4xf32>
    %380 = vector.shape_cast %379 : vector<1x1x32x4xf32> to vector<32x4xf32>
    %cst_319 = arith.constant dense<0.000000e+00> : vector<16x4xf32>
    %381 = tpu.matmul %286, %380, %cst_319 {dimension_numbers = #tpu.dot_dimension_numbers<[1], [0], [0], [1], [0, 0, 1, 1], [], []>} : vector<16x32xf32>, vector<32x4xf32>, vector<16x4xf32> -> vector<16x4xf32>
    %382 = tpu.transpose %378, [1, 0] : vector<16x4xf32> -> vector<4x16xf32>
    %cst_320 = arith.constant dense<0.000000e+00> : vector<16x16xf32>
    %383 = tpu.matmul %375, %382, %cst_320 {dimension_numbers = #tpu.dot_dimension_numbers<[1], [0], [0], [1], [0, 0, 1, 1], [], []>} : vector<16x4xf32>, vector<4x16xf32>, vector<16x16xf32> -> vector<16x16xf32>
    %cst_321 = arith.constant 5.000000e-01 : f32
    %384 = vector.broadcast %cst_321 : f32 to vector<16x16xf32>
    %385 = arith.mulf %383, %384 : vector<16x16xf32>
    %386 = arith.addf %385, %26 : vector<16x16xf32>
    %cst_322 = arith.constant dense<0xFF800000> : vector<16xf32>
    %387 = vector.multi_reduction <maximumf>, %386, %cst_322 [1] : vector<16x16xf32> to vector<16xf32>
    %388 = vector.shape_cast %387 : vector<16xf32> to vector<16x1xf32>
    %389 = vector.broadcast %388 : vector<16x1xf32> to vector<16x16xf32>
    %390 = arith.subf %386, %389 : vector<16x16xf32>
    %391 = math.exp %390 : vector<16x16xf32>
    %cst_323 = arith.constant dense<0.000000e+00> : vector<16xf32>
    %392 = vector.multi_reduction <add>, %391, %cst_323 [1] : vector<16x16xf32> to vector<16xf32>
    %393 = vector.shape_cast %392 : vector<16xf32> to vector<16x1xf32>
    %394 = tpu.reciprocal %393 {approx = true} : vector<16x1xf32> -> vector<16x1xf32>
    %395 = vector.broadcast %394 : vector<16x1xf32> to vector<16x16xf32>
    %396 = arith.mulf %391, %395 : vector<16x16xf32>
    %cst_324 = arith.constant dense<0.000000e+00> : vector<16x4xf32>
    %397 = tpu.matmul %396, %381, %cst_324 {dimension_numbers = #tpu.dot_dimension_numbers<[1], [0], [0], [1], [0, 0, 1, 1], [], []>} : vector<16x16xf32>, vector<16x4xf32>, vector<16x4xf32> -> vector<16x4xf32>
    %c1_325 = arith.constant 1 : index
    %c3_326 = arith.constant 3 : index
    %c0_327 = arith.constant 0 : index
    %c0_328 = arith.constant 0 : index
    %398 = vector.load %arg18[%c1_325, %c3_326, %c0_327, %c0_328] : memref<2x8x4x32xf32, #tpu.memory_space<vmem>>, vector<1x1x4x32xf32>
    %399 = vector.shape_cast %398 : vector<1x1x4x32xf32> to vector<4x32xf32>
    %cst_329 = arith.constant dense<0.000000e+00> : vector<16x32xf32>
    %400 = tpu.matmul %397, %399, %cst_329 {dimension_numbers = #tpu.dot_dimension_numbers<[1], [0], [0], [1], [0, 0, 1, 1], [], []>} : vector<16x4xf32>, vector<4x32xf32>, vector<16x32xf32> -> vector<16x32xf32>
    %401 = arith.addf %372, %400 : vector<16x32xf32>
    %c1_330 = arith.constant 1 : index
    %c4_331 = arith.constant 4 : index
    %c0_332 = arith.constant 0 : index
    %c0_333 = arith.constant 0 : index
    %402 = vector.load %arg15[%c1_330, %c4_331, %c0_332, %c0_333] : memref<2x8x32x4xf32, #tpu.memory_space<vmem>>, vector<1x1x32x4xf32>
    %403 = vector.shape_cast %402 : vector<1x1x32x4xf32> to vector<32x4xf32>
    %cst_334 = arith.constant dense<0.000000e+00> : vector<16x4xf32>
    %404 = tpu.matmul %286, %403, %cst_334 {dimension_numbers = #tpu.dot_dimension_numbers<[1], [0], [0], [1], [0, 0, 1, 1], [], []>} : vector<16x32xf32>, vector<32x4xf32>, vector<16x4xf32> -> vector<16x4xf32>
    %c1_335 = arith.constant 1 : index
    %c4_336 = arith.constant 4 : index
    %c0_337 = arith.constant 0 : index
    %c0_338 = arith.constant 0 : index
    %405 = vector.load %arg16[%c1_335, %c4_336, %c0_337, %c0_338] : memref<2x8x32x4xf32, #tpu.memory_space<vmem>>, vector<1x1x32x4xf32>
    %406 = vector.shape_cast %405 : vector<1x1x32x4xf32> to vector<32x4xf32>
    %cst_339 = arith.constant dense<0.000000e+00> : vector<16x4xf32>
    %407 = tpu.matmul %286, %406, %cst_339 {dimension_numbers = #tpu.dot_dimension_numbers<[1], [0], [0], [1], [0, 0, 1, 1], [], []>} : vector<16x32xf32>, vector<32x4xf32>, vector<16x4xf32> -> vector<16x4xf32>
    %c1_340 = arith.constant 1 : index
    %c4_341 = arith.constant 4 : index
    %c0_342 = arith.constant 0 : index
    %c0_343 = arith.constant 0 : index
    %408 = vector.load %arg17[%c1_340, %c4_341, %c0_342, %c0_343] : memref<2x8x32x4xf32, #tpu.memory_space<vmem>>, vector<1x1x32x4xf32>
    %409 = vector.shape_cast %408 : vector<1x1x32x4xf32> to vector<32x4xf32>
    %cst_344 = arith.constant dense<0.000000e+00> : vector<16x4xf32>
    %410 = tpu.matmul %286, %409, %cst_344 {dimension_numbers = #tpu.dot_dimension_numbers<[1], [0], [0], [1], [0, 0, 1, 1], [], []>} : vector<16x32xf32>, vector<32x4xf32>, vector<16x4xf32> -> vector<16x4xf32>
    %411 = tpu.transpose %407, [1, 0] : vector<16x4xf32> -> vector<4x16xf32>
    %cst_345 = arith.constant dense<0.000000e+00> : vector<16x16xf32>
    %412 = tpu.matmul %404, %411, %cst_345 {dimension_numbers = #tpu.dot_dimension_numbers<[1], [0], [0], [1], [0, 0, 1, 1], [], []>} : vector<16x4xf32>, vector<4x16xf32>, vector<16x16xf32> -> vector<16x16xf32>
    %cst_346 = arith.constant 5.000000e-01 : f32
    %413 = vector.broadcast %cst_346 : f32 to vector<16x16xf32>
    %414 = arith.mulf %412, %413 : vector<16x16xf32>
    %415 = arith.addf %414, %26 : vector<16x16xf32>
    %cst_347 = arith.constant dense<0xFF800000> : vector<16xf32>
    %416 = vector.multi_reduction <maximumf>, %415, %cst_347 [1] : vector<16x16xf32> to vector<16xf32>
    %417 = vector.shape_cast %416 : vector<16xf32> to vector<16x1xf32>
    %418 = vector.broadcast %417 : vector<16x1xf32> to vector<16x16xf32>
    %419 = arith.subf %415, %418 : vector<16x16xf32>
    %420 = math.exp %419 : vector<16x16xf32>
    %cst_348 = arith.constant dense<0.000000e+00> : vector<16xf32>
    %421 = vector.multi_reduction <add>, %420, %cst_348 [1] : vector<16x16xf32> to vector<16xf32>
    %422 = vector.shape_cast %421 : vector<16xf32> to vector<16x1xf32>
    %423 = tpu.reciprocal %422 {approx = true} : vector<16x1xf32> -> vector<16x1xf32>
    %424 = vector.broadcast %423 : vector<16x1xf32> to vector<16x16xf32>
    %425 = arith.mulf %420, %424 : vector<16x16xf32>
    %cst_349 = arith.constant dense<0.000000e+00> : vector<16x4xf32>
    %426 = tpu.matmul %425, %410, %cst_349 {dimension_numbers = #tpu.dot_dimension_numbers<[1], [0], [0], [1], [0, 0, 1, 1], [], []>} : vector<16x16xf32>, vector<16x4xf32>, vector<16x4xf32> -> vector<16x4xf32>
    %c1_350 = arith.constant 1 : index
    %c4_351 = arith.constant 4 : index
    %c0_352 = arith.constant 0 : index
    %c0_353 = arith.constant 0 : index
    %427 = vector.load %arg18[%c1_350, %c4_351, %c0_352, %c0_353] : memref<2x8x4x32xf32, #tpu.memory_space<vmem>>, vector<1x1x4x32xf32>
    %428 = vector.shape_cast %427 : vector<1x1x4x32xf32> to vector<4x32xf32>
    %cst_354 = arith.constant dense<0.000000e+00> : vector<16x32xf32>
    %429 = tpu.matmul %426, %428, %cst_354 {dimension_numbers = #tpu.dot_dimension_numbers<[1], [0], [0], [1], [0, 0, 1, 1], [], []>} : vector<16x4xf32>, vector<4x32xf32>, vector<16x32xf32> -> vector<16x32xf32>
    %430 = arith.addf %401, %429 : vector<16x32xf32>
    %c1_355 = arith.constant 1 : index
    %c5_356 = arith.constant 5 : index
    %c0_357 = arith.constant 0 : index
    %c0_358 = arith.constant 0 : index
    %431 = vector.load %arg15[%c1_355, %c5_356, %c0_357, %c0_358] : memref<2x8x32x4xf32, #tpu.memory_space<vmem>>, vector<1x1x32x4xf32>
    %432 = vector.shape_cast %431 : vector<1x1x32x4xf32> to vector<32x4xf32>
    %cst_359 = arith.constant dense<0.000000e+00> : vector<16x4xf32>
    %433 = tpu.matmul %286, %432, %cst_359 {dimension_numbers = #tpu.dot_dimension_numbers<[1], [0], [0], [1], [0, 0, 1, 1], [], []>} : vector<16x32xf32>, vector<32x4xf32>, vector<16x4xf32> -> vector<16x4xf32>
    %c1_360 = arith.constant 1 : index
    %c5_361 = arith.constant 5 : index
    %c0_362 = arith.constant 0 : index
    %c0_363 = arith.constant 0 : index
    %434 = vector.load %arg16[%c1_360, %c5_361, %c0_362, %c0_363] : memref<2x8x32x4xf32, #tpu.memory_space<vmem>>, vector<1x1x32x4xf32>
    %435 = vector.shape_cast %434 : vector<1x1x32x4xf32> to vector<32x4xf32>
    %cst_364 = arith.constant dense<0.000000e+00> : vector<16x4xf32>
    %436 = tpu.matmul %286, %435, %cst_364 {dimension_numbers = #tpu.dot_dimension_numbers<[1], [0], [0], [1], [0, 0, 1, 1], [], []>} : vector<16x32xf32>, vector<32x4xf32>, vector<16x4xf32> -> vector<16x4xf32>
    %c1_365 = arith.constant 1 : index
    %c5_366 = arith.constant 5 : index
    %c0_367 = arith.constant 0 : index
    %c0_368 = arith.constant 0 : index
    %437 = vector.load %arg17[%c1_365, %c5_366, %c0_367, %c0_368] : memref<2x8x32x4xf32, #tpu.memory_space<vmem>>, vector<1x1x32x4xf32>
    %438 = vector.shape_cast %437 : vector<1x1x32x4xf32> to vector<32x4xf32>
    %cst_369 = arith.constant dense<0.000000e+00> : vector<16x4xf32>
    %439 = tpu.matmul %286, %438, %cst_369 {dimension_numbers = #tpu.dot_dimension_numbers<[1], [0], [0], [1], [0, 0, 1, 1], [], []>} : vector<16x32xf32>, vector<32x4xf32>, vector<16x4xf32> -> vector<16x4xf32>
    %440 = tpu.transpose %436, [1, 0] : vector<16x4xf32> -> vector<4x16xf32>
    %cst_370 = arith.constant dense<0.000000e+00> : vector<16x16xf32>
    %441 = tpu.matmul %433, %440, %cst_370 {dimension_numbers = #tpu.dot_dimension_numbers<[1], [0], [0], [1], [0, 0, 1, 1], [], []>} : vector<16x4xf32>, vector<4x16xf32>, vector<16x16xf32> -> vector<16x16xf32>
    %cst_371 = arith.constant 5.000000e-01 : f32
    %442 = vector.broadcast %cst_371 : f32 to vector<16x16xf32>
    %443 = arith.mulf %441, %442 : vector<16x16xf32>
    %444 = arith.addf %443, %26 : vector<16x16xf32>
    %cst_372 = arith.constant dense<0xFF800000> : vector<16xf32>
    %445 = vector.multi_reduction <maximumf>, %444, %cst_372 [1] : vector<16x16xf32> to vector<16xf32>
    %446 = vector.shape_cast %445 : vector<16xf32> to vector<16x1xf32>
    %447 = vector.broadcast %446 : vector<16x1xf32> to vector<16x16xf32>
    %448 = arith.subf %444, %447 : vector<16x16xf32>
    %449 = math.exp %448 : vector<16x16xf32>
    %cst_373 = arith.constant dense<0.000000e+00> : vector<16xf32>
    %450 = vector.multi_reduction <add>, %449, %cst_373 [1] : vector<16x16xf32> to vector<16xf32>
    %451 = vector.shape_cast %450 : vector<16xf32> to vector<16x1xf32>
    %452 = tpu.reciprocal %451 {approx = true} : vector<16x1xf32> -> vector<16x1xf32>
    %453 = vector.broadcast %452 : vector<16x1xf32> to vector<16x16xf32>
    %454 = arith.mulf %449, %453 : vector<16x16xf32>
    %cst_374 = arith.constant dense<0.000000e+00> : vector<16x4xf32>
    %455 = tpu.matmul %454, %439, %cst_374 {dimension_numbers = #tpu.dot_dimension_numbers<[1], [0], [0], [1], [0, 0, 1, 1], [], []>} : vector<16x16xf32>, vector<16x4xf32>, vector<16x4xf32> -> vector<16x4xf32>
    %c1_375 = arith.constant 1 : index
    %c5_376 = arith.constant 5 : index
    %c0_377 = arith.constant 0 : index
    %c0_378 = arith.constant 0 : index
    %456 = vector.load %arg18[%c1_375, %c5_376, %c0_377, %c0_378] : memref<2x8x4x32xf32, #tpu.memory_space<vmem>>, vector<1x1x4x32xf32>
    %457 = vector.shape_cast %456 : vector<1x1x4x32xf32> to vector<4x32xf32>
    %cst_379 = arith.constant dense<0.000000e+00> : vector<16x32xf32>
    %458 = tpu.matmul %455, %457, %cst_379 {dimension_numbers = #tpu.dot_dimension_numbers<[1], [0], [0], [1], [0, 0, 1, 1], [], []>} : vector<16x4xf32>, vector<4x32xf32>, vector<16x32xf32> -> vector<16x32xf32>
    %459 = arith.addf %430, %458 : vector<16x32xf32>
    %c1_380 = arith.constant 1 : index
    %c6_381 = arith.constant 6 : index
    %c0_382 = arith.constant 0 : index
    %c0_383 = arith.constant 0 : index
    %460 = vector.load %arg15[%c1_380, %c6_381, %c0_382, %c0_383] : memref<2x8x32x4xf32, #tpu.memory_space<vmem>>, vector<1x1x32x4xf32>
    %461 = vector.shape_cast %460 : vector<1x1x32x4xf32> to vector<32x4xf32>
    %cst_384 = arith.constant dense<0.000000e+00> : vector<16x4xf32>
    %462 = tpu.matmul %286, %461, %cst_384 {dimension_numbers = #tpu.dot_dimension_numbers<[1], [0], [0], [1], [0, 0, 1, 1], [], []>} : vector<16x32xf32>, vector<32x4xf32>, vector<16x4xf32> -> vector<16x4xf32>
    %c1_385 = arith.constant 1 : index
    %c6_386 = arith.constant 6 : index
    %c0_387 = arith.constant 0 : index
    %c0_388 = arith.constant 0 : index
    %463 = vector.load %arg16[%c1_385, %c6_386, %c0_387, %c0_388] : memref<2x8x32x4xf32, #tpu.memory_space<vmem>>, vector<1x1x32x4xf32>
    %464 = vector.shape_cast %463 : vector<1x1x32x4xf32> to vector<32x4xf32>
    %cst_389 = arith.constant dense<0.000000e+00> : vector<16x4xf32>
    %465 = tpu.matmul %286, %464, %cst_389 {dimension_numbers = #tpu.dot_dimension_numbers<[1], [0], [0], [1], [0, 0, 1, 1], [], []>} : vector<16x32xf32>, vector<32x4xf32>, vector<16x4xf32> -> vector<16x4xf32>
    %c1_390 = arith.constant 1 : index
    %c6_391 = arith.constant 6 : index
    %c0_392 = arith.constant 0 : index
    %c0_393 = arith.constant 0 : index
    %466 = vector.load %arg17[%c1_390, %c6_391, %c0_392, %c0_393] : memref<2x8x32x4xf32, #tpu.memory_space<vmem>>, vector<1x1x32x4xf32>
    %467 = vector.shape_cast %466 : vector<1x1x32x4xf32> to vector<32x4xf32>
    %cst_394 = arith.constant dense<0.000000e+00> : vector<16x4xf32>
    %468 = tpu.matmul %286, %467, %cst_394 {dimension_numbers = #tpu.dot_dimension_numbers<[1], [0], [0], [1], [0, 0, 1, 1], [], []>} : vector<16x32xf32>, vector<32x4xf32>, vector<16x4xf32> -> vector<16x4xf32>
    %469 = tpu.transpose %465, [1, 0] : vector<16x4xf32> -> vector<4x16xf32>
    %cst_395 = arith.constant dense<0.000000e+00> : vector<16x16xf32>
    %470 = tpu.matmul %462, %469, %cst_395 {dimension_numbers = #tpu.dot_dimension_numbers<[1], [0], [0], [1], [0, 0, 1, 1], [], []>} : vector<16x4xf32>, vector<4x16xf32>, vector<16x16xf32> -> vector<16x16xf32>
    %cst_396 = arith.constant 5.000000e-01 : f32
    %471 = vector.broadcast %cst_396 : f32 to vector<16x16xf32>
    %472 = arith.mulf %470, %471 : vector<16x16xf32>
    %473 = arith.addf %472, %26 : vector<16x16xf32>
    %cst_397 = arith.constant dense<0xFF800000> : vector<16xf32>
    %474 = vector.multi_reduction <maximumf>, %473, %cst_397 [1] : vector<16x16xf32> to vector<16xf32>
    %475 = vector.shape_cast %474 : vector<16xf32> to vector<16x1xf32>
    %476 = vector.broadcast %475 : vector<16x1xf32> to vector<16x16xf32>
    %477 = arith.subf %473, %476 : vector<16x16xf32>
    %478 = math.exp %477 : vector<16x16xf32>
    %cst_398 = arith.constant dense<0.000000e+00> : vector<16xf32>
    %479 = vector.multi_reduction <add>, %478, %cst_398 [1] : vector<16x16xf32> to vector<16xf32>
    %480 = vector.shape_cast %479 : vector<16xf32> to vector<16x1xf32>
    %481 = tpu.reciprocal %480 {approx = true} : vector<16x1xf32> -> vector<16x1xf32>
    %482 = vector.broadcast %481 : vector<16x1xf32> to vector<16x16xf32>
    %483 = arith.mulf %478, %482 : vector<16x16xf32>
    %cst_399 = arith.constant dense<0.000000e+00> : vector<16x4xf32>
    %484 = tpu.matmul %483, %468, %cst_399 {dimension_numbers = #tpu.dot_dimension_numbers<[1], [0], [0], [1], [0, 0, 1, 1], [], []>} : vector<16x16xf32>, vector<16x4xf32>, vector<16x4xf32> -> vector<16x4xf32>
    %c1_400 = arith.constant 1 : index
    %c6_401 = arith.constant 6 : index
    %c0_402 = arith.constant 0 : index
    %c0_403 = arith.constant 0 : index
    %485 = vector.load %arg18[%c1_400, %c6_401, %c0_402, %c0_403] : memref<2x8x4x32xf32, #tpu.memory_space<vmem>>, vector<1x1x4x32xf32>
    %486 = vector.shape_cast %485 : vector<1x1x4x32xf32> to vector<4x32xf32>
    %cst_404 = arith.constant dense<0.000000e+00> : vector<16x32xf32>
    %487 = tpu.matmul %484, %486, %cst_404 {dimension_numbers = #tpu.dot_dimension_numbers<[1], [0], [0], [1], [0, 0, 1, 1], [], []>} : vector<16x4xf32>, vector<4x32xf32>, vector<16x32xf32> -> vector<16x32xf32>
    %488 = arith.addf %459, %487 : vector<16x32xf32>
    %c1_405 = arith.constant 1 : index
    %c7_406 = arith.constant 7 : index
    %c0_407 = arith.constant 0 : index
    %c0_408 = arith.constant 0 : index
    %489 = vector.load %arg15[%c1_405, %c7_406, %c0_407, %c0_408] : memref<2x8x32x4xf32, #tpu.memory_space<vmem>>, vector<1x1x32x4xf32>
    %490 = vector.shape_cast %489 : vector<1x1x32x4xf32> to vector<32x4xf32>
    %cst_409 = arith.constant dense<0.000000e+00> : vector<16x4xf32>
    %491 = tpu.matmul %286, %490, %cst_409 {dimension_numbers = #tpu.dot_dimension_numbers<[1], [0], [0], [1], [0, 0, 1, 1], [], []>} : vector<16x32xf32>, vector<32x4xf32>, vector<16x4xf32> -> vector<16x4xf32>
    %c1_410 = arith.constant 1 : index
    %c7_411 = arith.constant 7 : index
    %c0_412 = arith.constant 0 : index
    %c0_413 = arith.constant 0 : index
    %492 = vector.load %arg16[%c1_410, %c7_411, %c0_412, %c0_413] : memref<2x8x32x4xf32, #tpu.memory_space<vmem>>, vector<1x1x32x4xf32>
    %493 = vector.shape_cast %492 : vector<1x1x32x4xf32> to vector<32x4xf32>
    %cst_414 = arith.constant dense<0.000000e+00> : vector<16x4xf32>
    %494 = tpu.matmul %286, %493, %cst_414 {dimension_numbers = #tpu.dot_dimension_numbers<[1], [0], [0], [1], [0, 0, 1, 1], [], []>} : vector<16x32xf32>, vector<32x4xf32>, vector<16x4xf32> -> vector<16x4xf32>
    %c1_415 = arith.constant 1 : index
    %c7_416 = arith.constant 7 : index
    %c0_417 = arith.constant 0 : index
    %c0_418 = arith.constant 0 : index
    %495 = vector.load %arg17[%c1_415, %c7_416, %c0_417, %c0_418] : memref<2x8x32x4xf32, #tpu.memory_space<vmem>>, vector<1x1x32x4xf32>
    %496 = vector.shape_cast %495 : vector<1x1x32x4xf32> to vector<32x4xf32>
    %cst_419 = arith.constant dense<0.000000e+00> : vector<16x4xf32>
    %497 = tpu.matmul %286, %496, %cst_419 {dimension_numbers = #tpu.dot_dimension_numbers<[1], [0], [0], [1], [0, 0, 1, 1], [], []>} : vector<16x32xf32>, vector<32x4xf32>, vector<16x4xf32> -> vector<16x4xf32>
    %498 = tpu.transpose %494, [1, 0] : vector<16x4xf32> -> vector<4x16xf32>
    %cst_420 = arith.constant dense<0.000000e+00> : vector<16x16xf32>
    %499 = tpu.matmul %491, %498, %cst_420 {dimension_numbers = #tpu.dot_dimension_numbers<[1], [0], [0], [1], [0, 0, 1, 1], [], []>} : vector<16x4xf32>, vector<4x16xf32>, vector<16x16xf32> -> vector<16x16xf32>
    %cst_421 = arith.constant 5.000000e-01 : f32
    %500 = vector.broadcast %cst_421 : f32 to vector<16x16xf32>
    %501 = arith.mulf %499, %500 : vector<16x16xf32>
    %502 = arith.addf %501, %26 : vector<16x16xf32>
    %cst_422 = arith.constant dense<0xFF800000> : vector<16xf32>
    %503 = vector.multi_reduction <maximumf>, %502, %cst_422 [1] : vector<16x16xf32> to vector<16xf32>
    %504 = vector.shape_cast %503 : vector<16xf32> to vector<16x1xf32>
    %505 = vector.broadcast %504 : vector<16x1xf32> to vector<16x16xf32>
    %506 = arith.subf %502, %505 : vector<16x16xf32>
    %507 = math.exp %506 : vector<16x16xf32>
    %cst_423 = arith.constant dense<0.000000e+00> : vector<16xf32>
    %508 = vector.multi_reduction <add>, %507, %cst_423 [1] : vector<16x16xf32> to vector<16xf32>
    %509 = vector.shape_cast %508 : vector<16xf32> to vector<16x1xf32>
    %510 = tpu.reciprocal %509 {approx = true} : vector<16x1xf32> -> vector<16x1xf32>
    %511 = vector.broadcast %510 : vector<16x1xf32> to vector<16x16xf32>
    %512 = arith.mulf %507, %511 : vector<16x16xf32>
    %cst_424 = arith.constant dense<0.000000e+00> : vector<16x4xf32>
    %513 = tpu.matmul %512, %497, %cst_424 {dimension_numbers = #tpu.dot_dimension_numbers<[1], [0], [0], [1], [0, 0, 1, 1], [], []>} : vector<16x16xf32>, vector<16x4xf32>, vector<16x4xf32> -> vector<16x4xf32>
    %c1_425 = arith.constant 1 : index
    %c7_426 = arith.constant 7 : index
    %c0_427 = arith.constant 0 : index
    %c0_428 = arith.constant 0 : index
    %514 = vector.load %arg18[%c1_425, %c7_426, %c0_427, %c0_428] : memref<2x8x4x32xf32, #tpu.memory_space<vmem>>, vector<1x1x4x32xf32>
    %515 = vector.shape_cast %514 : vector<1x1x4x32xf32> to vector<4x32xf32>
    %cst_429 = arith.constant dense<0.000000e+00> : vector<16x32xf32>
    %516 = tpu.matmul %513, %515, %cst_429 {dimension_numbers = #tpu.dot_dimension_numbers<[1], [0], [0], [1], [0, 0, 1, 1], [], []>} : vector<16x4xf32>, vector<4x32xf32>, vector<16x32xf32> -> vector<16x32xf32>
    %517 = arith.addf %488, %516 : vector<16x32xf32>
    %518 = arith.addf %286, %517 : vector<16x32xf32>
    %cst_430 = arith.constant dense<0.000000e+00> : vector<16xf32>
    %519 = vector.multi_reduction <add>, %518, %cst_430 [1] : vector<16x32xf32> to vector<16xf32>
    %520 = vector.shape_cast %519 : vector<16xf32> to vector<16x1xf32>
    %cst_431 = arith.constant 3.200000e+01 : f32
    %521 = vector.broadcast %cst_431 : f32 to vector<16x1xf32>
    %522 = arith.divf %520, %521 : vector<16x1xf32>
    %523 = vector.broadcast %522 : vector<16x1xf32> to vector<16x32xf32>
    %524 = arith.subf %518, %523 : vector<16x32xf32>
    %525 = vector.broadcast %522 : vector<16x1xf32> to vector<16x32xf32>
    %526 = arith.subf %518, %525 : vector<16x32xf32>
    %527 = arith.mulf %524, %526 : vector<16x32xf32>
    %cst_432 = arith.constant dense<0.000000e+00> : vector<16xf32>
    %528 = vector.multi_reduction <add>, %527, %cst_432 [1] : vector<16x32xf32> to vector<16xf32>
    %529 = vector.shape_cast %528 : vector<16xf32> to vector<16x1xf32>
    %cst_433 = arith.constant 3.200000e+01 : f32
    %530 = vector.broadcast %cst_433 : f32 to vector<16x1xf32>
    %531 = arith.divf %529, %530 : vector<16x1xf32>
    %532 = vector.broadcast %522 : vector<16x1xf32> to vector<16x32xf32>
    %533 = arith.subf %518, %532 : vector<16x32xf32>
    %cst_434 = arith.constant 9.99999974E-6 : f32
    %534 = vector.broadcast %cst_434 : f32 to vector<16x1xf32>
    %535 = arith.addf %531, %534 : vector<16x1xf32>
    %536 = math.rsqrt %535 : vector<16x1xf32>
    %537 = vector.broadcast %536 : vector<16x1xf32> to vector<16x32xf32>
    %538 = arith.mulf %533, %537 : vector<16x32xf32>
    %c1_435 = arith.constant 1 : index
    %c0_436 = arith.constant 0 : index
    %c0_437 = arith.constant 0 : index
    %539 = vector.load %arg19[%c1_435, %c0_436, %c0_437] : memref<2x1x32xf32, #tpu.memory_space<vmem>>, vector<1x1x32xf32>
    %540 = vector.shape_cast %539 : vector<1x1x32xf32> to vector<1x32xf32>
    %541 = vector.broadcast %540 : vector<1x32xf32> to vector<16x32xf32>
    %542 = arith.mulf %538, %541 : vector<16x32xf32>
    %c1_438 = arith.constant 1 : index
    %c0_439 = arith.constant 0 : index
    %c0_440 = arith.constant 0 : index
    %543 = vector.load %arg20[%c1_438, %c0_439, %c0_440] : memref<2x1x32xf32, #tpu.memory_space<vmem>>, vector<1x1x32xf32>
    %544 = vector.shape_cast %543 : vector<1x1x32xf32> to vector<1x32xf32>
    %545 = vector.broadcast %544 : vector<1x32xf32> to vector<16x32xf32>
    %546 = arith.addf %542, %545 : vector<16x32xf32>
    %c0_441 = arith.constant 0 : index
    %c0_442 = arith.constant 0 : index
    %547 = vector.load %arg3[%c0_441, %c0_442] : memref<2x16xf32, #tpu.memory_space<vmem>>, vector<2x16xf32>
    %cst_443 = arith.constant dense<0.000000e+00> : vector<2xf32>
    %548 = vector.multi_reduction <add>, %547, %cst_443 [1] : vector<2x16xf32> to vector<2xf32>
    %549 = vector.shape_cast %548 : vector<2xf32> to vector<2x1xf32>
    %cst_444 = arith.constant 1.000000e+00 : f32
    %550 = vector.broadcast %cst_444 : f32 to vector<2x1xf32>
    %551 = arith.maximumf %549, %550 : vector<2x1xf32>
    %cst_445 = arith.constant dense<0.000000e+00> : vector<2x32xf32>
    %552 = tpu.matmul %547, %546, %cst_445 {dimension_numbers = #tpu.dot_dimension_numbers<[1], [0], [0], [1], [0, 0, 1, 1], [], []>} : vector<2x16xf32>, vector<16x32xf32>, vector<2x32xf32> -> vector<2x32xf32>
    %553 = tpu.reciprocal %551 {approx = true} : vector<2x1xf32> -> vector<2x1xf32>
    %554 = vector.broadcast %553 : vector<2x1xf32> to vector<2x32xf32>
    %555 = arith.mulf %552, %554 : vector<2x32xf32>
    %c0_446 = arith.constant 0 : index
    %c0_447 = arith.constant 0 : index
    %556 = vector.load %arg21[%c0_446, %c0_447] : memref<32x128xf32, #tpu.memory_space<vmem>>, vector<32x128xf32>
    %cst_448 = arith.constant dense<0.000000e+00> : vector<2x128xf32>
    %557 = tpu.matmul %12, %556, %cst_448 {dimension_numbers = #tpu.dot_dimension_numbers<[1], [0], [0], [1], [0, 0, 1, 1], [], []>} : vector<2x32xf32>, vector<32x128xf32>, vector<2x128xf32> -> vector<2x128xf32>
    %c0_449 = arith.constant 0 : index
    %c0_450 = arith.constant 0 : index
    %558 = vector.load %arg22[%c0_449, %c0_450] : memref<32x128xf32, #tpu.memory_space<vmem>>, vector<32x128xf32>
    %cst_451 = arith.constant dense<0.000000e+00> : vector<2x128xf32>
    %559 = tpu.matmul %555, %558, %cst_451 {dimension_numbers = #tpu.dot_dimension_numbers<[1], [0], [0], [1], [0, 0, 1, 1], [], []>} : vector<2x32xf32>, vector<32x128xf32>, vector<2x128xf32> -> vector<2x128xf32>
    %560 = arith.addf %557, %559 : vector<2x128xf32>
    %c0_452 = arith.constant 0 : index
    %c0_453 = arith.constant 0 : index
    %561 = vector.load %arg23[%c0_452, %c0_453] : memref<1x128xf32, #tpu.memory_space<vmem>>, vector<1x128xf32>
    %562 = vector.broadcast %561 : vector<1x128xf32> to vector<2x128xf32>
    %563 = arith.addf %560, %562 : vector<2x128xf32>
    %c0_454 = arith.constant 0 : index
    %c0_455 = arith.constant 0 : index
    %564 = vector.load %arg4[%c0_454, %c0_455] : memref<2x4xf32, #tpu.memory_space<vmem>>, vector<2x4xf32>
    %c0_456 = arith.constant 0 : index
    %c0_457 = arith.constant 0 : index
    %565 = vector.load %arg24[%c0_456, %c0_457] : memref<4x256xf32, #tpu.memory_space<vmem>>, vector<4x256xf32>
    %cst_458 = arith.constant dense<0.000000e+00> : vector<2x256xf32>
    %566 = tpu.matmul %564, %565, %cst_458 {dimension_numbers = #tpu.dot_dimension_numbers<[1], [0], [0], [1], [0, 0, 1, 1], [], []>} : vector<2x4xf32>, vector<4x256xf32>, vector<2x256xf32> -> vector<2x256xf32>
    %c0_459 = arith.constant 0 : index
    %c0_460 = arith.constant 0 : index
    %567 = vector.load %arg25[%c0_459, %c0_460] : memref<128x256xf32, #tpu.memory_space<vmem>>, vector<128x256xf32>
    %cst_461 = arith.constant dense<0.000000e+00> : vector<2x256xf32>
    %568 = tpu.matmul %563, %567, %cst_461 {dimension_numbers = #tpu.dot_dimension_numbers<[1], [0], [0], [1], [0, 0, 1, 1], [], []>} : vector<2x128xf32>, vector<128x256xf32>, vector<2x256xf32> -> vector<2x256xf32>
    %569 = arith.addf %566, %568 : vector<2x256xf32>
    %c0_462 = arith.constant 0 : index
    %c0_463 = arith.constant 0 : index
    %570 = vector.load %arg6[%c0_462, %c0_463] : memref<2x128xf32, #tpu.memory_space<vmem>>, vector<2x128xf32>
    %c0_464 = arith.constant 0 : index
    %c0_465 = arith.constant 0 : index
    %571 = vector.load %arg26[%c0_464, %c0_465] : memref<128x256xf32, #tpu.memory_space<vmem>>, vector<128x256xf32>
    %cst_466 = arith.constant dense<0.000000e+00> : vector<2x256xf32>
    %572 = tpu.matmul %570, %571, %cst_466 {dimension_numbers = #tpu.dot_dimension_numbers<[1], [0], [0], [1], [0, 0, 1, 1], [], []>} : vector<2x128xf32>, vector<128x256xf32>, vector<2x256xf32> -> vector<2x256xf32>
    %573 = arith.addf %569, %572 : vector<2x256xf32>
    %c0_467 = arith.constant 0 : index
    %c0_468 = arith.constant 0 : index
    %574 = vector.load %arg27[%c0_467, %c0_468] : memref<1x256xf32, #tpu.memory_space<vmem>>, vector<1x256xf32>
    %575 = vector.broadcast %574 : vector<1x256xf32> to vector<2x256xf32>
    %576 = arith.addf %573, %575 : vector<2x256xf32>
    %cst_469 = arith.constant 0.000000e+00 : f32
    %577 = vector.broadcast %cst_469 : f32 to vector<2x256xf32>
    %578 = arith.maximumf %576, %577 : vector<2x256xf32>
    %c0_470 = arith.constant 0 : index
    %c0_471 = arith.constant 0 : index
    %579 = vector.load %arg28[%c0_470, %c0_471] : memref<256x256xf32, #tpu.memory_space<vmem>>, vector<256x256xf32>
    %cst_472 = arith.constant dense<0.000000e+00> : vector<2x256xf32>
    %580 = tpu.matmul %578, %579, %cst_472 {dimension_numbers = #tpu.dot_dimension_numbers<[1], [0], [0], [1], [0, 0, 1, 1], [], []>} : vector<2x256xf32>, vector<256x256xf32>, vector<2x256xf32> -> vector<2x256xf32>
    %c0_473 = arith.constant 0 : index
    %c0_474 = arith.constant 0 : index
    %581 = vector.load %arg29[%c0_473, %c0_474] : memref<1x256xf32, #tpu.memory_space<vmem>>, vector<1x256xf32>
    %582 = vector.broadcast %581 : vector<1x256xf32> to vector<2x256xf32>
    %583 = arith.addf %580, %582 : vector<2x256xf32>
    %cst_475 = arith.constant 0.000000e+00 : f32
    %584 = vector.broadcast %cst_475 : f32 to vector<2x256xf32>
    %585 = arith.maximumf %583, %584 : vector<2x256xf32>
    %c0_476 = arith.constant 0 : index
    %c0_477 = arith.constant 0 : index
    %586 = vector.load %arg30[%c0_476, %c0_477] : memref<256x4xf32, #tpu.memory_space<vmem>>, vector<256x4xf32>
    %cst_478 = arith.constant dense<0.000000e+00> : vector<2x4xf32>
    %587 = tpu.matmul %585, %586, %cst_478 {dimension_numbers = #tpu.dot_dimension_numbers<[1], [0], [0], [1], [0, 0, 1, 1], [], []>} : vector<2x256xf32>, vector<256x4xf32>, vector<2x4xf32> -> vector<2x4xf32>
    %c0_479 = arith.constant 0 : index
    %c0_480 = arith.constant 0 : index
    %588 = vector.load %arg31[%c0_479, %c0_480] : memref<1x4xf32, #tpu.memory_space<vmem>>, vector<1x4xf32>
    %589 = vector.broadcast %588 : vector<1x4xf32> to vector<2x4xf32>
    %590 = arith.addf %587, %589 : vector<2x4xf32>
    %c0_481 = arith.constant 0 : index
    %c0_482 = arith.constant 0 : index
    %591 = vector.load %arg5[%c0_481, %c0_482] : memref<2x4xf32, #tpu.memory_space<vmem>>, vector<2x4xf32>
    %592 = arith.subf %590, %591 : vector<2x4xf32>
    %593 = arith.mulf %592, %592 : vector<2x4xf32>
    %594 = vector.shape_cast %593 : vector<2x4xf32> to vector<1x2x4xf32>
    %cst_483 = arith.constant dense<0.000000e+00> : vector<1xf32>
    %595 = vector.multi_reduction <add>, %594, %cst_483 [1, 2] : vector<1x2x4xf32> to vector<1xf32>
    %596 = vector.shape_cast %595 : vector<1xf32> to vector<1x1x1xf32>
    %597 = vector.extract %596[0, 0, 0] : f32 from vector<1x1x1xf32>
    %598 = vector.broadcast %597 : f32 to vector<1x1xf32>
    %cst_484 = arith.constant 1.250000e-01 : f32
    %599 = vector.broadcast %cst_484 : f32 to vector<1x1xf32>
    %600 = arith.mulf %598, %599 : vector<1x1xf32>
    %c0_485 = arith.constant 0 : index
    %c0_486 = arith.constant 0 : index
    %601 = vector.load %arg32[%c0_485, %c0_486] : memref<1x1xf32, #tpu.memory_space<vmem>>, vector<1x1xf32>
    tpu.vector_store %arg32[%c0_485, %c0_486], %600 {strides = array<i32>} : memref<1x1xf32, #tpu.memory_space<vmem>>, vector<1x1xf32>,
    return
  }
}

</mosaic_0001>

<bundles_post_ra>
// kernel: eq.15
= control target key start
LH: loop header
LB: loop body
LE: loop exit
PB: predicated region body
PF: predicated region fallthrough
CT: control target
= control target key end

     0   :  { %vm7_vm0 = vcmask 64512   ;;  %vm13_vm1 = vcmask 130112   ;;  %s39_s0 = inlined_call_operand.vmem [shape: s32[2,8], index: 0, kind: input, shape index: {}]   ;;  %s40_s1 = inlined_call_operand.vmem [shape: s32[16], index: 1, kind: output, shape index: {}]  }
   0x1   :  { %v4_v0 = vld [vmem:[%s39_s0] sm:$0x3]  ;;  %s22_s0 = smov 8  }
   0x2   :  { %5 = vst [vmem:[#allocation1] sm:$0x3] %v4_v0 }
   0x9   :  { %v10_v1 = vld [vmem:[#allocation1 + $0x1] sm:$0x1]   ;;  %v6_v2 = vld [vmem:[#allocation1] sm:$0x1]  }
   0xa   :  { %11 = vrot.lane.b32.xlu0 %v10_v1, %s22_s0  ;;  %8 = vst.msk [vmem:[#allocation0] sm:$0x1] %vm7_vm0, %v6_v2  }
  0x7c   :  { %v12_v3 = vpop.permute.xlu0 %11  }
  0x7d   :  { %14 = vst.msk [vmem:[#allocation0] sm:$0x1] %vm13_vm1, %v12_v3  }
  0x84   :  { %v18_v4 = vld [vmem:[#allocation0] sm:$0x1] }
  0x85   :  { %20 = vst [vmem:[%s40_s1] sm:$0x1] %v18_v4 }

// kernel: forward.21
= control target key start
LH: loop header
LB: loop body
LE: loop exit
PB: predicated region body
PF: predicated region fallthrough
CT: control target
= control target key end

     0   :  { %s12724_s6 = smov 1   ;;  %s12725_s10 = smov 2   ;;  %s13944_s0 = inlined_call_operand.smem [shape: u32[33], index: -1, kind: input, shape index: {}] }
   0x1   :  { %s12768_s5 = sld [smem:[%s13944_s0]]   ;;  %s12726_s14 = smov 3  }
   0x2   :  { %s12773_s9 = sld [smem:[%s13944_s0 + %s12724_s6]]   ;;  %s12727_s18 = smov 4  }
   0x3   :  { %s12778_s13 = sld [smem:[%s13944_s0 + %s12725_s10]]   ;;  %s12728_s22 = smov 5  }
   0x4   :  { %s12783_s17 = sld [smem:[%s13944_s0 + %s12726_s14]]   ;;  %s12729_s26 = smov 6  }
   0x5   :  { %s12788_s21 = sld [smem:[%s13944_s0 + %s12727_s18]]   ;;  %s12730_s30 = smov 7  }
   0x6   :  { %s12793_s25 = sld [smem:[%s13944_s0 + %s12728_s22]]   ;;  %s12731_s4 = smov 8  }
   0x7   :  { %s12798_s29 = sld [smem:[%s13944_s0 + %s12729_s26]]   ;;  %s12732_s10 = smov 9  }
   0x8   :  { %s12803_s3 = sld [smem:[%s13944_s0 + %s12730_s30]]   ;;  %s12733_s15 = smov 10  }
   0x9   :  { %s12808_s8 = sld [smem:[%s13944_s0 + %s12731_s4]]   ;;  %s12734_s20 = smov 11  }
   0xa   :  { %13952 = sst [smem:[#allocation5_spill]] %s12783_s17  ;;  %s12735_s26 = smov 12  }
   0xb   :  { %13953 = sst [smem:[#allocation6_spill]] %s12788_s21  ;;  %s12736_s1 = smov 13  }
   0xc   :  { %13954 = sst [smem:[#allocation7_spill]] %s12793_s25  ;;  %s12737_s7 = smov 14  }
   0xd   :  { %13955 = sst [smem:[#allocation8_spill]] %s12798_s29  ;;  %s12739_s22 = smov 16  }
   0xe   :  { %s12813_s14 = sld [smem:[%s13944_s0 + %s12732_s10]]   ;;  %s12740_s28 = smov 17  }
   0xf   :  { %s12818_s19 = sld [smem:[%s13944_s0 + %s12733_s15]]   ;;  %s12738_s15 = smov 15  }
  0x10   :  { %s12823_s24 = sld [smem:[%s13944_s0 + %s12734_s20]]  }
  0x11   :  { %s12828_s30 = sld [smem:[%s13944_s0 + %s12735_s26]]  }
  0x12   :  { %s12833_s6 = sld [smem:[%s13944_s0 + %s12736_s1]]  }
  0x13   :  { %s12838_s12 = sld [smem:[%s13944_s0 + %s12737_s7]]   ;;  %s12741_s7 = smov 18  }
  0x14   :  { %s12843_s20 = sld [smem:[%s13944_s0 + %s12738_s15]]   ;;  %s12742_s15 = smov 19  }
  0x15   :  { %13956 = sst [smem:[#allocation9_spill]] %s12818_s19 }
  0x16   :  { %s12848_s27 = sld [smem:[%s13944_s0 + %s12739_s22]]   ;;  %s12743_s22 = smov 20  }
  0x17   :  { %s12853_s4 = sld [smem:[%s13944_s0 + %s12740_s28]]   ;;  %s12744_s28 = smov 21  }
  0x18   :  { %s12858_s25 = sld [smem:[%s13944_s0 + %s12741_s7]]   ;;  %s12745_s7 = smov 22  }
  0x19   :  { %s12863_s29 = sld [smem:[%s13944_s0 + %s12742_s15]]   ;;  %s12746_s15 = smov 23  }
  0x1a   :  { %s12868_s21 = sld [smem:[%s13944_s0 + %s12743_s22]]   ;;  %s12747_s22 = smov 24  }
  0x1b   :  { %s12873_s17 = sld [smem:[%s13944_s0 + %s12744_s28]]   ;;  %s12748_s28 = smov 25  }
  0x1c   :  { %s12878_s19 = sld [smem:[%s13944_s0 + %s12745_s7]]   ;;  %s12749_s7 = smov 26  }
  0x1f   :  { %13957 = sst [smem:[#allocation10_spill]] %s12863_s29 }
  0x20   :  { %13958 = sst [smem:[#allocation11_spill]] %s12868_s21 }
  0x21   :  { %13959 = sst [smem:[#allocation12_spill]] %s12873_s17 }
  0x22   :  { %13960 = sst [smem:[#allocation13_spill]] %s12878_s19 }
  0x23   :  { %s12883_s29 = sld [smem:[%s13944_s0 + %s12746_s15]]   ;;  %s12750_s15 = smov 27  }
  0x24   :  { %s12888_s21 = sld [smem:[%s13944_s0 + %s12747_s22]]   ;;  %s12751_s22 = smov 28  }
  0x25   :  { %s12893_s17 = sld [smem:[%s13944_s0 + %s12748_s28]]   ;;  %s12752_s28 = smov 29  }
  0x26   :  { %s12898_s19 = sld [smem:[%s13944_s0 + %s12749_s7]]   ;;  %s12753_s7 = smov 30  }
  0x29   :  { %13961 = sst [smem:[#allocation14_spill]] %s12883_s29 }
  0x2a   :  { %13962 = sst [smem:[#allocation15_spill]] %s12888_s21 }
  0x2b   :  { %13963 = sst [smem:[#allocation16_spill]] %s12893_s17 }
  0x2c   :  { %13964 = sst [smem:[#allocation17_spill]] %s12898_s19 }
  0x2d   :  { %s12903_s29 = sld [smem:[%s13944_s0 + %s12750_s15]]   ;;  %s12754_s15 = smov 31  }
  0x2e   :  { %s12908_s21 = sld [smem:[%s13944_s0 + %s12751_s22]]   ;;  %s12755_s22 = smov 32  }
  0x2f   :  { %s12913_s17 = sld [smem:[%s13944_s0 + %s12752_s28]]  }
  0x30   :  { %s12918_s19 = sld [smem:[%s13944_s0 + %s12753_s7]]  }
  0x33   :  { %13965 = sst [smem:[#allocation18_spill]] %s12903_s29 }
  0x34   :  { %13966 = sst [smem:[#allocation19_spill]] %s12908_s21 }
  0x35   :  { %s12923_s29 = sld [smem:[%s13944_s0 + %s12754_s15]]  }
  0x36   :  { %s12928_s21 = sld [smem:[%s13944_s0 + %s12755_s22]]  }
  0x37   :  { %v136_v0 = vld [vmem:[%s12803_s3] sm:$0xff]  ;;  %v137_v1 = vld [vmem:[%s12803_s3 + $0x8] sm:$0xff]  ;;  %v12756_v2 = vmov 0.0|0.0   ;;  %vm12757_vm0 = vmmov 0   ;;  %v12758_v4 = vmov 0.0   ;;  %vm145_vm1 = vcmask 130048  }
  0x38   :  { %11733 = vmatprep.subr.bf16.mxu0 %v12756_v2  ;;  %v11734_v3 = vpack.c.bf16 %v137_v1, %v136_v0  ;;  %10824 = vmatprep.mubr.msk.f32.mxu0 %vm12757_vm0, %v12758_v4  ;;  %v311_v5 = vld [vmem:[%s12823_s24] sm:$0xff]  ;;  %v312_v6 = vld [vmem:[%s12823_s24 + $0x8] sm:$0xff]  ;;  %v222_v11 = vld [vmem:[%s12813_s14 + $0x10] sm:$0xff] }
  0x39   :  { %v135_v7 = vld [vmem:[%s12768_s5] sm:$0x3]  ;;  %v11748_v8 = vpack.c.bf16 %v312_v6, %v311_v5  ;;  %11736 = vmatprep.subr.bf16.mxu1 %v12756_v2  ;;  %10843 = vmatprep.mubr.msk.f32.mxu1 %vm12757_vm0, %v12758_v4  ;;  %v221_v10 = vld [vmem:[%s12813_s14 + $0x8] sm:$0xff]  ;;  %v223_v12 = vld [vmem:[%s12813_s14 + $0x18] sm:$0xff] }
  0x3a   :  { %v220_v9 = vld [vmem:[%s12813_s14] sm:$0xff]  ;;  %11735 = vmatpush3.bf16.msra.mxu0 %v11734_v3 }
  0x3b   :  { %11749 = vmatprep.subr.bf16.mxu0 %v11748_v8  ;;  %v309_v13 = vld [vmem:[%s12773_s9] sm:$0xff]  ;;  %v11737_v14 = vpack.c.bf16 %v221_v10, %v220_v9 }
  0x3c   :  { %70 = vsyncpa [#allocation3], 0  ;;  %v11740_v15 = vpack.c.bf16 %v223_v12, %v222_v11  ;;  %v310_v16 = vld [vmem:[%s12773_s9 + $0x8] sm:$0xff]  ;;  %v224_v17 = vld [vmem:[%s12813_s14 + $0x20] sm:$0xff]  ;;  %vm235_vm2 = vcmask 523264   ;;  %vm505_vm3 = vcmask 261120  }
  0x3d   :  { %10825 = vmatmul.mubr.msk.f32.vlgmr.msra.gmra.mrb[0].mxu0 %vm145_vm1, %v135_v7  ;;  %11738 = vmatpush3.bf16.msra.mxu1 %v11737_v14  ;;  %v225_v18 = vld [vmem:[%s12813_s14 + $0x28] sm:$0xff]  ;;  %v226_v20 = vld [vmem:[%s12813_s14 + $0x30] sm:$0xff]  ;;  %v227_v21 = vld [vmem:[%s12813_s14 + $0x38] sm:$0xff]  ;;  %vm745_vm4 = vcmask 31744   ;;  %vm1383_vm6 = vcmask 1043456   ;;  %s13969_s0 = sld [smem:[#allocation10_spill]] }
  0x3e   :  { %11751 = vmatpush3.bf16.msra.mxu0 %v11748_v8  ;;  %10850 = vmatprep.mubr.msk.f32.mxu0 %vm145_vm1, %v309_v13  ;;  %v11743_v19 = vpack.c.bf16 %v225_v18, %v224_v17  ;;  %v11746_v22 = vpack.c.bf16 %v227_v21, %v226_v20  ;;  %v403_v23 = vld [vmem:[%s12833_s6] sm:$0xff]  ;;  %v404_v24 = vld [vmem:[%s12833_s6 + $0x8] sm:$0xff]  ;;  %v405_v28 = vld [vmem:[%s12833_s6 + $0x10] sm:$0xff]  ;;  %s13970_s5 = sld [smem:[#allocation11_spill]]  ;;  %s13971_s9 = sld [smem:[#allocation12_spill]]  ;;  %vm8952_vm7 = vcmask 123904  }
  0x3f   :  { %11739 = vmatprep.subr.bf16.mxu1 %v12756_v2  ;;  %v11752_v25 = vpack.c.bf16 %v404_v24, %v403_v23  ;;  %v9823_v26 = vld [vmem:[%s12808_s8] ss:$0 sm:$0xff]  ;;  %v406_v29 = vld [vmem:[%s12833_s6 + $0x18] sm:$0xff]  ;;  %v408_v37 = vld [vmem:[%s12833_s6 + $0x28] sm:$0xff]  ;;  %s13974_s3 = sld [smem:[#allocation13_spill]]  ;;  %s13975_s8 = sld [smem:[#allocation16_spill]] }
  0x40   :  { %v11756_v33 = vpack.c.bf16 %v406_v29, %v405_v28  ;;  %v9827_v34 = vld [vmem:[%s12828_s30] ss:$0 sm:$0xff]  ;;  %v409_v42 = vld [vmem:[%s12833_s6 + $0x30] sm:$0xff]  ;;  %v410_v43 = vld [vmem:[%s12833_s6 + $0x38] sm:$0xff]  ;;  %s13976_s14 = sld [smem:[#allocation15_spill]]  ;;  %s13977_s24 = sld [smem:[#allocation19_spill]] }
  0x41   :  { %10851 = vmatmul.mubr.msk.f32.vlgmr.msra.gmra.mrb[2].mxu0 %vm145_vm1, %v310_v16  ;;  %11741 = vmatpush3.bf16.msra.mxu1 %v11740_v15  ;;  %v407_v36 = vld [vmem:[%s12833_s6 + $0x20] sm:$0xff]  ;;  %v11764_v44 = vpack.c.bf16 %v410_v43, %v409_v42  ;;  %v502_v48 = vld [vmem:[%s12843_s20 + $0x8] sm:$0xff]  ;;  %v503_v53 = vld [vmem:[%s12843_s20 + $0x10] sm:$0xff]  ;;  %s13978_s30 = sld [smem:[#allocation14_spill]]  ;;  %s13979_s6 = sld [smem:[#allocation17_spill]]  ;;  %vm9762_vm8 = vcmask 25600  }
  0x42   :  { %11742 = vmatprep.subr.bf16.mxu1 %v12756_v2  ;;  %v11760_v40 = vpack.c.bf16 %v408_v37, %v407_v36  ;;  %v501_v47 = vld [vmem:[%s12843_s20] sm:$0xff]  ;;  %v588_v51 = vld [vmem:[%s12848_s27 + $0x8] sm:$0xff]  ;;  %v504_v54 = vld [vmem:[%s12843_s20 + $0x18] sm:$0xff]  ;;  %vm9775_vm9 = vcmask 0  }
  0x43   :  { %v587_v49 = vld [vmem:[%s12848_s27] sm:$0xff]  ;;  %v11768_v50 = vpack.c.bf16 %v502_v48, %v501_v47  ;;  %v11772_v55 = vpack.c.bf16 %v504_v54, %v503_v53  ;;  %v589_v56 = vld [vmem:[%s12848_s27 + $0x10] sm:$0xff]  ;;  %v590_v57 = vld [vmem:[%s12848_s27 + $0x18] sm:$0xff] }
  0x44   :  { %v11776_v52 = vpack.c.bf16 %v588_v51, %v587_v49  ;;  %v11780_v58 = vpack.c.bf16 %v590_v57, %v589_v56  ;;  %v666_v59 = vld [vmem:[%s12853_s4] sm:$0xff]  ;;  %v667_v60 = vld [vmem:[%s12853_s4 + $0x8] sm:$0xff]  ;;  %v668_v3 = vld [vmem:[%s12853_s4 + $0x10] sm:$0xff] }
  0x45   :  { %11744 = vmatpush3.bf16.msra.mxu1 %v11743_v19  ;;  %v11784_v61 = vpack.c.bf16 %v667_v60, %v666_v59  ;;  %v9830_v0 = vld [vmem:[%s12838_s12] ss:$0 sm:$0xff]  ;;  %v669_v5 = vld [vmem:[%s12853_s4 + $0x18] sm:$0xff]  ;;  %v9852_v11 = vld [vmem:[%s12848_s27 + $0x28] sm:$0xff]  ;;  %s13980_s12 = sld [smem:[#allocation6_spill]] }
  0x46   :  { %11745 = vmatprep.subr.bf16.mxu1 %v12756_v2  ;;  %11777 = vmatprep.subr.bf16.mxu0 %v11776_v52  ;;  %v11788_v9 = vpack.c.bf16 %v669_v5, %v668_v3  ;;  %v9851_v10 = vld [vmem:[%s12848_s27 + $0x20] sm:$0xff]  ;;  %vm13005_vm5 = vmpackc.low %vm745_vm4, %vm745_vm4  ;;  %v9853_v19 = vld [vmem:[%s12848_s27 + $0x30] sm:$0xff] }
  0x47   :  { %11779 = vmatpush3.bf16.msra.mxu0 %v11776_v52  ;;  %v11810_v18 = vpack.c.bf16 %v9852_v11, %v9851_v10  ;;  %v9854_v20 = vld [vmem:[%s12848_s27 + $0x38] sm:$0xff]  ;;  %v9845_v48 = vld [vmem:[%s12843_s20 + $0x20] sm:$0xff]  ;;  %v9846_v49 = vld [vmem:[%s12843_s20 + $0x28] sm:$0xff] }
  0x48   :  { %11781 = vmatprep.subr.bf16.mxu0 %v11780_v58  ;;  %v11814_v24 = vpack.c.bf16 %v9854_v20, %v9853_v19  ;;  %v9848_v56 = vld [vmem:[%s12843_s20 + $0x38] sm:$0xff]  ;;  %v9857_v60 = vld [vmem:[%s12853_s4 + $0x20] sm:$0xff] }
  0x49   :  { %11747 = vmatpush3.bf16.msra.mxu1 %v11746_v22 }
  0x4a   :  { %11753 = vmatprep.subr.bf16.mxu1 %v11752_v25 }
  0x4b   :  { %11783 = vmatpush3.bf16.msra.mxu0 %v11780_v58 }
 0x110   :  { %v215_v27 = vpop.f32.mrb[0].mxu0 }
 0x111   :  { %v216_v30 = vadd.f32 %v9823_v26, %v215_v27  ;;  %v10826_v31 = vpop.f32.mrb[1].mxu0  ;;  %v13022_v27 = vld [vmem:[%s12778_s13] sm:$0xff] }
 0x113   :  { %v219_v32 = vmax.f32 %v216_v30, 0.0  ;;  %v13025_v30 = vld [vmem:[%s12778_s13 + $0x8] sm:$0xff] }
 0x114   :  { %v10852_v35 = vpop.f32.mrb[2].mxu0 }
 0x115   :  { %10844 = vmatmul.mubr.msk.f32.vlgmr.msra.gmra.mrb[0].mxu1 %vm235_vm2, %v219_v32  ;;  %v392_v38 = vpop.f32.mrb[3].mxu0  ;;  %v398_v45 = vadd.f32 %v10852_v35, %v9827_v34 }
 0x116   :  { %11755 = vmatpush3.bf16.msra.mxu1 %v11752_v25  ;;  %v393_v39 = vadd.f32 %v9827_v34, %v392_v38 }
 0x117   :  { %11757 = vmatprep.subr.bf16.mxu1 %v11756_v33  ;;  %v402_v46 = vmax.f32 %v398_v45, 0.0 }
 0x118   :  { %v401_v41 = vmax.f32 %v393_v39, 0.0 }
 0x11a   :  { %11759 = vmatpush3.bf16.msra.mxu1 %v11756_v33  ;;  %10869 = vmatprep.mubr.msk.f32.mxu1 %vm235_vm2, %v401_v41 }
 0x11b   :  { %11761 = vmatprep.subr.bf16.mxu1 %v11760_v40 }
 0x11e   :  { %11763 = vmatpush3.bf16.msra.mxu1 %v11760_v40 }
 0x11f   :  { %11765 = vmatprep.subr.bf16.mxu1 %v11764_v44 }
 0x122   :  { %11767 = vmatpush3.bf16.msra.mxu1 %v11764_v44 }
 0x123   :  { %11769 = vmatprep.subr.bf16.mxu1 %v11768_v50 }
 0x125   :  { %10870 = vmatmul.mubr.msk.f32.vlgmr.msra.gmra.mrb[2].mxu1 %vm235_vm2, %v402_v46 }
 0x126   :  { %11771 = vmatpush3.bf16.msra.mxu1 %v11768_v50  ;;  %v11802_v50 = vpack.c.bf16 %v9846_v49, %v9845_v48  ;;  %v9888_v48 = vld [vmem:[%s12853_s4 + $0x40] sm:$0xff]  ;;  %v9889_v49 = vld [vmem:[%s12853_s4 + $0x48] sm:$0xff] }
 0x127   :  { %11773 = vmatprep.subr.bf16.mxu1 %v11772_v55 }
 0x12a   :  { %11775 = vmatpush3.bf16.msra.mxu1 %v11772_v55  ;;  %v9847_v55 = vld [vmem:[%s12843_s20 + $0x30] sm:$0xff] }
 0x12b   :  { %11785 = vmatprep.subr.bf16.mxu1 %v11784_v61  ;;  %v11806_v59 = vpack.c.bf16 %v9848_v56, %v9847_v55  ;;  %v9882_v55 = vld [vmem:[%s12848_s27 + $0x40] sm:$0xff]  ;;  %v9883_v56 = vld [vmem:[%s12848_s27 + $0x48] sm:$0xff] }
 0x1e8   :  { %v12980_v62 = vpop.f32.mrb[0].mxu1 }
 0x1e9   :  { %v10845_v63 = vpop.f32.mrb[1].mxu1 }
 0x1f8   :  { %v10871_v1 = vpop.f32.mrb[2].mxu1 }
 0x1f9   :  { %v490_v6 = vpop.f32.mrb[3].mxu1  ;;  %v12987_v8 = vadd.f32 %v10871_v1, %v9830_v0  ;;  %v9860_v1 = vld [vmem:[%s12853_s4 + $0x38] sm:$0xff] }
 0x1fa   :  { %v12985_v7 = vadd.f32 %v9830_v0, %v490_v6  ;;  %v9859_v0 = vld [vmem:[%s12853_s4 + $0x30] sm:$0xff] }
 0x1fb   :  { %v11822_v3 = vpack.c.bf16 %v9860_v1, %v9859_v0 }
 0x1fc   :  { %10880 = vmatprep.mubr.msk.f32.mxu1 %vm505_vm3, %v12985_v7  ;;  %10891 = vmatprep.mubr.msk.f32.mxu0 %vm505_vm3, %v12985_v7 }
 0x1fd   :  { %10881 = vmatmul.mubr.msk.f32.vlgmr.msra.gmra.mrb[4].mxu1 %vm505_vm3, %v12987_v8  ;;  %10892 = vmatmul.mubr.msk.f32.vlgmr.msra.gmra.mrb[4].mxu0 %vm505_vm3, %v12987_v8 }
 0x1fe   :  { %11787 = vmatpush3.bf16.msra.mxu1 %v11784_v61  ;;  %10902 = vmatprep.mubr.msk.f32.mxu1 %vm505_vm3, %v12985_v7  ;;  %v9858_v61 = vld [vmem:[%s12853_s4 + $0x28] sm:$0xff] }
 0x1ff   :  { %11789 = vmatprep.subr.bf16.mxu1 %v11788_v9  ;;  %v11818_v63 = vpack.c.bf16 %v9858_v61, %v9857_v60  ;;  %v9884_v60 = vld [vmem:[%s12848_s27 + $0x50] sm:$0xff]  ;;  %v9885_v61 = vld [vmem:[%s12848_s27 + $0x58] sm:$0xff] }
 0x200   :  { %v11848_v1 = vpack.c.bf16 %v9885_v61, %v9884_v60 }
 0x202   :  { %11791 = vmatpush3.bf16.msra.mxu1 %v11788_v9 }
 0x205   :  { %10903 = vmatmul.mubr.msk.f32.vlgmr.msra.gmra.mrb[6].mxu1 %vm505_vm3, %v12987_v8 }
 0x2d0   :  { %v10882_v12 = vpop.f32.mrb[4].mxu1  ;;  %v10893_v13 = vpop.f32.mrb[4].mxu0 }
 0x2d1   :  { %v578_v14 = vpop.f32.mrb[5].mxu1  ;;  %v657_v15 = vpop.f32.mrb[5].mxu0 }
 0x2d2   :  { %v11792_v17 = vpack.c.bf16 %v10893_v13, %v657_v15  ;;  %10909 = vmatprep.mubr.msk.f32.mxu0 %vm745_vm4, %v578_v14 }
 0x2d4   :  { %11794 = vmatprep.subr.msk.bf16.mxu0 %vm13005_vm5, %v11792_v17 }
 0x2d5   :  { %11797 = vmatpush3.bf16.xpose.msk.msra.mxu0 %vm13005_vm5, %v11792_v17 }
 0x2d6   :  { %11811 = vmatprep.subr.bf16.mxu0 %v11810_v18 }
 0x2d8   :  { %v10904_v21 = vpop.f32.mrb[6].mxu1 }
 0x2d9   :  { %v736_v22 = vpop.f32.mrb[7].mxu1 }
 0x2da   :  { %v11798_v23 = vpack.c.bf16 %v10904_v21, %v736_v22 }
 0x2dc   :  { %11799 = vmatprep.subr.bf16.mxu1 %v11798_v23  ;;  %10910 = vmatmul.mubr.msk.f32.vlgmr.msra.gmra.mrb[6].mxu0 %vm745_vm4, %v10882_v12 }
 0x2dd   :  { %11801 = vmatpush3.bf16.msra.mxu1 %v11798_v23  ;;  %11813 = vmatpush3.bf16.msra.mxu0 %v11810_v18 }
 0x2de   :  { %10938 = vmatprep.mubr.msk.f32.mxu0 %vm505_vm3, %v12985_v7  ;;  %11815 = vmatprep.subr.bf16.mxu0 %v11814_v24 }
 0x2df   :  { %11803 = vmatprep.subr.bf16.mxu1 %v11802_v50 }
 0x2e1   :  { %11817 = vmatpush3.bf16.msra.mxu0 %v11814_v24 }
 0x2e4   :  { %10939 = vmatmul.mubr.msk.f32.vlgmr.msra.gmra.mrb[8].mxu0 %vm505_vm3, %v12987_v8 }
 0x3af   :  { %v10911_v25 = vpop.f32.mrb[6].mxu0 }
 0x3b0   :  { %v824_v26 = vpop.f32.mrb[7].mxu0  ;;  %v834_v28 = vmul.f32 0.5, %v10911_v25 }
 0x3b1   :  { %v833_v29 = vmul.f32 0.5, %v824_v26 }
 0x3b2   :  { %v836_v33 = vadd.f32 %v834_v28, %v13025_v30 }
 0x3b3   :  { %v835_v31 = vadd.f32 %v833_v29, %v13022_v27 }
 0x3b4   :  { %v840_v37 = vsel %vm145_vm1, %v836_v33, -inf }
 0x3b5   :  { %v837_v32 = vsel %vm145_vm1, %v835_v31, -inf }
 0x3b6   :  { %838 = vmax.xlane.f32.xlu0 %v837_v32 }
 0x3b7   :  { %v10940_v34 = vpop.f32.mrb[8].mxu0 }
 0x3b8   :  { %v1092_v35 = vpop.f32.mrb[9].mxu0 }
 0x3b9   :  { %v11826_v36 = vpack.c.bf16 %v10940_v34, %v1092_v35  ;;  %v9876_v35 = vld [vmem:[%s12843_s20 + $0x40] sm:$0xff] }
 0x3ba   :  { %841 = vmax.xlane.f32.xlu0 %v840_v37 }
 0x3bb   :  { %11828 = vmatprep.subr.msk.bf16.mxu0 %vm13005_vm5, %v11826_v36 }
 0x3bc   :  { %11831 = vmatpush3.bf16.xpose.msk.msra.mxu0 %vm13005_vm5, %v11826_v36  ;;  %v9877_v36 = vld [vmem:[%s12843_s20 + $0x48] sm:$0xff] }
 0x3bd   :  { %v11836_v37 = vpack.c.bf16 %v9877_v36, %v9876_v35  ;;  %v9900_v36 = vld [vmem:[%s12858_s25 + $0x8] sm:$0xf] }
 0x443   :  { %v839_v38 = vpop.xlane.xlu0 %838 }
 0x444   :  { %v843_v39 = vsub.f32 %v835_v31, %v839_v38  ;;  %v9869_v38 = vld [vmem:[%s12858_s25 + $0x4] sm:$0xf] }
 0x445   :  { %10966 = vmatprep.subr.msk.mxu0 %vm1383_vm6, %v9869_v38 }
 0x446   :  { %v845_v40 = vmul.f32 1.442695, %v843_v39 }
 0x447   :  { %v842_v41 = vpop.xlane.xlu0 %841 }
 0x448   :  { %12558 = vpow2.f32 %v845_v40  ;;  %v844_v42 = vsub.f32 %v836_v33, %v842_v41 }
 0x44a   :  { %v847_v43 = vmul.f32 1.442695, %v844_v42  ;;  %v9878_v42 = vld [vmem:[%s12843_s20 + $0x50] sm:$0xff] }
 0x44c   :  { %12560 = vpow2.f32 %v847_v43  ;;  %v9879_v43 = vld [vmem:[%s12843_s20 + $0x58] sm:$0xff] }
 0x452   :  { %v12559_v44 = vpop.eup %12558 }
 0x453   :  { %v849_v45 = vsel %vm145_vm1, %v12559_v44, 0.0 }
 0x454   :  { %850 = vadd.xlane.f32.xlu1 %v849_v45 }
 0x456   :  { %v12561_v46 = vpop.eup %12560 }
 0x457   :  { %v852_v47 = vsel %vm145_vm1, %v12561_v46, 0.0 }
 0x458   :  { %853 = vadd.xlane.f32.xlu1 %v852_v47  ;;  %v11840_v47 = vpack.c.bf16 %v9879_v43, %v9878_v42 }
 0x4e1   :  { %v851_v51 = vpop.xlane.xlu1 %850 }
 0x4e2   :  { %12562 = vrcp.f32 %v851_v51  ;;  %v9890_v51 = vld [vmem:[%s12853_s4 + $0x50] sm:$0xff] }
 0x4e5   :  { %v854_v52 = vpop.xlane.xlu1 %853 }
 0x4e6   :  { %12564 = vrcp.f32 %v854_v52  ;;  %v9891_v52 = vld [vmem:[%s12853_s4 + $0x58] sm:$0xff] }
 0x4ec   :  { %v12563_v53 = vpop.eup %12562 }
 0x4ed   :  { %v857_v54 = vmul.f32 %v12563_v53, %v12559_v44  ;;  %v11856_v53 = vpack.c.bf16 %v9891_v52, %v9890_v51  ;;  %v9910_v52 = vld [vmem:[%s12848_s27 + $0x60] sm:$0xff] }
 0x4ef   :  { %10916 = vmatprep.mubr.msk.f32.mxu1 %vm145_vm1, %v857_v54  ;;  %v940_v54 = vld [vmem:[%s12858_s25] sm:$0xf] }
 0x4f0   :  { %v12565_v57 = vpop.eup %12564 }
 0x4f1   :  { %v858_v58 = vmul.f32 %v12565_v57, %v12561_v46 }
 0x4f3   :  { %10917 = vmatmul.mubr.msk.f32.vlgmr.msra.gmra.mrb[8].mxu1 %vm145_vm1, %v858_v58 }
 0x4f4   :  { %11805 = vmatpush3.bf16.msra.mxu1 %v11802_v50  ;;  %10927 = vmatprep.mubr.msk.f32.mxu1 %vm505_vm3, %v12985_v7  ;;  %v11852_v50 = vpack.c.bf16 %v9889_v49, %v9888_v48  ;;  %v9918_v49 = vld [vmem:[%s12853_s4 + $0x70] sm:$0xff] }
 0x4f5   :  { %11807 = vmatprep.subr.bf16.mxu1 %v11806_v59 }
 0x4f8   :  { %11809 = vmatpush3.bf16.msra.mxu1 %v11806_v59  ;;  %v11844_v59 = vpack.c.bf16 %v9883_v56, %v9882_v55  ;;  %v9912_v55 = vld [vmem:[%s12848_s27 + $0x70] sm:$0xff]  ;;  %v9913_v56 = vld [vmem:[%s12848_s27 + $0x78] sm:$0xff] }
 0x4f9   :  { %11819 = vmatprep.subr.bf16.mxu1 %v11818_v63 }
 0x4fb   :  { %10928 = vmatmul.mubr.msk.f32.vlgmr.msra.gmra.mrb[10].mxu1 %vm505_vm3, %v12987_v8 }
 0x4fc   :  { %11821 = vmatpush3.bf16.msra.mxu1 %v11818_v63  ;;  %10949 = vmatprep.mubr.msk.f32.mxu1 %vm505_vm3, %v12985_v7 }
 0x4fd   :  { %11823 = vmatprep.subr.bf16.mxu1 %v11822_v3 }
 0x500   :  { %11825 = vmatpush3.bf16.msra.mxu1 %v11822_v3 }
 0x503   :  { %10950 = vmatmul.mubr.msk.f32.vlgmr.msra.gmra.mrb[12].mxu1 %vm505_vm3, %v12987_v8 }
 0x5c6   :  { %v13055_v5 = vpop.f32.mrb[8].mxu1 }
 0x5c7   :  { %v13057_v6 = vpop.f32.mrb[9].mxu1 }
 0x5ce   :  { %v10929_v9 = vpop.f32.mrb[10].mxu1 }
 0x5cf   :  { %v1012_v10 = vpop.f32.mrb[11].mxu1 }
 0x5d0   :  { %10956 = vmatprep.mubr.msk.f32.mxu0 %vm745_vm4, %v1012_v10 }
 0x5d1   :  { %10957 = vmatmul.mubr.msk.f32.vlgmr.msra.gmra.mrb[10].mxu0 %vm745_vm4, %v10929_v9 }
 0x5d2   :  { %10967 = vmatpush3.msk.msra.mxu0 %vm1383_vm6, %v9869_v38 }
 0x5d3   :  { %10971 = vmatprep.subr.msk.mxu0 %vm1383_vm6, %v940_v54 }
 0x5d6   :  { %v10951_v11 = vpop.f32.mrb[12].mxu1 }
 0x5d7   :  { %v1172_v12 = vpop.f32.mrb[13].mxu1 }
 0x5d8   :  { %v11832_v13 = vpack.c.bf16 %v10951_v11, %v1172_v12 }
 0x5da   :  { %11833 = vmatprep.subr.bf16.mxu1 %v11832_v13 }
 0x5db   :  { %11835 = vmatpush3.bf16.msra.mxu1 %v11832_v13 }
 0x5dc   :  { %11837 = vmatprep.subr.bf16.mxu1 %v11836_v37 }
 0x6a4   :  { %v10958_v14 = vpop.f32.mrb[10].mxu0 }
 0x6a5   :  { %v1269_v15 = vmul.f32 0.5, %v10958_v14  ;;  %v1259_v17 = vpop.f32.mrb[11].mxu0 }
 0x6a6   :  { %v1268_v18 = vmul.f32 0.5, %v1259_v17 }
 0x6a7   :  { %v1271_v19 = vadd.f32 %v1269_v15, %v13025_v30 }
 0x6a8   :  { %v1270_v20 = vadd.f32 %v1268_v18, %v13022_v27 }
 0x6a9   :  { %v1275_v21 = vsel %vm145_vm1, %v1271_v19, -inf }
 0x6aa   :  { %1276 = vmax.xlane.f32.xlu1 %v1275_v21  ;;  %v1272_v22 = vsel %vm145_vm1, %v1270_v20, -inf }
 0x6ab   :  { %1273 = vmax.xlane.f32.xlu0 %v1272_v22 }
 0x737   :  { %v1277_v23 = vpop.xlane.xlu1 %1276 }
 0x738   :  { %v1279_v24 = vsub.f32 %v1271_v19, %v1277_v23  ;;  %v1274_v25 = vpop.xlane.xlu0 %1273 }
 0x739   :  { %v1278_v26 = vsub.f32 %v1270_v20, %v1274_v25 }
 0x73a   :  { %v1282_v28 = vmul.f32 1.442695, %v1279_v24 }
 0x73b   :  { %v1280_v29 = vmul.f32 1.442695, %v1278_v26 }
 0x73c   :  { %12566 = vpow2.f32 %v1282_v28 }
 0x73d   :  { %12568 = vpow2.f32 %v1280_v29 }
 0x746   :  { %v12567_v31 = vpop.eup %12566 }
 0x747   :  { %v12569_v32 = vpop.eup %12568  ;;  %v1287_v33 = vsel %vm145_vm1, %v12567_v31, 0.0 }
 0x748   :  { %1288 = vadd.xlane.f32.xlu1 %v1287_v33  ;;  %v1284_v34 = vsel %vm145_vm1, %v12569_v32, 0.0  ;;  %v9904_v33 = vld [vmem:[%s12843_s20 + $0x60] sm:$0xff] }
 0x749   :  { %1285 = vadd.xlane.f32.xlu0 %v1284_v34  ;;  %v9905_v34 = vld [vmem:[%s12843_s20 + $0x68] sm:$0xff] }
 0x74a   :  { %v11870_v35 = vpack.c.bf16 %v9905_v34, %v9904_v33  ;;  %v9928_v33 = vld [vmem:[%s12858_s25 + $0xc] sm:$0xf] }
 0x7d5   :  { %v1289_v39 = vpop.xlane.xlu1 %1288 }
 0x7d6   :  { %12570 = vrcp.f32 %v1289_v39  ;;  %v1286_v40 = vpop.xlane.xlu0 %1285 }
 0x7d7   :  { %12572 = vrcp.f32 %v1286_v40  ;;  %v9906_v40 = vld [vmem:[%s12843_s20 + $0x70] sm:$0xff] }
 0x7e0   :  { %v12571_v41 = vpop.eup %12570 }
 0x7e1   :  { %v12573_v44 = vpop.eup %12572  ;;  %v1293_v46 = vmul.f32 %v12571_v41, %v12567_v31  ;;  %v9907_v41 = vld [vmem:[%s12843_s20 + $0x78] sm:$0xff] }
 0x7e2   :  { %v1292_v45 = vmul.f32 %v12573_v44, %v12569_v32 }
 0x7e4   :  { %10963 = vmatprep.mubr.msk.f32.mxu1 %vm145_vm1, %v1292_v45  ;;  %v11874_v45 = vpack.c.bf16 %v9907_v41, %v9906_v40 }
 0x7e5   :  { %10964 = vmatmul.mubr.msk.f32.vlgmr.msra.gmra.mrb[14].mxu1 %vm145_vm1, %v1293_v46  ;;  %v9916_v46 = vld [vmem:[%s12853_s4 + $0x60] sm:$0xff] }
 0x7e6   :  { %11839 = vmatpush3.bf16.msra.mxu1 %v11836_v37  ;;  %10984 = vmatprep.mubr.msk.f32.mxu1 %vm505_vm3, %v12985_v7 }
 0x7e7   :  { %11841 = vmatprep.subr.bf16.mxu1 %v11840_v47 }
 0x7ea   :  { %11843 = vmatpush3.bf16.msra.mxu1 %v11840_v47  ;;  %v9917_v47 = vld [vmem:[%s12853_s4 + $0x68] sm:$0xff] }
 0x7eb   :  { %11853 = vmatprep.subr.bf16.mxu1 %v11852_v50  ;;  %v11886_v48 = vpack.c.bf16 %v9917_v47, %v9916_v46  ;;  %v9946_v46 = vld [vmem:[%s12853_s4 + $0x90] sm:$0xff]  ;;  %v9947_v47 = vld [vmem:[%s12853_s4 + $0x98] sm:$0xff] }
 0x7ed   :  { %10985 = vmatmul.mubr.msk.f32.vlgmr.msra.gmra.mrb[16].mxu1 %vm505_vm3, %v12987_v8 }
 0x7ee   :  { %11855 = vmatpush3.bf16.msra.mxu1 %v11852_v50  ;;  %11006 = vmatprep.mubr.msk.f32.mxu1 %vm505_vm3, %v12985_v7  ;;  %v9919_v50 = vld [vmem:[%s12853_s4 + $0x78] sm:$0xff] }
 0x7ef   :  { %11857 = vmatprep.subr.bf16.mxu1 %v11856_v53  ;;  %v11890_v51 = vpack.c.bf16 %v9919_v50, %v9918_v49  ;;  %v9938_v49 = vld [vmem:[%s12848_s27 + $0x80] sm:$0xff]  ;;  %v9939_v50 = vld [vmem:[%s12848_s27 + $0x88] sm:$0xff] }
 0x7f2   :  { %11859 = vmatpush3.bf16.msra.mxu1 %v11856_v53  ;;  %v9911_v53 = vld [vmem:[%s12848_s27 + $0x68] sm:$0xff] }
 0x7f5   :  { %11007 = vmatmul.mubr.msk.f32.vlgmr.msra.gmra.mrb[18].mxu1 %vm505_vm3, %v12987_v8 }
 0x8b8   :  { %v10965_v57 = vpop.f32.mrb[14].mxu1 }
 0x8b9   :  { %v1366_v58 = vpop.f32.mrb[15].mxu1 }
 0x8ba   :  { %10968 = vmatprep.mubr.msk.f32.mxu0 %vm745_vm4, %v1366_v58 }
 0x8bb   :  { %10969 = vmatmul.mubr.msk.f32.vlgmr.msra.gmra.mrb[12].mxu0 %vm745_vm4, %v10965_v57 }
 0x8bc   :  { %10972 = vmatpush3.msk.msra.mxu0 %vm1383_vm6, %v940_v54  ;;  %10973 = vmatprep.mubr.msk.f32.mxu0 %vm745_vm4, %v13057_v6  ;;  %v11878_v54 = vpack.c.bf16 %v9911_v53, %v9910_v52  ;;  %v9940_v52 = vld [vmem:[%s12848_s27 + $0x90] sm:$0xff]  ;;  %v9941_v53 = vld [vmem:[%s12848_s27 + $0x98] sm:$0xff] }
 0x8bd   :  { %11845 = vmatprep.subr.bf16.mxu0 %v11844_v59 }
 0x8c0   :  { %v10986_v63 = vpop.f32.mrb[16].mxu1 }
 0x8c1   :  { %v1617_v0 = vpop.f32.mrb[17].mxu1 }
 0x8c3   :  { %10974 = vmatmul.mubr.msk.f32.vlgmr.msra.gmra.mrb[12].mxu0 %vm745_vm4, %v13055_v5 }
 0x8c4   :  { %11847 = vmatpush3.bf16.msra.mxu0 %v11844_v59  ;;  %10995 = vmatprep.mubr.msk.f32.mxu0 %vm505_vm3, %v12985_v7  ;;  %v11882_v59 = vpack.c.bf16 %v9913_v56, %v9912_v55  ;;  %v11916_v56 = vpack.c.bf16 %v9941_v53, %v9940_v52 }
 0x8c5   :  { %11849 = vmatprep.subr.bf16.mxu0 %v11848_v1 }
 0x8c8   :  { %11851 = vmatpush3.bf16.msra.mxu0 %v11848_v1  ;;  %v11008_v3 = vpop.f32.mrb[18].mxu1 }
 0x8c9   :  { %v1777_v9 = vpop.f32.mrb[19].mxu1 }
 0x8ca   :  { %v11866_v10 = vpack.c.bf16 %v11008_v3, %v1777_v9 }
 0x8cb   :  { %10996 = vmatmul.mubr.msk.f32.vlgmr.msra.gmra.mrb[14].mxu0 %vm505_vm3, %v12987_v8 }
 0x8cc   :  { %11013 = vmatprep.mubr.msk.f32.mxu0 %vm745_vm4, %v1617_v0  ;;  %11867 = vmatprep.subr.bf16.mxu1 %v11866_v10 }
 0x8cd   :  { %11869 = vmatpush3.bf16.msra.mxu1 %v11866_v10 }
 0x8ce   :  { %11871 = vmatprep.subr.bf16.mxu1 %v11870_v35 }
 0x99e   :  { %v10997_v6 = vpop.f32.mrb[14].mxu0 }
 0x99f   :  { %v1697_v11 = vpop.f32.mrb[15].mxu0 }
 0x9a0   :  { %v11860_v12 = vpack.c.bf16 %v10997_v6, %v1697_v11 }
 0x9a2   :  { %11862 = vmatprep.subr.msk.bf16.mxu0 %vm13005_vm5, %v11860_v12 }
 0x9a3   :  { %11865 = vmatpush3.bf16.xpose.msk.msra.mxu0 %vm13005_vm5, %v11860_v12 }
 0x9a4   :  { %11023 = vmatprep.subr.msk.mxu0 %vm1383_vm6, %v9900_v36 }
 0x9aa   :  { %11014 = vmatmul.mubr.msk.f32.vlgmr.msra.gmra.mrb[16].mxu0 %vm745_vm4, %v10986_v63 }
 0x9ab   :  { %11024 = vmatpush3.msk.msra.mxu0 %vm1383_vm6, %v9900_v36 }
 0x9ac   :  { %11879 = vmatprep.subr.bf16.mxu0 %v11878_v54 }
 0xa7d   :  { %v11015_v5 = vpop.f32.mrb[16].mxu0 }
 0xa7e   :  { %v1874_v13 = vmul.f32 0.5, %v11015_v5  ;;  %v1864_v14 = vpop.f32.mrb[17].mxu0 }
 0xa7f   :  { %v1873_v15 = vmul.f32 0.5, %v1864_v14 }
 0xa80   :  { %v1876_v17 = vadd.f32 %v1874_v13, %v13025_v30 }
 0xa81   :  { %v1875_v18 = vadd.f32 %v1873_v15, %v13022_v27 }
 0xa82   :  { %v1880_v19 = vsel %vm145_vm1, %v1876_v17, -inf }
 0xa83   :  { %1881 = vmax.xlane.f32.xlu1 %v1880_v19  ;;  %v1877_v20 = vsel %vm145_vm1, %v1875_v18, -inf }
 0xa84   :  { %1878 = vmax.xlane.f32.xlu0 %v1877_v20 }
 0xb10   :  { %v1882_v21 = vpop.xlane.xlu1 %1881 }
 0xb11   :  { %v1884_v22 = vsub.f32 %v1876_v17, %v1882_v21  ;;  %v1879_v23 = vpop.xlane.xlu0 %1878 }
 0xb12   :  { %v1883_v24 = vsub.f32 %v1875_v18, %v1879_v23 }
 0xb13   :  { %v1887_v25 = vmul.f32 1.442695, %v1884_v22 }
 0xb14   :  { %v1885_v26 = vmul.f32 1.442695, %v1883_v24 }
 0xb15   :  { %12574 = vpow2.f32 %v1887_v25 }
 0xb16   :  { %12576 = vpow2.f32 %v1885_v26 }
 0xb1f   :  { %v12575_v28 = vpop.eup %12574 }
 0xb20   :  { %v12577_v29 = vpop.eup %12576  ;;  %v1892_v31 = vsel %vm145_vm1, %v12575_v28, 0.0 }
 0xb21   :  { %1893 = vadd.xlane.f32.xlu1 %v1892_v31  ;;  %v1889_v32 = vsel %vm145_vm1, %v12577_v29, 0.0  ;;  %v9933_v31 = vld [vmem:[%s12843_s20 + $0x88] sm:$0xff] }
 0xb22   :  { %1890 = vadd.xlane.f32.xlu0 %v1889_v32 }
 0xbae   :  { %v1894_v37 = vpop.xlane.xlu1 %1893 }
 0xbaf   :  { %12578 = vrcp.f32 %v1894_v37  ;;  %v1891_v38 = vpop.xlane.xlu0 %1890  ;;  %v9934_v37 = vld [vmem:[%s12843_s20 + $0x90] sm:$0xff] }
 0xbb0   :  { %12580 = vrcp.f32 %v1891_v38  ;;  %v9935_v38 = vld [vmem:[%s12843_s20 + $0x98] sm:$0xff] }
 0xbb9   :  { %v12579_v39 = vpop.eup %12578 }
 0xbba   :  { %v12581_v42 = vpop.eup %12580  ;;  %v1898_v44 = vmul.f32 %v12579_v39, %v12575_v28 }
 0xbbb   :  { %v1897_v43 = vmul.f32 %v12581_v42, %v12577_v29  ;;  %v9932_v29 = vld [vmem:[%s12843_s20 + $0x80] sm:$0xff]  ;;  %v11908_v42 = vpack.c.bf16 %v9935_v38, %v9934_v37 }
 0xbbc   :  { %v11904_v32 = vpack.c.bf16 %v9933_v31, %v9932_v29  ;;  %v9956_v29 = vld [vmem:[%s12858_s25 + $0x10] sm:$0xf] }
 0xbbd   :  { %11020 = vmatprep.mubr.msk.f32.mxu1 %vm145_vm1, %v1897_v43  ;;  %v9944_v43 = vld [vmem:[%s12853_s4 + $0x80] sm:$0xff] }
 0xbbe   :  { %11021 = vmatmul.mubr.msk.f32.vlgmr.msra.gmra.mrb[20].mxu1 %vm145_vm1, %v1898_v44  ;;  %v9945_v44 = vld [vmem:[%s12853_s4 + $0x88] sm:$0xff] }
 0xbbf   :  { %11873 = vmatpush3.bf16.msra.mxu1 %v11870_v35  ;;  %11036 = vmatprep.mubr.msk.f32.mxu1 %vm505_vm3, %v12985_v7 }
 0xbc0   :  { %11875 = vmatprep.subr.bf16.mxu1 %v11874_v45 }
 0xbc3   :  { %11877 = vmatpush3.bf16.msra.mxu1 %v11874_v45  ;;  %v11920_v45 = vpack.c.bf16 %v9945_v44, %v9944_v43  ;;  %v9974_v43 = vld [vmem:[%s12853_s4 + $0xb0] sm:$0xff]  ;;  %v9975_v44 = vld [vmem:[%s12853_s4 + $0xb8] sm:$0xff] }
 0xbc4   :  { %11887 = vmatprep.subr.bf16.mxu1 %v11886_v48 }
 0xbc6   :  { %11037 = vmatmul.mubr.msk.f32.vlgmr.msra.gmra.mrb[22].mxu1 %vm505_vm3, %v12987_v8 }
 0xbc7   :  { %11889 = vmatpush3.bf16.msra.mxu1 %v11886_v48  ;;  %11058 = vmatprep.mubr.msk.f32.mxu1 %vm505_vm3, %v12985_v7  ;;  %v11924_v48 = vpack.c.bf16 %v9947_v47, %v9946_v46  ;;  %v9966_v46 = vld [vmem:[%s12848_s27 + $0xa0] sm:$0xff]  ;;  %v9967_v47 = vld [vmem:[%s12848_s27 + $0xa8] sm:$0xff] }
 0xbc8   :  { %11891 = vmatprep.subr.bf16.mxu1 %v11890_v51 }
 0xbcb   :  { %11893 = vmatpush3.bf16.msra.mxu1 %v11890_v51  ;;  %v11912_v51 = vpack.c.bf16 %v9939_v50, %v9938_v49  ;;  %v9968_v49 = vld [vmem:[%s12848_s27 + $0xb0] sm:$0xff]  ;;  %v9969_v50 = vld [vmem:[%s12848_s27 + $0xb8] sm:$0xff] }
 0xbcc   :  { %v11950_v53 = vpack.c.bf16 %v9969_v50, %v9968_v49 }
 0xbce   :  { %11059 = vmatmul.mubr.msk.f32.vlgmr.msra.gmra.mrb[24].mxu1 %vm505_vm3, %v12987_v8 }
 0xc91   :  { %v11022_v57 = vpop.f32.mrb[20].mxu1 }
 0xc92   :  { %v1971_v58 = vpop.f32.mrb[21].mxu1 }
 0xc93   :  { %11025 = vmatprep.mubr.msk.f32.mxu0 %vm745_vm4, %v1971_v58 }
 0xc94   :  { %11026 = vmatmul.mubr.msk.f32.vlgmr.msra.gmra.mrb[12].mxu0 %vm745_vm4, %v11022_v57 }
 0xc95   :  { %11881 = vmatpush3.bf16.msra.mxu0 %v11878_v54  ;;  %11047 = vmatprep.mubr.msk.f32.mxu0 %vm505_vm3, %v12985_v7 }
 0xc96   :  { %11883 = vmatprep.subr.bf16.mxu0 %v11882_v59 }
 0xc99   :  { %v11038_v60 = vpop.f32.mrb[22].mxu1  ;;  %11885 = vmatpush3.bf16.msra.mxu0 %v11882_v59 }
 0xc9a   :  { %v2139_v61 = vpop.f32.mrb[23].mxu1 }
 0xc9c   :  { %11048 = vmatmul.mubr.msk.f32.vlgmr.msra.gmra.mrb[18].mxu0 %vm505_vm3, %v12987_v8 }
 0xc9d   :  { %11065 = vmatprep.mubr.msk.f32.mxu0 %vm745_vm4, %v2139_v61 }
 0xca1   :  { %v11060_v63 = vpop.f32.mrb[24].mxu1 }
 0xca2   :  { %v2299_v0 = vpop.f32.mrb[25].mxu1 }
 0xca3   :  { %v11900_v1 = vpack.c.bf16 %v11060_v63, %v2299_v0 }
 0xca5   :  { %11901 = vmatprep.subr.bf16.mxu1 %v11900_v1 }
 0xca6   :  { %11903 = vmatpush3.bf16.msra.mxu1 %v11900_v1 }
 0xca7   :  { %11905 = vmatprep.subr.bf16.mxu1 %v11904_v32 }
 0xd6f   :  { %v11049_v3 = vpop.f32.mrb[18].mxu0 }
 0xd70   :  { %v2219_v9 = vpop.f32.mrb[19].mxu0 }
 0xd71   :  { %v11894_v10 = vpack.c.bf16 %v11049_v3, %v2219_v9 }
 0xd73   :  { %11896 = vmatprep.subr.msk.bf16.mxu0 %vm13005_vm5, %v11894_v10 }
 0xd74   :  { %11899 = vmatpush3.bf16.xpose.msk.msra.mxu0 %vm13005_vm5, %v11894_v10 }
 0xd75   :  { %11075 = vmatprep.subr.msk.mxu0 %vm1383_vm6, %v9928_v33 }
 0xd7b   :  { %11066 = vmatmul.mubr.msk.f32.vlgmr.msra.gmra.mrb[20].mxu0 %vm745_vm4, %v11038_v60 }
 0xd7c   :  { %11076 = vmatpush3.msk.msra.mxu0 %vm1383_vm6, %v9928_v33 }
 0xd7d   :  { %11913 = vmatprep.subr.bf16.mxu0 %v11912_v51 }
 0xe4e   :  { %v11067_v6 = vpop.f32.mrb[20].mxu0 }
 0xe4f   :  { %v2396_v11 = vmul.f32 0.5, %v11067_v6  ;;  %v2386_v12 = vpop.f32.mrb[21].mxu0 }
 0xe50   :  { %v2395_v5 = vmul.f32 0.5, %v2386_v12 }
 0xe51   :  { %v2398_v13 = vadd.f32 %v2396_v11, %v13025_v30 }
 0xe52   :  { %v2397_v14 = vadd.f32 %v2395_v5, %v13022_v27 }
 0xe53   :  { %v2402_v15 = vsel %vm145_vm1, %v2398_v13, -inf }
 0xe54   :  { %2403 = vmax.xlane.f32.xlu1 %v2402_v15  ;;  %v2399_v17 = vsel %vm145_vm1, %v2397_v14, -inf }
 0xe55   :  { %2400 = vmax.xlane.f32.xlu0 %v2399_v17 }
 0xee1   :  { %v2404_v18 = vpop.xlane.xlu1 %2403 }
 0xee2   :  { %v2406_v19 = vsub.f32 %v2398_v13, %v2404_v18  ;;  %v2401_v20 = vpop.xlane.xlu0 %2400 }
 0xee3   :  { %v2405_v21 = vsub.f32 %v2397_v14, %v2401_v20 }
 0xee4   :  { %v2409_v22 = vmul.f32 1.442695, %v2406_v19 }
 0xee5   :  { %v2407_v23 = vmul.f32 1.442695, %v2405_v21 }
 0xee6   :  { %12582 = vpow2.f32 %v2409_v22 }
 0xee7   :  { %12584 = vpow2.f32 %v2407_v23 }
 0xef0   :  { %v12583_v24 = vpop.eup %12582 }
 0xef1   :  { %v12585_v25 = vpop.eup %12584  ;;  %v2414_v26 = vsel %vm145_vm1, %v12583_v24, 0.0 }
 0xef2   :  { %2415 = vadd.xlane.f32.xlu1 %v2414_v26  ;;  %v2411_v28 = vsel %vm145_vm1, %v12585_v25, 0.0  ;;  %v9961_v26 = vld [vmem:[%s12843_s20 + $0xa8] sm:$0xff] }
 0xef3   :  { %2412 = vadd.xlane.f32.xlu0 %v2411_v28 }
 0xf7f   :  { %v2416_v34 = vpop.xlane.xlu1 %2415 }
 0xf80   :  { %12586 = vrcp.f32 %v2416_v34  ;;  %v2413_v35 = vpop.xlane.xlu0 %2412  ;;  %v9962_v34 = vld [vmem:[%s12843_s20 + $0xb0] sm:$0xff] }
 0xf81   :  { %12588 = vrcp.f32 %v2413_v35  ;;  %v9963_v35 = vld [vmem:[%s12843_s20 + $0xb8] sm:$0xff] }
 0xf8a   :  { %v12587_v36 = vpop.eup %12586 }
 0xf8b   :  { %v12589_v39 = vpop.eup %12588  ;;  %v2420_v41 = vmul.f32 %v12587_v36, %v12583_v24 }
 0xf8c   :  { %v2419_v40 = vmul.f32 %v12589_v39, %v12585_v25  ;;  %v9960_v25 = vld [vmem:[%s12843_s20 + $0xa0] sm:$0xff]  ;;  %v11942_v39 = vpack.c.bf16 %v9963_v35, %v9962_v34 }
 0xf8d   :  { %v11938_v28 = vpack.c.bf16 %v9961_v26, %v9960_v25  ;;  %v10000_v35 = vld [vmem:[%s12853_s4 + $0xc0] sm:$0xff] }
 0xf8e   :  { %11072 = vmatprep.mubr.msk.f32.mxu1 %vm145_vm1, %v2419_v40  ;;  %v9972_v40 = vld [vmem:[%s12853_s4 + $0xa0] sm:$0xff] }
 0xf8f   :  { %11073 = vmatmul.mubr.msk.f32.vlgmr.msra.gmra.mrb[26].mxu1 %vm145_vm1, %v2420_v41  ;;  %v9973_v41 = vld [vmem:[%s12853_s4 + $0xa8] sm:$0xff] }
 0xf90   :  { %11907 = vmatpush3.bf16.msra.mxu1 %v11904_v32  ;;  %11088 = vmatprep.mubr.msk.f32.mxu1 %vm505_vm3, %v12985_v7 }
 0xf91   :  { %11909 = vmatprep.subr.bf16.mxu1 %v11908_v42 }
 0xf94   :  { %11911 = vmatpush3.bf16.msra.mxu1 %v11908_v42  ;;  %v11954_v42 = vpack.c.bf16 %v9973_v41, %v9972_v40  ;;  %v9994_v41 = vld [vmem:[%s12848_s27 + $0xc0] sm:$0xff] }
 0xf95   :  { %11921 = vmatprep.subr.bf16.mxu1 %v11920_v45 }
 0xf97   :  { %11089 = vmatmul.mubr.msk.f32.vlgmr.msra.gmra.mrb[28].mxu1 %vm505_vm3, %v12987_v8 }
 0xf98   :  { %11923 = vmatpush3.bf16.msra.mxu1 %v11920_v45  ;;  %11110 = vmatprep.mubr.msk.f32.mxu1 %vm505_vm3, %v12985_v7  ;;  %v11958_v45 = vpack.c.bf16 %v9975_v44, %v9974_v43  ;;  %v9996_v44 = vld [vmem:[%s12848_s27 + $0xd0] sm:$0xff] }
 0xf99   :  { %11925 = vmatprep.subr.bf16.mxu1 %v11924_v48 }
 0xf9c   :  { %11927 = vmatpush3.bf16.msra.mxu1 %v11924_v48  ;;  %v11946_v48 = vpack.c.bf16 %v9967_v47, %v9966_v46 }
 0xf9f   :  { %11111 = vmatmul.mubr.msk.f32.vlgmr.msra.gmra.mrb[30].mxu1 %vm505_vm3, %v12987_v8 }
0x1062   :  { %v11074_v54 = vpop.f32.mrb[26].mxu1 }
0x1063   :  { %v2493_v55 = vpop.f32.mrb[27].mxu1 }
0x1064   :  { %11077 = vmatprep.mubr.msk.f32.mxu0 %vm745_vm4, %v2493_v55 }
0x1065   :  { %11078 = vmatmul.mubr.msk.f32.vlgmr.msra.gmra.mrb[12].mxu0 %vm745_vm4, %v11074_v54 }
0x1066   :  { %11915 = vmatpush3.bf16.msra.mxu0 %v11912_v51  ;;  %11099 = vmatprep.mubr.msk.f32.mxu0 %vm505_vm3, %v12985_v7 }
0x1067   :  { %11917 = vmatprep.subr.bf16.mxu0 %v11916_v56 }
0x106a   :  { %v11090_v57 = vpop.f32.mrb[28].mxu1  ;;  %11919 = vmatpush3.bf16.msra.mxu0 %v11916_v56 }
0x106b   :  { %v2661_v58 = vpop.f32.mrb[29].mxu1 }
0x106d   :  { %11100 = vmatmul.mubr.msk.f32.vlgmr.msra.gmra.mrb[22].mxu0 %vm505_vm3, %v12987_v8 }
0x106e   :  { %11117 = vmatprep.mubr.msk.f32.mxu0 %vm745_vm4, %v2661_v58 }
0x1072   :  { %v11112_v59 = vpop.f32.mrb[30].mxu1 }
0x1073   :  { %v2821_v60 = vpop.f32.mrb[31].mxu1 }
0x1074   :  { %v11934_v61 = vpack.c.bf16 %v11112_v59, %v2821_v60 }
0x1076   :  { %11935 = vmatprep.subr.bf16.mxu1 %v11934_v61 }
0x1077   :  { %11937 = vmatpush3.bf16.msra.mxu1 %v11934_v61 }
0x1078   :  { %11939 = vmatprep.subr.bf16.mxu1 %v11938_v28 }
0x1140   :  { %v11101_v63 = vpop.f32.mrb[22].mxu0 }
0x1141   :  { %v2741_v0 = vpop.f32.mrb[23].mxu0 }
0x1142   :  { %v11928_v1 = vpack.c.bf16 %v11101_v63, %v2741_v0 }
0x1144   :  { %11930 = vmatprep.subr.msk.bf16.mxu0 %vm13005_vm5, %v11928_v1 }
0x1145   :  { %11933 = vmatpush3.bf16.xpose.msk.msra.mxu0 %vm13005_vm5, %v11928_v1 }
0x1146   :  { %11127 = vmatprep.subr.msk.mxu0 %vm1383_vm6, %v9956_v29 }
0x114c   :  { %11118 = vmatmul.mubr.msk.f32.vlgmr.msra.gmra.mrb[24].mxu0 %vm745_vm4, %v11090_v57 }
0x114d   :  { %11128 = vmatpush3.msk.msra.mxu0 %vm1383_vm6, %v9956_v29  ;;  %v9991_v29 = vld [vmem:[%s12843_s20 + $0xd8] sm:$0xff] }
0x114e   :  { %11947 = vmatprep.subr.bf16.mxu0 %v11946_v48 }
0x121f   :  { %v11119_v3 = vpop.f32.mrb[24].mxu0 }
0x1220   :  { %v2918_v9 = vmul.f32 0.5, %v11119_v3  ;;  %v2908_v10 = vpop.f32.mrb[25].mxu0 }
0x1221   :  { %v2917_v6 = vmul.f32 0.5, %v2908_v10 }
0x1222   :  { %v2920_v11 = vadd.f32 %v2918_v9, %v13025_v30 }
0x1223   :  { %v2919_v12 = vadd.f32 %v2917_v6, %v13022_v27 }
0x1224   :  { %v2924_v5 = vsel %vm145_vm1, %v2920_v11, -inf }
0x1225   :  { %2925 = vmax.xlane.f32.xlu1 %v2924_v5  ;;  %v2921_v13 = vsel %vm145_vm1, %v2919_v12, -inf }
0x1226   :  { %2922 = vmax.xlane.f32.xlu0 %v2921_v13 }
0x12b2   :  { %v2926_v14 = vpop.xlane.xlu1 %2925 }
0x12b3   :  { %v2928_v15 = vsub.f32 %v2920_v11, %v2926_v14  ;;  %v2923_v17 = vpop.xlane.xlu0 %2922 }
0x12b4   :  { %v2927_v18 = vsub.f32 %v2919_v12, %v2923_v17 }
0x12b5   :  { %v2931_v19 = vmul.f32 1.442695, %v2928_v15 }
0x12b6   :  { %v2929_v20 = vmul.f32 1.442695, %v2927_v18 }
0x12b7   :  { %12590 = vpow2.f32 %v2931_v19 }
0x12b8   :  { %12592 = vpow2.f32 %v2929_v20  ;;  %v9988_v20 = vld [vmem:[%s12843_s20 + $0xc0] sm:$0xff] }
0x12c1   :  { %v12591_v21 = vpop.eup %12590 }
0x12c2   :  { %v12593_v22 = vpop.eup %12592  ;;  %v2936_v23 = vsel %vm145_vm1, %v12591_v21, 0.0 }
0x12c3   :  { %2937 = vadd.xlane.f32.xlu1 %v2936_v23  ;;  %v2933_v24 = vsel %vm145_vm1, %v12593_v22, 0.0  ;;  %v9984_v23 = vld [vmem:[%s12858_s25 + $0x14] sm:$0xf] }
0x12c4   :  { %2934 = vadd.xlane.f32.xlu0 %v2933_v24 }
0x1350   :  { %v2938_v31 = vpop.xlane.xlu1 %2937 }
0x1351   :  { %12594 = vrcp.f32 %v2938_v31  ;;  %v2935_v32 = vpop.xlane.xlu0 %2934 }
0x1352   :  { %12596 = vrcp.f32 %v2935_v32 }
0x135b   :  { %v12595_v33 = vpop.eup %12594 }
0x135c   :  { %v12597_v36 = vpop.eup %12596  ;;  %v2942_v38 = vmul.f32 %v12595_v33, %v12591_v21  ;;  %v9989_v21 = vld [vmem:[%s12843_s20 + $0xc8] sm:$0xff] }
0x135d   :  { %v2941_v37 = vmul.f32 %v12597_v36, %v12593_v22  ;;  %v11972_v22 = vpack.c.bf16 %v9989_v21, %v9988_v20  ;;  %v10001_v36 = vld [vmem:[%s12853_s4 + $0xc8] sm:$0xff]  ;;  %v10012_v20 = vld [vmem:[%s12858_s25 + $0x18] sm:$0xf] }
0x135f   :  { %11124 = vmatprep.mubr.msk.f32.mxu1 %vm145_vm1, %v2941_v37  ;;  %v11988_v37 = vpack.c.bf16 %v10001_v36, %v10000_v35  ;;  %v10030_v35 = vld [vmem:[%s12853_s4 + $0xf0] sm:$0xff]  ;;  %v10031_v36 = vld [vmem:[%s12853_s4 + $0xf8] sm:$0xff] }
0x1360   :  { %11125 = vmatmul.mubr.msk.f32.vlgmr.msra.gmra.mrb[32].mxu1 %vm145_vm1, %v2942_v38  ;;  %v10002_v38 = vld [vmem:[%s12853_s4 + $0xd0] sm:$0xff] }
0x1361   :  { %11941 = vmatpush3.bf16.msra.mxu1 %v11938_v28  ;;  %11140 = vmatprep.mubr.msk.f32.mxu1 %vm505_vm3, %v12985_v7  ;;  %v9990_v28 = vld [vmem:[%s12843_s20 + $0xd0] sm:$0xff] }
0x1362   :  { %11943 = vmatprep.subr.bf16.mxu1 %v11942_v39  ;;  %v11976_v34 = vpack.c.bf16 %v9991_v29, %v9990_v28 }
0x1365   :  { %11945 = vmatpush3.bf16.msra.mxu1 %v11942_v39  ;;  %v10003_v39 = vld [vmem:[%s12853_s4 + $0xd8] sm:$0xff] }
0x1366   :  { %11955 = vmatprep.subr.bf16.mxu1 %v11954_v42  ;;  %v11992_v40 = vpack.c.bf16 %v10003_v39, %v10002_v38  ;;  %v10022_v38 = vld [vmem:[%s12848_s27 + $0xe0] sm:$0xff]  ;;  %v10023_v39 = vld [vmem:[%s12848_s27 + $0xe8] sm:$0xff] }
0x1368   :  { %11141 = vmatmul.mubr.msk.f32.vlgmr.msra.gmra.mrb[34].mxu1 %vm505_vm3, %v12987_v8 }
0x1369   :  { %11957 = vmatpush3.bf16.msra.mxu1 %v11954_v42  ;;  %11162 = vmatprep.mubr.msk.f32.mxu1 %vm505_vm3, %v12985_v7  ;;  %v9995_v42 = vld [vmem:[%s12848_s27 + $0xc8] sm:$0xff] }
0x136a   :  { %11959 = vmatprep.subr.bf16.mxu1 %v11958_v45  ;;  %v11980_v43 = vpack.c.bf16 %v9995_v42, %v9994_v41  ;;  %v10024_v41 = vld [vmem:[%s12848_s27 + $0xf0] sm:$0xff]  ;;  %v10025_v42 = vld [vmem:[%s12848_s27 + $0xf8] sm:$0xff] }
0x136d   :  { %11961 = vmatpush3.bf16.msra.mxu1 %v11958_v45  ;;  %v9997_v45 = vld [vmem:[%s12848_s27 + $0xd8] sm:$0xff] }
0x1370   :  { %11163 = vmatmul.mubr.msk.f32.vlgmr.msra.gmra.mrb[36].mxu1 %vm505_vm3, %v12987_v8 }
0x1433   :  { %v11126_v51 = vpop.f32.mrb[32].mxu1 }
0x1434   :  { %v3015_v52 = vpop.f32.mrb[33].mxu1 }
0x1435   :  { %11129 = vmatprep.mubr.msk.f32.mxu0 %vm745_vm4, %v3015_v52 }
0x1436   :  { %11130 = vmatmul.mubr.msk.f32.vlgmr.msra.gmra.mrb[12].mxu0 %vm745_vm4, %v11126_v51 }
0x1437   :  { %11949 = vmatpush3.bf16.msra.mxu0 %v11946_v48  ;;  %11151 = vmatprep.mubr.msk.f32.mxu0 %vm505_vm3, %v12985_v7  ;;  %v11984_v48 = vpack.c.bf16 %v9997_v45, %v9996_v44  ;;  %v12018_v45 = vpack.c.bf16 %v10025_v42, %v10024_v41  ;;  %v10052_v42 = vld [vmem:[%s12848_s27 + $0x100] sm:$0xff] }
0x1438   :  { %11951 = vmatprep.subr.bf16.mxu0 %v11950_v53 }
0x143b   :  { %v11142_v54 = vpop.f32.mrb[34].mxu1  ;;  %11953 = vmatpush3.bf16.msra.mxu0 %v11950_v53 }
0x143c   :  { %v3183_v55 = vpop.f32.mrb[35].mxu1 }
0x143e   :  { %11152 = vmatmul.mubr.msk.f32.vlgmr.msra.gmra.mrb[26].mxu0 %vm505_vm3, %v12987_v8 }
0x143f   :  { %11169 = vmatprep.mubr.msk.f32.mxu0 %vm745_vm4, %v3183_v55 }
0x1443   :  { %v11164_v56 = vpop.f32.mrb[36].mxu1 }
0x1444   :  { %v3343_v57 = vpop.f32.mrb[37].mxu1 }
0x1445   :  { %v11968_v58 = vpack.c.bf16 %v11164_v56, %v3343_v57 }
0x1447   :  { %11969 = vmatprep.subr.bf16.mxu1 %v11968_v58 }
0x1448   :  { %11971 = vmatpush3.bf16.msra.mxu1 %v11968_v58 }
0x1449   :  { %11973 = vmatprep.subr.bf16.mxu1 %v11972_v22 }
0x1511   :  { %v11153_v59 = vpop.f32.mrb[26].mxu0 }
0x1512   :  { %v3263_v60 = vpop.f32.mrb[27].mxu0 }
0x1513   :  { %v11962_v61 = vpack.c.bf16 %v11153_v59, %v3263_v60 }
0x1515   :  { %11964 = vmatprep.subr.msk.bf16.mxu0 %vm13005_vm5, %v11962_v61 }
0x1516   :  { %11967 = vmatpush3.bf16.xpose.msk.msra.mxu0 %vm13005_vm5, %v11962_v61  ;;  %v13284_v61 = vld [vmem:[%s12778_s13 + $0x8] sm:$0xff] }
0x1517   :  { %11179 = vmatprep.subr.msk.mxu0 %vm1383_vm6, %v9984_v23 }
0x151d   :  { %11170 = vmatmul.mubr.msk.f32.vlgmr.msra.gmra.mrb[28].mxu0 %vm745_vm4, %v11142_v54 }
0x151e   :  { %11180 = vmatpush3.msk.msra.mxu0 %vm1383_vm6, %v9984_v23 }
0x151f   :  { %11981 = vmatprep.subr.bf16.mxu0 %v11980_v43 }
0x15f0   :  { %v11171_v63 = vpop.f32.mrb[28].mxu0 }
0x15f1   :  { %v3440_v0 = vmul.f32 0.5, %v11171_v63  ;;  %v3430_v1 = vpop.f32.mrb[29].mxu0 }
0x15f2   :  { %v3439_v3 = vmul.f32 0.5, %v3430_v1 }
0x15f3   :  { %v3442_v9 = vadd.f32 %v3440_v0, %v13025_v30  ;;  %v13288_v0 = vld [vmem:[%s12778_s13] sm:$0xff] }
0x15f4   :  { %v3441_v10 = vadd.f32 %v3439_v3, %v13022_v27 }
0x15f5   :  { %v3446_v6 = vsel %vm145_vm1, %v3442_v9, -inf }
0x15f6   :  { %3447 = vmax.xlane.f32.xlu1 %v3446_v6  ;;  %v3443_v11 = vsel %vm145_vm1, %v3441_v10, -inf }
0x15f7   :  { %3444 = vmax.xlane.f32.xlu0 %v3443_v11 }
0x1683   :  { %v3448_v12 = vpop.xlane.xlu1 %3447 }
0x1684   :  { %v3450_v5 = vsub.f32 %v3442_v9, %v3448_v12  ;;  %v3445_v13 = vpop.xlane.xlu0 %3444 }
0x1685   :  { %v3449_v14 = vsub.f32 %v3441_v10, %v3445_v13 }
0x1686   :  { %v3453_v15 = vmul.f32 1.442695, %v3450_v5 }
0x1687   :  { %v3451_v17 = vmul.f32 1.442695, %v3449_v14 }
0x1688   :  { %12598 = vpow2.f32 %v3453_v15 }
0x1689   :  { %12600 = vpow2.f32 %v3451_v17 }
0x1692   :  { %v12599_v30 = vpop.eup %12598 }
0x1693   :  { %v12601_v18 = vpop.eup %12600  ;;  %v3458_v27 = vsel %vm145_vm1, %v12599_v30, 0.0 }
0x1694   :  { %3459 = vadd.xlane.f32.xlu1 %v3458_v27  ;;  %v3455_v19 = vsel %vm145_vm1, %v12601_v18, 0.0  ;;  %v10017_v27 = vld [vmem:[%s12843_s20 + $0xe8] sm:$0xff] }
0x1695   :  { %3456 = vadd.xlane.f32.xlu0 %v3455_v19 }
0x1721   :  { %v3460_v24 = vpop.xlane.xlu1 %3459 }
0x1722   :  { %12602 = vrcp.f32 %v3460_v24  ;;  %v3457_v25 = vpop.xlane.xlu0 %3456  ;;  %v10018_v24 = vld [vmem:[%s12843_s20 + $0xf0] sm:$0xff] }
0x1723   :  { %12604 = vrcp.f32 %v3457_v25  ;;  %v10019_v25 = vld [vmem:[%s12843_s20 + $0xf8] sm:$0xff] }
0x172c   :  { %v12603_v26 = vpop.eup %12602 }
0x172d   :  { %v12605_v31 = vpop.eup %12604  ;;  %v3464_v33 = vmul.f32 %v12603_v26, %v12599_v30 }
0x172e   :  { %v3463_v32 = vmul.f32 %v12605_v31, %v12601_v18  ;;  %v10016_v18 = vld [vmem:[%s12843_s20 + $0xe0] sm:$0xff]  ;;  %v12010_v31 = vpack.c.bf16 %v10019_v25, %v10018_v24 }
0x172f   :  { %v12006_v19 = vpack.c.bf16 %v10017_v27, %v10016_v18 }
0x1730   :  { %11176 = vmatprep.mubr.msk.f32.mxu1 %vm145_vm1, %v3463_v32  ;;  %v10028_v32 = vld [vmem:[%s12853_s4 + $0xe0] sm:$0xff] }
0x1731   :  { %11177 = vmatmul.mubr.msk.f32.vlgmr.msra.gmra.mrb[38].mxu1 %vm145_vm1, %v3464_v33  ;;  %v10029_v33 = vld [vmem:[%s12853_s4 + $0xe8] sm:$0xff] }
0x1732   :  { %11975 = vmatpush3.bf16.msra.mxu1 %v11972_v22  ;;  %11192 = vmatprep.mubr.msk.f32.mxu1 %vm505_vm3, %v12985_v7 }
0x1733   :  { %11977 = vmatprep.subr.bf16.mxu1 %v11976_v34 }
0x1736   :  { %11979 = vmatpush3.bf16.msra.mxu1 %v11976_v34  ;;  %v12022_v34 = vpack.c.bf16 %v10029_v33, %v10028_v32 }
0x1737   :  { %11989 = vmatprep.subr.bf16.mxu1 %v11988_v37 }
0x1739   :  { %11193 = vmatmul.mubr.msk.f32.vlgmr.msra.gmra.mrb[40].mxu1 %vm505_vm3, %v12987_v8 }
0x173a   :  { %11991 = vmatpush3.bf16.msra.mxu1 %v11988_v37  ;;  %11214 = vmatprep.mubr.msk.f32.mxu1 %vm505_vm3, %v12985_v7  ;;  %v12026_v37 = vpack.c.bf16 %v10031_v36, %v10030_v35 }
0x173b   :  { %11993 = vmatprep.subr.bf16.mxu1 %v11992_v40 }
0x173e   :  { %11995 = vmatpush3.bf16.msra.mxu1 %v11992_v40  ;;  %v12014_v40 = vpack.c.bf16 %v10023_v39, %v10022_v38  ;;  %v10046_v39 = vld [vmem:[%s12843_s20 + $0x100] sm:$0xff] }
0x1741   :  { %11215 = vmatmul.mubr.msk.f32.vlgmr.msra.gmra.mrb[42].mxu1 %vm505_vm3, %v12987_v8 }
0x1804   :  { %v11178_v46 = vpop.f32.mrb[38].mxu1 }
0x1805   :  { %v3537_v47 = vpop.f32.mrb[39].mxu1 }
0x1806   :  { %11181 = vmatprep.mubr.msk.f32.mxu0 %vm745_vm4, %v3537_v47 }
0x1807   :  { %11182 = vmatmul.mubr.msk.f32.vlgmr.msra.gmra.mrb[12].mxu0 %vm745_vm4, %v11178_v46 }
0x1808   :  { %11983 = vmatpush3.bf16.msra.mxu0 %v11980_v43  ;;  %11203 = vmatprep.mubr.msk.f32.mxu0 %vm505_vm3, %v12985_v7 }
0x1809   :  { %11985 = vmatprep.subr.bf16.mxu0 %v11984_v48 }
0x180c   :  { %v11194_v49 = vpop.f32.mrb[40].mxu1  ;;  %11987 = vmatpush3.bf16.msra.mxu0 %v11984_v48 }
0x180d   :  { %v3705_v50 = vpop.f32.mrb[41].mxu1 }
0x180f   :  { %11204 = vmatmul.mubr.msk.f32.vlgmr.msra.gmra.mrb[30].mxu0 %vm505_vm3, %v12987_v8 }
0x1810   :  { %11221 = vmatprep.mubr.msk.f32.mxu0 %vm745_vm4, %v3705_v50 }
0x1814   :  { %v11216_v51 = vpop.f32.mrb[42].mxu1 }
0x1815   :  { %v3865_v52 = vpop.f32.mrb[43].mxu1 }
0x1816   :  { %v12002_v53 = vpack.c.bf16 %v11216_v51, %v3865_v52 }
0x1818   :  { %12003 = vmatprep.subr.bf16.mxu1 %v12002_v53 }
0x1819   :  { %12005 = vmatpush3.bf16.msra.mxu1 %v12002_v53 }
0x181a   :  { %12007 = vmatprep.subr.bf16.mxu1 %v12006_v19 }
0x18e2   :  { %v11205_v54 = vpop.f32.mrb[30].mxu0 }
0x18e3   :  { %v3785_v55 = vpop.f32.mrb[31].mxu0 }
0x18e4   :  { %v11996_v56 = vpack.c.bf16 %v11205_v54, %v3785_v55 }
0x18e6   :  { %11998 = vmatprep.subr.msk.bf16.mxu0 %vm13005_vm5, %v11996_v56 }
0x18e7   :  { %12001 = vmatpush3.bf16.xpose.msk.msra.mxu0 %vm13005_vm5, %v11996_v56 }
0x18e8   :  { %11231 = vmatprep.subr.msk.mxu0 %vm1383_vm6, %v10012_v20 }
0x18ee   :  { %11222 = vmatmul.mubr.msk.f32.vlgmr.msra.gmra.mrb[32].mxu0 %vm745_vm4, %v11194_v49 }
0x18ef   :  { %11232 = vmatpush3.msk.msra.mxu0 %vm1383_vm6, %v10012_v20 }
0x18f0   :  { %12015 = vmatprep.subr.bf16.mxu0 %v12014_v40 }
0x19c1   :  { %v11223_v57 = vpop.f32.mrb[32].mxu0 }
0x19c2   :  { %v3962_v58 = vmul.f32 0.5, %v11223_v57  ;;  %v3952_v59 = vpop.f32.mrb[33].mxu0 }
0x19c3   :  { %v3961_v60 = vmul.f32 0.5, %v3952_v59 }
0x19c4   :  { %v3964_v63 = vadd.f32 %v13284_v61, %v3962_v58 }
0x19c5   :  { %v3963_v1 = vadd.f32 %v13288_v0, %v3961_v60 }
0x19c6   :  { %v3968_v3 = vsel %vm145_vm1, %v3964_v63, -inf }
0x19c7   :  { %3969 = vmax.xlane.f32.xlu1 %v3968_v3  ;;  %v3965_v9 = vsel %vm145_vm1, %v3963_v1, -inf }
0x19c8   :  { %3966 = vmax.xlane.f32.xlu0 %v3965_v9 }
0x1a54   :  { %v3970_v10 = vpop.xlane.xlu1 %3969 }
0x1a55   :  { %v3972_v6 = vsub.f32 %v3964_v63, %v3970_v10  ;;  %v3967_v11 = vpop.xlane.xlu0 %3966 }
0x1a56   :  { %v3971_v12 = vsub.f32 %v3963_v1, %v3967_v11 }
0x1a57   :  { %v3975_v5 = vmul.f32 1.442695, %v3972_v6 }
0x1a58   :  { %v3973_v13 = vmul.f32 1.442695, %v3971_v12 }
0x1a59   :  { %12606 = vpow2.f32 %v3975_v5 }
0x1a5a   :  { %12608 = vpow2.f32 %v3973_v13 }
0x1a63   :  { %v12607_v14 = vpop.eup %12606 }
0x1a64   :  { %v12609_v15 = vpop.eup %12608  ;;  %v3980_v17 = vsel %vm145_vm1, %v12607_v14, 0.0 }
0x1a65   :  { %3981 = vadd.xlane.f32.xlu1 %v3980_v17  ;;  %v3977_v30 = vsel %vm145_vm1, %v12609_v15, 0.0 }
0x1a66   :  { %3978 = vadd.xlane.f32.xlu0 %v3977_v30 }
0x1af2   :  { %v3982_v21 = vpop.xlane.xlu1 %3981 }
0x1af3   :  { %12610 = vrcp.f32 %v3982_v21  ;;  %v3979_v22 = vpop.xlane.xlu0 %3978 }
0x1af4   :  { %12612 = vrcp.f32 %v3979_v22 }
0x1afd   :  { %v12611_v23 = vpop.eup %12610 }
0x1afe   :  { %v12613_v26 = vpop.eup %12612  ;;  %v3986_v29 = vmul.f32 %v12611_v23, %v12607_v14 }
0x1aff   :  { %v3985_v28 = vmul.f32 %v12613_v26, %v12609_v15  ;;  %v10040_v15 = vld [vmem:[%s12858_s25 + $0x1c] sm:$0xf] }
0x1b01   :  { %11228 = vmatprep.mubr.msk.f32.mxu1 %vm145_vm1, %v3985_v28 }
0x1b02   :  { %11229 = vmatmul.mubr.msk.f32.vlgmr.msra.gmra.mrb[44].mxu1 %vm145_vm1, %v3986_v29 }
0x1b03   :  { %12009 = vmatpush3.bf16.msra.mxu1 %v12006_v19  ;;  %11244 = vmatprep.mubr.msk.f32.mxu1 %vm505_vm3, %v12985_v7 }
0x1b04   :  { %12011 = vmatprep.subr.bf16.mxu1 %v12010_v31 }
0x1b07   :  { %12013 = vmatpush3.bf16.msra.mxu1 %v12010_v31 }
0x1b08   :  { %12023 = vmatprep.subr.bf16.mxu1 %v12022_v34 }
0x1b0a   :  { %11245 = vmatmul.mubr.msk.f32.vlgmr.msra.gmra.mrb[46].mxu1 %vm505_vm3, %v12987_v8 }
0x1b0b   :  { %12025 = vmatpush3.bf16.msra.mxu1 %v12022_v34  ;;  %11266 = vmatprep.mubr.msk.f32.mxu1 %vm505_vm3, %v12985_v7 }
0x1b0c   :  { %12027 = vmatprep.subr.bf16.mxu1 %v12026_v37 }
0x1b0f   :  { %12029 = vmatpush3.bf16.msra.mxu1 %v12026_v37 }
0x1b12   :  { %11267 = vmatmul.mubr.msk.f32.vlgmr.msra.gmra.mrb[48].mxu1 %vm505_vm3, %v12987_v8 }
0x1bd5   :  { %v11230_v43 = vpop.f32.mrb[44].mxu1 }
0x1bd6   :  { %v4059_v44 = vpop.f32.mrb[45].mxu1 }
0x1bd7   :  { %11233 = vmatprep.mubr.msk.f32.mxu0 %vm745_vm4, %v4059_v44 }
0x1bd8   :  { %11234 = vmatmul.mubr.msk.f32.vlgmr.msra.gmra.mrb[12].mxu0 %vm745_vm4, %v11230_v43  ;;  %v10053_v43 = vld [vmem:[%s12848_s27 + $0x108] sm:$0xff] }
0x1bd9   :  { %12017 = vmatpush3.bf16.msra.mxu0 %v12014_v40  ;;  %11255 = vmatprep.mubr.msk.f32.mxu0 %vm505_vm3, %v12985_v7  ;;  %v10047_v40 = vld [vmem:[%s12843_s20 + $0x108] sm:$0xff]  ;;  %v12048_v44 = vpack.c.bf16 %v10053_v43, %v10052_v42 }
0x1bda   :  { %12019 = vmatprep.subr.bf16.mxu0 %v12018_v45  ;;  %v12040_v41 = vpack.c.bf16 %v10047_v40, %v10046_v39 }
0x1bdd   :  { %v11246_v46 = vpop.f32.mrb[46].mxu1  ;;  %12021 = vmatpush3.bf16.msra.mxu0 %v12018_v45  ;;  %v10048_v45 = vld [vmem:[%s12843_s20 + $0x110] sm:$0xff] }
0x1bde   :  { %v4227_v47 = vpop.f32.mrb[47].mxu1 }
0x1be0   :  { %11256 = vmatmul.mubr.msk.f32.vlgmr.msra.gmra.mrb[34].mxu0 %vm505_vm3, %v12987_v8 }
0x1be1   :  { %11273 = vmatprep.mubr.msk.f32.mxu0 %vm745_vm4, %v4227_v47 }
0x1be5   :  { %v11268_v48 = vpop.f32.mrb[48].mxu1 }
0x1be6   :  { %v4387_v49 = vpop.f32.mrb[49].mxu1 }
0x1be7   :  { %v12036_v50 = vpack.c.bf16 %v11268_v48, %v4387_v49  ;;  %v10054_v48 = vld [vmem:[%s12848_s27 + $0x110] sm:$0xff]  ;;  %v10055_v49 = vld [vmem:[%s12848_s27 + $0x118] sm:$0xff] }
0x1be9   :  { %12037 = vmatprep.subr.bf16.mxu1 %v12036_v50 }
0x1bea   :  { %12039 = vmatpush3.bf16.msra.mxu1 %v12036_v50  ;;  %v12052_v50 = vpack.c.bf16 %v10055_v49, %v10054_v48 }
0x1beb   :  { %12041 = vmatprep.subr.bf16.mxu1 %v12040_v41 }
0x1cb3   :  { %v11257_v51 = vpop.f32.mrb[34].mxu0 }
0x1cb4   :  { %v4307_v52 = vpop.f32.mrb[35].mxu0 }
0x1cb5   :  { %v12030_v53 = vpack.c.bf16 %v11257_v51, %v4307_v52  ;;  %v10058_v51 = vld [vmem:[%s12853_s4 + $0x100] sm:$0xff]  ;;  %v10059_v52 = vld [vmem:[%s12853_s4 + $0x108] sm:$0xff] }
0x1cb7   :  { %12032 = vmatprep.subr.msk.bf16.mxu0 %vm13005_vm5, %v12030_v53 }
0x1cb8   :  { %12035 = vmatpush3.bf16.xpose.msk.msra.mxu0 %vm13005_vm5, %v12030_v53  ;;  %v12056_v53 = vpack.c.bf16 %v10059_v52, %v10058_v51  ;;  %v10072_v51 = vld [vmem:[%s12843_s20 + $0x128] sm:$0xff] }
0x1cb9   :  { %11283 = vmatprep.subr.msk.mxu0 %vm1383_vm6, %v10040_v15 }
0x1cbf   :  { %11274 = vmatmul.mubr.msk.f32.vlgmr.msra.gmra.mrb[36].mxu0 %vm745_vm4, %v11246_v46  ;;  %v10049_v46 = vld [vmem:[%s12843_s20 + $0x118] sm:$0xff] }
0x1cc0   :  { %11284 = vmatpush3.msk.msra.mxu0 %vm1383_vm6, %v10040_v15  ;;  %v12044_v47 = vpack.c.bf16 %v10049_v46, %v10048_v45 }
0x1cc1   :  { %12049 = vmatprep.subr.bf16.mxu0 %v12048_v44 }
0x1d92   :  { %v11275_v54 = vpop.f32.mrb[36].mxu0 }
0x1d93   :  { %v4484_v55 = vmul.f32 0.5, %v11275_v54  ;;  %v4474_v56 = vpop.f32.mrb[37].mxu0 }
0x1d94   :  { %v4483_v57 = vmul.f32 0.5, %v4474_v56 }
0x1d95   :  { %v4486_v58 = vadd.f32 %v13284_v61, %v4484_v55 }
0x1d96   :  { %v4485_v59 = vadd.f32 %v13288_v0, %v4483_v57 }
0x1d97   :  { %v4490_v60 = vsel %vm145_vm1, %v4486_v58, -inf }
0x1d98   :  { %4491 = vmax.xlane.f32.xlu1 %v4490_v60  ;;  %v4487_v63 = vsel %vm145_vm1, %v4485_v59, -inf }
0x1d99   :  { %4488 = vmax.xlane.f32.xlu0 %v4487_v63  ;;  %v10044_v63 = vld [vmem:[%s13969_s0] ss:$0 sm:$0xff] }
0x1e25   :  { %v4492_v1 = vpop.xlane.xlu1 %4491 }
0x1e26   :  { %v4494_v3 = vsub.f32 %v4486_v58, %v4492_v1  ;;  %v4489_v9 = vpop.xlane.xlu0 %4488 }
0x1e27   :  { %v4493_v10 = vsub.f32 %v4485_v59, %v4489_v9 }
0x1e28   :  { %v4497_v6 = vmul.f32 1.442695, %v4494_v3 }
0x1e29   :  { %v4495_v11 = vmul.f32 1.442695, %v4493_v10  ;;  %v10045_v10 = vld [vmem:[%s13970_s5] ss:$0 sm:$0xff] }
0x1e2a   :  { %12614 = vpow2.f32 %v4497_v6 }
0x1e2b   :  { %12616 = vpow2.f32 %v4495_v11 }
0x1e34   :  { %v12615_v12 = vpop.eup %12614 }
0x1e35   :  { %v12617_v5 = vpop.eup %12616  ;;  %v4502_v13 = vsel %vm145_vm1, %v12615_v12, 0.0 }
0x1e36   :  { %4503 = vadd.xlane.f32.xlu1 %v4502_v13  ;;  %v4499_v14 = vsel %vm145_vm1, %v12617_v5, 0.0 }
0x1e37   :  { %4500 = vadd.xlane.f32.xlu0 %v4499_v14 }
0x1ec3   :  { %v4504_v17 = vpop.xlane.xlu1 %4503 }
0x1ec4   :  { %12618 = vrcp.f32 %v4504_v17  ;;  %v4501_v30 = vpop.xlane.xlu0 %4500  ;;  %v10077_v17 = vld [vmem:[%s12848_s27 + $0x120] sm:$0xff] }
0x1ec5   :  { %12620 = vrcp.f32 %v4501_v30  ;;  %v10078_v30 = vld [vmem:[%s12848_s27 + $0x128] sm:$0xff] }
0x1ece   :  { %v12619_v18 = vpop.eup %12618 }
0x1ecf   :  { %v12621_v27 = vpop.eup %12620  ;;  %v4508_v20 = vmul.f32 %v12619_v18, %v12615_v12  ;;  %v10060_v12 = vld [vmem:[%s12853_s4 + $0x110] sm:$0xff] }
0x1ed0   :  { %v4507_v19 = vmul.f32 %v12621_v27, %v12617_v5  ;;  %v10061_v5 = vld [vmem:[%s12853_s4 + $0x118] sm:$0xff] }
0x1ed1   :  { %v12060_v15 = vpack.c.bf16 %v10061_v5, %v10060_v12 }
0x1ed2   :  { %11280 = vmatprep.mubr.msk.f32.mxu1 %vm145_vm1, %v4507_v19 }
0x1ed3   :  { %11281 = vmatmul.mubr.msk.f32.vlgmr.msra.gmra.mrb[50].mxu1 %vm145_vm1, %v4508_v20 }
0x1ed4   :  { %12043 = vmatpush3.bf16.msra.mxu1 %v12040_v41 }
0x1ed5   :  { %12045 = vmatprep.subr.bf16.mxu1 %v12044_v47 }
0x1ed8   :  { %12047 = vmatpush3.bf16.msra.mxu1 %v12044_v47 }
0x1ed9   :  { %12057 = vmatprep.subr.bf16.mxu1 %v12056_v53 }
0x1fa6   :  { %v11282_v21 = vpop.f32.mrb[50].mxu1 }
0x1fa7   :  { %v4581_v22 = vpop.f32.mrb[51].mxu1 }
0x1fa8   :  { %11285 = vmatprep.mubr.msk.f32.mxu0 %vm745_vm4, %v4581_v22  ;;  %v12082_v22 = vpack.c.bf16 %v10078_v30, %v10077_v17 }
0x1fa9   :  { %11286 = vmatmul.mubr.msk.f32.vlgmr.msra.gmra.mrb[12].mxu0 %vm745_vm4, %v11282_v21 }
0x1faa   :  { %12051 = vmatpush3.bf16.msra.mxu0 %v12048_v44 }
0x1fab   :  { %12053 = vmatprep.subr.bf16.mxu0 %v12052_v50 }
0x1fae   :  { %12055 = vmatpush3.bf16.msra.mxu0 %v12052_v50  ;;  %v10071_v50 = vld [vmem:[%s12843_s20 + $0x120] sm:$0xff] }
0x1faf   :  { %v12074_v52 = vpack.c.bf16 %v10072_v51, %v10071_v50  ;;  %v10114_v50 = vld [vmem:[%s12853_s4 + $0x140] sm:$0xff]  ;;  %v10115_v51 = vld [vmem:[%s12853_s4 + $0x148] sm:$0xff] }
0x207c   :  { %v11287_v23 = vpop.f32.mrb[12].mxu0 }
0x207d   :  { %v4679_v24 = vadd.f32 %v11287_v23, %v12987_v8  ;;  %v4667_v25 = vpop.f32.mrb[13].mxu0  ;;  %v10079_v23 = vld [vmem:[%s12848_s27 + $0x130] sm:$0xff] }
0x207e   :  { %v4678_v26 = vadd.f32 %v4667_v25, %v12985_v7 }
0x207f   :  { %v4683_v28 = vsel %vm505_vm3, %v4679_v24, 0.0 }
0x2080   :  { %4684 = vadd.xlane.f32.xlu1 %v4683_v28  ;;  %v4680_v29 = vsel %vm505_vm3, %v4678_v26, 0.0 }
0x2081   :  { %4681 = vadd.xlane.f32.xlu0 %v4680_v29 }
0x210d   :  { %v4685_v31 = vpop.xlane.xlu1 %4684 }
0x210e   :  { %v4688_v32 = vmul.f32 0.03125, %v4685_v31  ;;  %v4682_v33 = vpop.xlane.xlu0 %4681 }
0x210f   :  { %v4687_v34 = vmul.f32 0.03125, %v4682_v33 }
0x2110   :  { %v4690_v35 = vsub.f32 %v4679_v24, %v4688_v32  ;;  %v10080_v24 = vld [vmem:[%s12848_s27 + $0x138] sm:$0xff] }
0x2111   :  { %v4689_v36 = vsub.f32 %v4678_v26, %v4687_v34  ;;  %v12086_v29 = vpack.c.bf16 %v10080_v24, %v10079_v23 }
0x2112   :  { %v4692_v8 = vmul.f32 %v4690_v35, %v4690_v35 }
0x2113   :  { %v4691_v7 = vmul.f32 %v4689_v36, %v4689_v36 }
0x2114   :  { %v4696_v37 = vsel %vm505_vm3, %v4692_v8, 0.0 }
0x2115   :  { %4697 = vadd.xlane.f32.xlu1 %v4696_v37  ;;  %v4693_v38 = vsel %vm505_vm3, %v4691_v7, 0.0 }
0x2116   :  { %4694 = vadd.xlane.f32.xlu0 %v4693_v38 }
0x21a2   :  { %v4698_v54 = vpop.xlane.xlu1 %4697 }
0x21a3   :  { %v4700_v55 = vmul.f32 0.03125, %v4698_v54  ;;  %v4695_v56 = vpop.xlane.xlu0 %4694 }
0x21a4   :  { %v4699_v57 = vmul.f32 0.03125, %v4695_v56  ;;  %v10073_v56 = vld [vmem:[%s12843_s20 + $0x130] sm:$0xff] }
0x21a5   :  { %v4702_v58 = vadd.f32 1e-05, %v4700_v55 }
0x21a6   :  { %v4701_v59 = vadd.f32 1e-05, %v4699_v57  ;;  %v10074_v57 = vld [vmem:[%s12843_s20 + $0x138] sm:$0xff] }
0x21a7   :  { %12622 = vrsqrt.f32 %v4702_v58 }
0x21a8   :  { %12624 = vrsqrt.f32 %v4701_v59 }
0x21b1   :  { %v12623_v60 = vpop.eup %12622 }
0x21b2   :  { %v12625_v1 = vpop.eup %12624  ;;  %v4706_v3 = vmul.f32 %v12623_v60, %v4690_v35 }
0x21b3   :  { %v4705_v9 = vmul.f32 %v12625_v1, %v4689_v36  ;;  %v10083_v1 = vld [vmem:[%s12853_s4 + $0x120] sm:$0xff] }
0x21b4   :  { %v4715_v6 = vmul.f32 %v10044_v63, %v4706_v3  ;;  %v10084_v3 = vld [vmem:[%s12853_s4 + $0x128] sm:$0xff] }
0x21b5   :  { %v4714_v11 = vmul.f32 %v10044_v63, %v4705_v9  ;;  %v12078_v63 = vpack.c.bf16 %v10074_v57, %v10073_v56  ;;  %v12090_v9 = vpack.c.bf16 %v10084_v3, %v10083_v1  ;;  %v10070_v56 = vld [vmem:[%s12858_s25 + $0x20] sm:$0xf]  ;;  %v10110_v1 = vld [vmem:[%s12848_s27 + $0x150] sm:$0xff]  ;;  %v10111_v3 = vld [vmem:[%s12848_s27 + $0x158] sm:$0xff] }
0x21b6   :  { %v13367_v14 = vadd.f32 %v10045_v10, %v4715_v6  ;;  %v10086_v6 = vld [vmem:[%s12853_s4 + $0x138] sm:$0xff]  ;;  %v10108_v57 = vld [vmem:[%s12848_s27 + $0x140] sm:$0xff] }
0x21b7   :  { %v13365_v13 = vadd.f32 %v10045_v10, %v4714_v11  ;;  %v10085_v10 = vld [vmem:[%s12853_s4 + $0x130] sm:$0xff] }
0x21b8   :  { %v12094_v11 = vpack.c.bf16 %v10086_v6, %v10085_v10  ;;  %v12120_v6 = vpack.c.bf16 %v10111_v3, %v10110_v1 }
0x21b9   :  { %11296 = vmatprep.mubr.msk.f32.mxu1 %vm505_vm3, %v13365_v13  ;;  %11307 = vmatprep.mubr.msk.f32.mxu0 %vm505_vm3, %v13365_v13 }
0x21ba   :  { %11297 = vmatmul.mubr.msk.f32.vlgmr.msra.gmra.mrb[52].mxu1 %vm505_vm3, %v13367_v14  ;;  %11308 = vmatmul.mubr.msk.f32.vlgmr.msra.gmra.mrb[38].mxu0 %vm505_vm3, %v13367_v14 }
0x21bb   :  { %12059 = vmatpush3.bf16.msra.mxu1 %v12056_v53  ;;  %11318 = vmatprep.mubr.msk.f32.mxu1 %vm505_vm3, %v13365_v13 }
0x21bc   :  { %12061 = vmatprep.subr.bf16.mxu1 %v12060_v15 }
0x21bf   :  { %12063 = vmatpush3.bf16.msra.mxu1 %v12060_v15 }
0x21c2   :  { %11319 = vmatmul.mubr.msk.f32.vlgmr.msra.gmra.mrb[54].mxu1 %vm505_vm3, %v13367_v14 }
0x228d   :  { %v11298_v18 = vpop.f32.mrb[52].mxu1  ;;  %v11309_v27 = vpop.f32.mrb[38].mxu0 }
0x228e   :  { %v4802_v19 = vpop.f32.mrb[53].mxu1  ;;  %v4882_v20 = vpop.f32.mrb[39].mxu0 }
0x228f   :  { %v12064_v21 = vpack.c.bf16 %v11309_v27, %v4882_v20  ;;  %11325 = vmatprep.mubr.msk.f32.mxu0 %vm745_vm4, %v4802_v19 }
0x2291   :  { %12066 = vmatprep.subr.msk.bf16.mxu0 %vm13005_vm5, %v12064_v21 }
0x2292   :  { %12069 = vmatpush3.bf16.xpose.msk.msra.mxu0 %vm13005_vm5, %v12064_v21 }
0x2293   :  { %12083 = vmatprep.subr.bf16.mxu0 %v12082_v22 }
0x2295   :  { %v11320_v25 = vpop.f32.mrb[54].mxu1 }
0x2296   :  { %v4962_v26 = vpop.f32.mrb[55].mxu1 }
0x2297   :  { %v12070_v28 = vpack.c.bf16 %v11320_v25, %v4962_v26 }
0x2299   :  { %12071 = vmatprep.subr.bf16.mxu1 %v12070_v28  ;;  %11326 = vmatmul.mubr.msk.f32.vlgmr.msra.gmra.mrb[40].mxu0 %vm745_vm4, %v11298_v18 }
0x229a   :  { %12073 = vmatpush3.bf16.msra.mxu1 %v12070_v28  ;;  %12085 = vmatpush3.bf16.msra.mxu0 %v12082_v22 }
0x229b   :  { %11354 = vmatprep.mubr.msk.f32.mxu0 %vm505_vm3, %v13365_v13  ;;  %12087 = vmatprep.subr.bf16.mxu0 %v12086_v29 }
0x229c   :  { %12075 = vmatprep.subr.bf16.mxu1 %v12074_v52 }
0x229e   :  { %12089 = vmatpush3.bf16.msra.mxu0 %v12086_v29 }
0x22a1   :  { %11355 = vmatmul.mubr.msk.f32.vlgmr.msra.gmra.mrb[42].mxu0 %vm505_vm3, %v13367_v14 }
0x236c   :  { %v11327_v31 = vpop.f32.mrb[40].mxu0 }
0x236d   :  { %v5059_v32 = vmul.f32 0.5, %v11327_v31  ;;  %v5049_v33 = vpop.f32.mrb[41].mxu0 }
0x236e   :  { %v5058_v34 = vmul.f32 0.5, %v5049_v33 }
0x236f   :  { %v5061_v35 = vadd.f32 %v13284_v61, %v5059_v32 }
0x2370   :  { %v5060_v36 = vadd.f32 %v13288_v0, %v5058_v34 }
0x2371   :  { %v5065_v8 = vsel %vm145_vm1, %v5061_v35, -inf }
0x2372   :  { %5066 = vmax.xlane.f32.xlu1 %v5065_v8  ;;  %v5062_v7 = vsel %vm145_vm1, %v5060_v36, -inf }
0x2373   :  { %5063 = vmax.xlane.f32.xlu0 %v5062_v7 }
0x2374   :  { %v11356_v37 = vpop.f32.mrb[42].mxu0 }
0x2375   :  { %v5318_v38 = vpop.f32.mrb[43].mxu0 }
0x2376   :  { %v12098_v39 = vpack.c.bf16 %v11356_v37, %v5318_v38  ;;  %v10102_v37 = vld [vmem:[%s12843_s20 + $0x140] sm:$0xff]  ;;  %v10103_v38 = vld [vmem:[%s12843_s20 + $0x148] sm:$0xff] }
0x2378   :  { %12100 = vmatprep.subr.msk.bf16.mxu0 %vm13005_vm5, %v12098_v39 }
0x2379   :  { %12103 = vmatpush3.bf16.xpose.msk.msra.mxu0 %vm13005_vm5, %v12098_v39  ;;  %v12108_v39 = vpack.c.bf16 %v10103_v38, %v10102_v37  ;;  %v10126_v38 = vld [vmem:[%s12858_s25 + $0x28] sm:$0xf] }
0x23ff   :  { %v5067_v40 = vpop.xlane.xlu1 %5066 }
0x2400   :  { %v5069_v41 = vsub.f32 %v5061_v35, %v5067_v40  ;;  %v5064_v42 = vpop.xlane.xlu0 %5063  ;;  %v10095_v40 = vld [vmem:[%s12858_s25 + $0x24] sm:$0xf] }
0x2401   :  { %v5068_v43 = vsub.f32 %v5060_v36, %v5064_v42  ;;  %11382 = vmatprep.subr.msk.mxu0 %vm1383_vm6, %v10095_v40 }
0x2402   :  { %v5072_v44 = vmul.f32 1.442695, %v5069_v41 }
0x2403   :  { %v5070_v45 = vmul.f32 1.442695, %v5068_v43 }
0x2404   :  { %12626 = vpow2.f32 %v5072_v44  ;;  %v10104_v44 = vld [vmem:[%s12843_s20 + $0x150] sm:$0xff] }
0x2405   :  { %12628 = vpow2.f32 %v5070_v45  ;;  %v10105_v45 = vld [vmem:[%s12843_s20 + $0x158] sm:$0xff] }
0x240e   :  { %v12627_v46 = vpop.eup %12626 }
0x240f   :  { %v12629_v47 = vpop.eup %12628  ;;  %v5077_v48 = vsel %vm145_vm1, %v12627_v46, 0.0 }
0x2410   :  { %5078 = vadd.xlane.f32.xlu1 %v5077_v48  ;;  %v5074_v49 = vsel %vm145_vm1, %v12629_v47, 0.0 }
0x2411   :  { %5075 = vadd.xlane.f32.xlu0 %v5074_v49  ;;  %v12112_v49 = vpack.c.bf16 %v10105_v45, %v10104_v44 }
0x249d   :  { %v5079_v53 = vpop.xlane.xlu1 %5078 }
0x249e   :  { %12630 = vrcp.f32 %v5079_v53  ;;  %v5076_v54 = vpop.xlane.xlu0 %5075  ;;  %v10116_v53 = vld [vmem:[%s12853_s4 + $0x150] sm:$0xff] }
0x249f   :  { %12632 = vrcp.f32 %v5076_v54  ;;  %v10117_v54 = vld [vmem:[%s12853_s4 + $0x158] sm:$0xff] }
0x24a8   :  { %v12631_v55 = vpop.eup %12630 }
0x24a9   :  { %v12633_v58 = vpop.eup %12632  ;;  %v5083_v60 = vmul.f32 %v12631_v55, %v12627_v46  ;;  %v12128_v55 = vpack.c.bf16 %v10117_v54, %v10116_v53  ;;  %v10136_v54 = vld [vmem:[%s12848_s27 + $0x160] sm:$0xff] }
0x24aa   :  { %v5082_v59 = vmul.f32 %v12633_v58, %v12629_v47  ;;  %v10109_v58 = vld [vmem:[%s12848_s27 + $0x148] sm:$0xff] }
0x24ac   :  { %11332 = vmatprep.mubr.msk.f32.mxu1 %vm145_vm1, %v5082_v59 }
0x24ad   :  { %11333 = vmatmul.mubr.msk.f32.vlgmr.msra.gmra.mrb[56].mxu1 %vm145_vm1, %v5083_v60 }
0x24ae   :  { %12077 = vmatpush3.bf16.msra.mxu1 %v12074_v52  ;;  %11343 = vmatprep.mubr.msk.f32.mxu1 %vm505_vm3, %v13365_v13  ;;  %v12124_v52 = vpack.c.bf16 %v10115_v51, %v10114_v50  ;;  %v10144_v51 = vld [vmem:[%s12853_s4 + $0x170] sm:$0xff] }
0x24af   :  { %12079 = vmatprep.subr.bf16.mxu1 %v12078_v63 }
0x24b2   :  { %12081 = vmatpush3.bf16.msra.mxu1 %v12078_v63  ;;  %v12116_v63 = vpack.c.bf16 %v10109_v58, %v10108_v57  ;;  %v10138_v57 = vld [vmem:[%s12848_s27 + $0x170] sm:$0xff]  ;;  %v10139_v58 = vld [vmem:[%s12848_s27 + $0x178] sm:$0xff] }
0x24b3   :  { %12091 = vmatprep.subr.bf16.mxu1 %v12090_v9 }
0x24b5   :  { %11344 = vmatmul.mubr.msk.f32.vlgmr.msra.gmra.mrb[58].mxu1 %vm505_vm3, %v13367_v14 }
0x24b6   :  { %12093 = vmatpush3.bf16.msra.mxu1 %v12090_v9  ;;  %11365 = vmatprep.mubr.msk.f32.mxu1 %vm505_vm3, %v13365_v13 }
0x24b7   :  { %12095 = vmatprep.subr.bf16.mxu1 %v12094_v11 }
0x24ba   :  { %12097 = vmatpush3.bf16.msra.mxu1 %v12094_v11 }
0x24bd   :  { %11366 = vmatmul.mubr.msk.f32.vlgmr.msra.gmra.mrb[60].mxu1 %vm505_vm3, %v13367_v14 }
0x2580   :  { %v13423_v12 = vpop.f32.mrb[56].mxu1 }
0x2581   :  { %v13425_v5 = vpop.f32.mrb[57].mxu1 }
0x2588   :  { %v11345_v15 = vpop.f32.mrb[58].mxu1 }
0x2589   :  { %v5238_v17 = vpop.f32.mrb[59].mxu1 }
0x258a   :  { %11372 = vmatprep.mubr.msk.f32.mxu0 %vm745_vm4, %v5238_v17 }
0x258b   :  { %11373 = vmatmul.mubr.msk.f32.vlgmr.msra.gmra.mrb[44].mxu0 %vm745_vm4, %v11345_v15 }
0x258c   :  { %11383 = vmatpush3.msk.msra.mxu0 %vm1383_vm6, %v10095_v40 }
0x258d   :  { %11387 = vmatprep.subr.msk.mxu0 %vm1383_vm6, %v10070_v56 }
0x2590   :  { %v11367_v30 = vpop.f32.mrb[60].mxu1 }
0x2591   :  { %v5398_v18 = vpop.f32.mrb[61].mxu1 }
0x2592   :  { %v12104_v27 = vpack.c.bf16 %v11367_v30, %v5398_v18 }
0x2594   :  { %12105 = vmatprep.subr.bf16.mxu1 %v12104_v27 }
0x2595   :  { %12107 = vmatpush3.bf16.msra.mxu1 %v12104_v27 }
0x2596   :  { %12109 = vmatprep.subr.bf16.mxu1 %v12108_v39 }
0x265e   :  { %v11374_v19 = vpop.f32.mrb[44].mxu0 }
0x265f   :  { %v5495_v20 = vmul.f32 0.5, %v11374_v19  ;;  %v5485_v21 = vpop.f32.mrb[45].mxu0 }
0x2660   :  { %v5494_v22 = vmul.f32 0.5, %v5485_v21 }
0x2661   :  { %v5497_v23 = vadd.f32 %v13284_v61, %v5495_v20 }
0x2662   :  { %v5496_v24 = vadd.f32 %v13288_v0, %v5494_v22 }
0x2663   :  { %v5501_v25 = vsel %vm145_vm1, %v5497_v23, -inf }
0x2664   :  { %5502 = vmax.xlane.f32.xlu1 %v5501_v25  ;;  %v5498_v26 = vsel %vm145_vm1, %v5496_v24, -inf }
0x2665   :  { %5499 = vmax.xlane.f32.xlu0 %v5498_v26 }
0x26f1   :  { %v5503_v28 = vpop.xlane.xlu1 %5502 }
0x26f2   :  { %v5505_v29 = vsub.f32 %v5497_v23, %v5503_v28  ;;  %v5500_v31 = vpop.xlane.xlu0 %5499 }
0x26f3   :  { %v5504_v32 = vsub.f32 %v5496_v24, %v5500_v31 }
0x26f4   :  { %v5508_v33 = vmul.f32 1.442695, %v5505_v29 }
0x26f5   :  { %v5506_v34 = vmul.f32 1.442695, %v5504_v32 }
0x26f6   :  { %12634 = vpow2.f32 %v5508_v33 }
0x26f7   :  { %12636 = vpow2.f32 %v5506_v34 }
0x2700   :  { %v12635_v35 = vpop.eup %12634 }
0x2701   :  { %v12637_v36 = vpop.eup %12636  ;;  %v5513_v8 = vsel %vm145_vm1, %v12635_v35, 0.0 }
0x2702   :  { %5514 = vadd.xlane.f32.xlu1 %v5513_v8  ;;  %v5510_v7 = vsel %vm145_vm1, %v12637_v36, 0.0  ;;  %v10130_v8 = vld [vmem:[%s12843_s20 + $0x160] sm:$0xff] }
0x2703   :  { %5511 = vadd.xlane.f32.xlu0 %v5510_v7  ;;  %v10131_v7 = vld [vmem:[%s12843_s20 + $0x168] sm:$0xff] }
0x2704   :  { %v12142_v37 = vpack.c.bf16 %v10131_v7, %v10130_v8 }
0x278f   :  { %v5515_v41 = vpop.xlane.xlu1 %5514 }
0x2790   :  { %12638 = vrcp.f32 %v5515_v41  ;;  %v5512_v42 = vpop.xlane.xlu0 %5511 }
0x2791   :  { %12640 = vrcp.f32 %v5512_v42  ;;  %v10132_v42 = vld [vmem:[%s12843_s20 + $0x170] sm:$0xff] }
0x279a   :  { %v12639_v43 = vpop.eup %12638 }
0x279b   :  { %v12641_v46 = vpop.eup %12640  ;;  %v5519_v48 = vmul.f32 %v12639_v43, %v12635_v35  ;;  %v10133_v43 = vld [vmem:[%s12843_s20 + $0x178] sm:$0xff] }
0x279c   :  { %v5518_v47 = vmul.f32 %v12641_v46, %v12637_v36 }
0x279e   :  { %11379 = vmatprep.mubr.msk.f32.mxu1 %vm145_vm1, %v5518_v47  ;;  %v12146_v47 = vpack.c.bf16 %v10133_v43, %v10132_v42  ;;  %v10170_v43 = vld [vmem:[%s12853_s4 + $0x180] sm:$0xff] }
0x279f   :  { %11380 = vmatmul.mubr.msk.f32.vlgmr.msra.gmra.mrb[62].mxu1 %vm145_vm1, %v5519_v48  ;;  %v10142_v48 = vld [vmem:[%s12853_s4 + $0x160] sm:$0xff] }
0x27a0   :  { %12111 = vmatpush3.bf16.msra.mxu1 %v12108_v39  ;;  %11400 = vmatprep.mubr.msk.f32.mxu1 %vm505_vm3, %v13365_v13 }
0x27a1   :  { %12113 = vmatprep.subr.bf16.mxu1 %v12112_v49 }
0x27a4   :  { %12115 = vmatpush3.bf16.msra.mxu1 %v12112_v49  ;;  %v10143_v49 = vld [vmem:[%s12853_s4 + $0x168] sm:$0xff] }
0x27a5   :  { %12125 = vmatprep.subr.bf16.mxu1 %v12124_v52  ;;  %v12158_v50 = vpack.c.bf16 %v10143_v49, %v10142_v48  ;;  %v10164_v49 = vld [vmem:[%s12848_s27 + $0x180] sm:$0xff] }
0x27a7   :  { %11401 = vmatmul.mubr.msk.f32.vlgmr.msra.gmra.mrb[64].mxu1 %vm505_vm3, %v13367_v14 }
0x27a8   :  { %12127 = vmatpush3.bf16.msra.mxu1 %v12124_v52  ;;  %11422 = vmatprep.mubr.msk.f32.mxu1 %vm505_vm3, %v13365_v13  ;;  %v10145_v52 = vld [vmem:[%s12853_s4 + $0x178] sm:$0xff] }
0x27a9   :  { %12129 = vmatprep.subr.bf16.mxu1 %v12128_v55  ;;  %v12162_v53 = vpack.c.bf16 %v10145_v52, %v10144_v51  ;;  %v10166_v52 = vld [vmem:[%s12848_s27 + $0x190] sm:$0xff] }
0x27ac   :  { %12131 = vmatpush3.bf16.msra.mxu1 %v12128_v55  ;;  %v10137_v55 = vld [vmem:[%s12848_s27 + $0x168] sm:$0xff] }
0x27af   :  { %11423 = vmatmul.mubr.msk.f32.vlgmr.msra.gmra.mrb[66].mxu1 %vm505_vm3, %v13367_v14 }
0x2872   :  { %v11381_v59 = vpop.f32.mrb[62].mxu1 }
0x2873   :  { %v5592_v60 = vpop.f32.mrb[63].mxu1 }
0x2874   :  { %11384 = vmatprep.mubr.msk.f32.mxu0 %vm745_vm4, %v5592_v60 }
0x2875   :  { %11385 = vmatmul.mubr.msk.f32.vlgmr.msra.gmra.mrb[46].mxu0 %vm745_vm4, %v11381_v59 }
0x2876   :  { %11388 = vmatpush3.msk.msra.mxu0 %vm1383_vm6, %v10070_v56  ;;  %11389 = vmatprep.mubr.msk.f32.mxu0 %vm745_vm4, %v13425_v5  ;;  %v12150_v56 = vpack.c.bf16 %v10137_v55, %v10136_v54 }
0x2877   :  { %12117 = vmatprep.subr.bf16.mxu0 %v12116_v63 }
0x287a   :  { %v11402_v9 = vpop.f32.mrb[64].mxu1 }
0x287b   :  { %v5842_v10 = vpop.f32.mrb[65].mxu1 }
0x287d   :  { %11390 = vmatmul.mubr.msk.f32.vlgmr.msra.gmra.mrb[46].mxu0 %vm745_vm4, %v13423_v12 }
0x287e   :  { %12119 = vmatpush3.bf16.msra.mxu0 %v12116_v63  ;;  %11411 = vmatprep.mubr.msk.f32.mxu0 %vm505_vm3, %v13365_v13  ;;  %v12154_v63 = vpack.c.bf16 %v10139_v58, %v10138_v57 }
0x287f   :  { %12121 = vmatprep.subr.bf16.mxu0 %v12120_v6 }
0x2882   :  { %12123 = vmatpush3.bf16.msra.mxu0 %v12120_v6  ;;  %v11424_v11 = vpop.f32.mrb[66].mxu1 }
0x2883   :  { %v6002_v15 = vpop.f32.mrb[67].mxu1 }
0x2884   :  { %v12138_v17 = vpack.c.bf16 %v11424_v11, %v6002_v15 }
0x2885   :  { %11412 = vmatmul.mubr.msk.f32.vlgmr.msra.gmra.mrb[48].mxu0 %vm505_vm3, %v13367_v14 }
0x2886   :  { %11429 = vmatprep.mubr.msk.f32.mxu0 %vm745_vm4, %v5842_v10  ;;  %12139 = vmatprep.subr.bf16.mxu1 %v12138_v17 }
0x2887   :  { %12141 = vmatpush3.bf16.msra.mxu1 %v12138_v17 }
0x2888   :  { %12143 = vmatprep.subr.bf16.mxu1 %v12142_v37 }
0x2958   :  { %v11413_v5 = vpop.f32.mrb[48].mxu0 }
0x2959   :  { %v5922_v30 = vpop.f32.mrb[49].mxu0 }
0x295a   :  { %v12132_v18 = vpack.c.bf16 %v11413_v5, %v5922_v30 }
0x295c   :  { %12134 = vmatprep.subr.msk.bf16.mxu0 %vm13005_vm5, %v12132_v18 }
0x295d   :  { %12137 = vmatpush3.bf16.xpose.msk.msra.mxu0 %vm13005_vm5, %v12132_v18 }
0x295e   :  { %11439 = vmatprep.subr.msk.mxu0 %vm1383_vm6, %v10126_v38 }
0x2964   :  { %11430 = vmatmul.mubr.msk.f32.vlgmr.msra.gmra.mrb[50].mxu0 %vm745_vm4, %v11402_v9 }
0x2965   :  { %11440 = vmatpush3.msk.msra.mxu0 %vm1383_vm6, %v10126_v38  ;;  %v10161_v38 = vld [vmem:[%s12843_s20 + $0x198] sm:$0xff] }
0x2966   :  { %12151 = vmatprep.subr.bf16.mxu0 %v12150_v56 }
0x2a37   :  { %v11431_v12 = vpop.f32.mrb[50].mxu0 }
0x2a38   :  { %v6099_v27 = vmul.f32 0.5, %v11431_v12  ;;  %v6089_v19 = vpop.f32.mrb[51].mxu0 }
0x2a39   :  { %v6098_v20 = vmul.f32 0.5, %v6089_v19 }
0x2a3a   :  { %v6101_v21 = vadd.f32 %v13284_v61, %v6099_v27 }
0x2a3b   :  { %v6100_v22 = vadd.f32 %v13288_v0, %v6098_v20 }
0x2a3c   :  { %v6105_v23 = vsel %vm145_vm1, %v6101_v21, -inf }
0x2a3d   :  { %6106 = vmax.xlane.f32.xlu1 %v6105_v23  ;;  %v6102_v24 = vsel %vm145_vm1, %v6100_v22, -inf }
0x2a3e   :  { %6103 = vmax.xlane.f32.xlu0 %v6102_v24 }
0x2aca   :  { %v6107_v25 = vpop.xlane.xlu1 %6106 }
0x2acb   :  { %v6109_v26 = vsub.f32 %v6101_v21, %v6107_v25  ;;  %v6104_v28 = vpop.xlane.xlu0 %6103 }
0x2acc   :  { %v6108_v29 = vsub.f32 %v6100_v22, %v6104_v28 }
0x2acd   :  { %v6112_v31 = vmul.f32 1.442695, %v6109_v26 }
0x2ace   :  { %v6110_v32 = vmul.f32 1.442695, %v6108_v29 }
0x2acf   :  { %12642 = vpow2.f32 %v6112_v31 }
0x2ad0   :  { %12644 = vpow2.f32 %v6110_v32  ;;  %v10158_v32 = vld [vmem:[%s12843_s20 + $0x180] sm:$0xff] }
0x2ad9   :  { %v12643_v33 = vpop.eup %12642 }
0x2ada   :  { %v12645_v34 = vpop.eup %12644  ;;  %v6117_v35 = vsel %vm145_vm1, %v12643_v33, 0.0 }
0x2adb   :  { %6118 = vadd.xlane.f32.xlu1 %v6117_v35  ;;  %v6114_v36 = vsel %vm145_vm1, %v12645_v34, 0.0  ;;  %v10154_v35 = vld [vmem:[%s12858_s25 + $0x2c] sm:$0xf] }
0x2adc   :  { %6115 = vadd.xlane.f32.xlu0 %v6114_v36 }
0x2b68   :  { %v6119_v39 = vpop.xlane.xlu1 %6118 }
0x2b69   :  { %12646 = vrcp.f32 %v6119_v39  ;;  %v6116_v40 = vpop.xlane.xlu0 %6115 }
0x2b6a   :  { %12648 = vrcp.f32 %v6116_v40 }
0x2b73   :  { %v12647_v41 = vpop.eup %12646 }
0x2b74   :  { %v12649_v44 = vpop.eup %12648  ;;  %v6123_v46 = vmul.f32 %v12647_v41, %v12643_v33  ;;  %v10159_v33 = vld [vmem:[%s12843_s20 + $0x188] sm:$0xff] }
0x2b75   :  { %v6122_v45 = vmul.f32 %v12649_v44, %v12645_v34  ;;  %v12176_v34 = vpack.c.bf16 %v10159_v33, %v10158_v32  ;;  %v10171_v44 = vld [vmem:[%s12853_s4 + $0x188] sm:$0xff]  ;;  %v10182_v32 = vld [vmem:[%s12858_s25 + $0x30] sm:$0xf] }
0x2b77   :  { %11436 = vmatprep.mubr.msk.f32.mxu1 %vm145_vm1, %v6122_v45  ;;  %v12192_v45 = vpack.c.bf16 %v10171_v44, %v10170_v43  ;;  %v10200_v43 = vld [vmem:[%s12853_s4 + $0x1b0] sm:$0xff]  ;;  %v10201_v44 = vld [vmem:[%s12853_s4 + $0x1b8] sm:$0xff] }
0x2b78   :  { %11437 = vmatmul.mubr.msk.f32.vlgmr.msra.gmra.mrb[68].mxu1 %vm145_vm1, %v6123_v46  ;;  %v10172_v46 = vld [vmem:[%s12853_s4 + $0x190] sm:$0xff] }
0x2b79   :  { %12145 = vmatpush3.bf16.msra.mxu1 %v12142_v37  ;;  %11452 = vmatprep.mubr.msk.f32.mxu1 %vm505_vm3, %v13365_v13  ;;  %v10160_v37 = vld [vmem:[%s12843_s20 + $0x190] sm:$0xff] }
0x2b7a   :  { %12147 = vmatprep.subr.bf16.mxu1 %v12146_v47  ;;  %v12180_v42 = vpack.c.bf16 %v10161_v38, %v10160_v37 }
0x2b7d   :  { %12149 = vmatpush3.bf16.msra.mxu1 %v12146_v47  ;;  %v10173_v47 = vld [vmem:[%s12853_s4 + $0x198] sm:$0xff] }
0x2b7e   :  { %12159 = vmatprep.subr.bf16.mxu1 %v12158_v50  ;;  %v12196_v48 = vpack.c.bf16 %v10173_v47, %v10172_v46  ;;  %v10192_v46 = vld [vmem:[%s12848_s27 + $0x1a0] sm:$0xff]  ;;  %v10193_v47 = vld [vmem:[%s12848_s27 + $0x1a8] sm:$0xff] }
0x2b80   :  { %11453 = vmatmul.mubr.msk.f32.vlgmr.msra.gmra.mrb[70].mxu1 %vm505_vm3, %v13367_v14 }
0x2b81   :  { %12161 = vmatpush3.bf16.msra.mxu1 %v12158_v50  ;;  %11474 = vmatprep.mubr.msk.f32.mxu1 %vm505_vm3, %v13365_v13  ;;  %v10165_v50 = vld [vmem:[%s12848_s27 + $0x188] sm:$0xff] }
0x2b82   :  { %12163 = vmatprep.subr.bf16.mxu1 %v12162_v53  ;;  %v12184_v51 = vpack.c.bf16 %v10165_v50, %v10164_v49  ;;  %v10194_v49 = vld [vmem:[%s12848_s27 + $0x1b0] sm:$0xff]  ;;  %v10195_v50 = vld [vmem:[%s12848_s27 + $0x1b8] sm:$0xff] }
0x2b85   :  { %12165 = vmatpush3.bf16.msra.mxu1 %v12162_v53  ;;  %v10167_v53 = vld [vmem:[%s12848_s27 + $0x198] sm:$0xff] }
0x2b88   :  { %11475 = vmatmul.mubr.msk.f32.vlgmr.msra.gmra.mrb[72].mxu1 %vm505_vm3, %v13367_v14 }
0x2c4b   :  { %v11438_v59 = vpop.f32.mrb[68].mxu1 }
0x2c4c   :  { %v6196_v60 = vpop.f32.mrb[69].mxu1 }
0x2c4d   :  { %11441 = vmatprep.mubr.msk.f32.mxu0 %vm745_vm4, %v6196_v60 }
0x2c4e   :  { %11442 = vmatmul.mubr.msk.f32.vlgmr.msra.gmra.mrb[46].mxu0 %vm745_vm4, %v11438_v59 }
0x2c4f   :  { %12153 = vmatpush3.bf16.msra.mxu0 %v12150_v56  ;;  %11463 = vmatprep.mubr.msk.f32.mxu0 %vm505_vm3, %v13365_v13  ;;  %v12188_v56 = vpack.c.bf16 %v10167_v53, %v10166_v52  ;;  %v12222_v53 = vpack.c.bf16 %v10195_v50, %v10194_v49 }
0x2c50   :  { %12155 = vmatprep.subr.bf16.mxu0 %v12154_v63 }
0x2c53   :  { %v11454_v1 = vpop.f32.mrb[70].mxu1  ;;  %12157 = vmatpush3.bf16.msra.mxu0 %v12154_v63 }
0x2c54   :  { %v6364_v3 = vpop.f32.mrb[71].mxu1 }
0x2c56   :  { %11464 = vmatmul.mubr.msk.f32.vlgmr.msra.gmra.mrb[52].mxu0 %vm505_vm3, %v13367_v14 }
0x2c57   :  { %11481 = vmatprep.mubr.msk.f32.mxu0 %vm745_vm4, %v6364_v3 }
0x2c5b   :  { %v11476_v9 = vpop.f32.mrb[72].mxu1 }
0x2c5c   :  { %v6524_v10 = vpop.f32.mrb[73].mxu1 }
0x2c5d   :  { %v12172_v6 = vpack.c.bf16 %v11476_v9, %v6524_v10 }
0x2c5f   :  { %12173 = vmatprep.subr.bf16.mxu1 %v12172_v6 }
0x2c60   :  { %12175 = vmatpush3.bf16.msra.mxu1 %v12172_v6 }
0x2c61   :  { %12177 = vmatprep.subr.bf16.mxu1 %v12176_v34 }
0x2d29   :  { %v11465_v11 = vpop.f32.mrb[52].mxu0 }
0x2d2a   :  { %v6444_v15 = vpop.f32.mrb[53].mxu0 }
0x2d2b   :  { %v12166_v17 = vpack.c.bf16 %v11465_v11, %v6444_v15 }
0x2d2d   :  { %12168 = vmatprep.subr.msk.bf16.mxu0 %vm13005_vm5, %v12166_v17 }
0x2d2e   :  { %12171 = vmatpush3.bf16.xpose.msk.msra.mxu0 %vm13005_vm5, %v12166_v17  ;;  %v13566_v17 = vld [vmem:[%s12778_s13 + $0x8] sm:$0xff] }
0x2d2f   :  { %11491 = vmatprep.subr.msk.mxu0 %vm1383_vm6, %v10154_v35 }
0x2d35   :  { %11482 = vmatmul.mubr.msk.f32.vlgmr.msra.gmra.mrb[54].mxu0 %vm745_vm4, %v11454_v1 }
0x2d36   :  { %11492 = vmatpush3.msk.msra.mxu0 %vm1383_vm6, %v10154_v35 }
0x2d37   :  { %12185 = vmatprep.subr.bf16.mxu0 %v12184_v51 }
0x2e08   :  { %v11483_v5 = vpop.f32.mrb[54].mxu0 }
0x2e09   :  { %v6621_v30 = vmul.f32 0.5, %v11483_v5  ;;  %v6611_v18 = vpop.f32.mrb[55].mxu0 }
0x2e0a   :  { %v6620_v12 = vmul.f32 0.5, %v6611_v18 }
0x2e0b   :  { %v6623_v27 = vadd.f32 %v13284_v61, %v6621_v30  ;;  %v13570_v30 = vld [vmem:[%s12778_s13] sm:$0xff]  ;;  %s13972_s13 = sld [smem:[#allocation9_spill]] }
0x2e0c   :  { %v6622_v19 = vadd.f32 %v13288_v0, %v6620_v12 }
0x2e0d   :  { %v6627_v20 = vsel %vm145_vm1, %v6623_v27, -inf }
0x2e0e   :  { %6628 = vmax.xlane.f32.xlu1 %v6627_v20  ;;  %v6624_v21 = vsel %vm145_vm1, %v6622_v19, -inf }
0x2e0f   :  { %6625 = vmax.xlane.f32.xlu0 %v6624_v21 }
0x2e9b   :  { %v6629_v22 = vpop.xlane.xlu1 %6628 }
0x2e9c   :  { %v6631_v23 = vsub.f32 %v6623_v27, %v6629_v22  ;;  %v6626_v24 = vpop.xlane.xlu0 %6625 }
0x2e9d   :  { %v6630_v25 = vsub.f32 %v6622_v19, %v6626_v24 }
0x2e9e   :  { %v6634_v26 = vmul.f32 1.442695, %v6631_v23 }
0x2e9f   :  { %v6632_v28 = vmul.f32 1.442695, %v6630_v25 }
0x2ea0   :  { %12650 = vpow2.f32 %v6634_v26 }
0x2ea1   :  { %12652 = vpow2.f32 %v6632_v28 }
0x2eaa   :  { %v12651_v61 = vpop.eup %12650 }
0x2eab   :  { %v12653_v29 = vpop.eup %12652  ;;  %v6639_v0 = vsel %vm145_vm1, %v12651_v61, 0.0 }
0x2eac   :  { %6640 = vadd.xlane.f32.xlu1 %v6639_v0  ;;  %v6636_v31 = vsel %vm145_vm1, %v12653_v29, 0.0  ;;  %v10187_v0 = vld [vmem:[%s12843_s20 + $0x1a8] sm:$0xff] }
0x2ead   :  { %6637 = vadd.xlane.f32.xlu0 %v6636_v31 }
0x2f39   :  { %v6641_v36 = vpop.xlane.xlu1 %6640 }
0x2f3a   :  { %12654 = vrcp.f32 %v6641_v36  ;;  %v6638_v8 = vpop.xlane.xlu0 %6637  ;;  %v10188_v36 = vld [vmem:[%s12843_s20 + $0x1b0] sm:$0xff] }
0x2f3b   :  { %12656 = vrcp.f32 %v6638_v8  ;;  %v10189_v8 = vld [vmem:[%s12843_s20 + $0x1b8] sm:$0xff] }
0x2f44   :  { %v12655_v7 = vpop.eup %12654 }
0x2f45   :  { %v12657_v39 = vpop.eup %12656  ;;  %v6645_v41 = vmul.f32 %v12655_v7, %v12651_v61 }
0x2f46   :  { %v6644_v40 = vmul.f32 %v12657_v39, %v12653_v29  ;;  %v10186_v29 = vld [vmem:[%s12843_s20 + $0x1a0] sm:$0xff]  ;;  %v12214_v39 = vpack.c.bf16 %v10189_v8, %v10188_v36 }
0x2f47   :  { %v12210_v31 = vpack.c.bf16 %v10187_v0, %v10186_v29  ;;  %v10210_v29 = vld [vmem:[%s12858_s25 + $0x34] sm:$0xf] }
0x2f48   :  { %11488 = vmatprep.mubr.msk.f32.mxu1 %vm145_vm1, %v6644_v40  ;;  %v10198_v40 = vld [vmem:[%s12853_s4 + $0x1a0] sm:$0xff] }
0x2f49   :  { %11489 = vmatmul.mubr.msk.f32.vlgmr.msra.gmra.mrb[74].mxu1 %vm145_vm1, %v6645_v41  ;;  %v10199_v41 = vld [vmem:[%s12853_s4 + $0x1a8] sm:$0xff] }
0x2f4a   :  { %12179 = vmatpush3.bf16.msra.mxu1 %v12176_v34  ;;  %11504 = vmatprep.mubr.msk.f32.mxu1 %vm505_vm3, %v13365_v13 }
0x2f4b   :  { %12181 = vmatprep.subr.bf16.mxu1 %v12180_v42 }
0x2f4e   :  { %12183 = vmatpush3.bf16.msra.mxu1 %v12180_v42  ;;  %v12226_v42 = vpack.c.bf16 %v10199_v41, %v10198_v40  ;;  %v10228_v40 = vld [vmem:[%s12853_s4 + $0x1d0] sm:$0xff]  ;;  %v10229_v41 = vld [vmem:[%s12853_s4 + $0x1d8] sm:$0xff] }
0x2f4f   :  { %12193 = vmatprep.subr.bf16.mxu1 %v12192_v45 }
0x2f51   :  { %11505 = vmatmul.mubr.msk.f32.vlgmr.msra.gmra.mrb[76].mxu1 %vm505_vm3, %v13367_v14 }
0x2f52   :  { %12195 = vmatpush3.bf16.msra.mxu1 %v12192_v45  ;;  %11526 = vmatprep.mubr.msk.f32.mxu1 %vm505_vm3, %v13365_v13  ;;  %v12230_v45 = vpack.c.bf16 %v10201_v44, %v10200_v43  ;;  %v10220_v43 = vld [vmem:[%s12848_s27 + $0x1c0] sm:$0xff]  ;;  %v10221_v44 = vld [vmem:[%s12848_s27 + $0x1c8] sm:$0xff] }
0x2f53   :  { %12197 = vmatprep.subr.bf16.mxu1 %v12196_v48 }
0x2f56   :  { %12199 = vmatpush3.bf16.msra.mxu1 %v12196_v48  ;;  %v12218_v48 = vpack.c.bf16 %v10193_v47, %v10192_v46  ;;  %v10222_v46 = vld [vmem:[%s12848_s27 + $0x1d0] sm:$0xff]  ;;  %v10223_v47 = vld [vmem:[%s12848_s27 + $0x1d8] sm:$0xff] }
0x2f57   :  { %v12256_v50 = vpack.c.bf16 %v10223_v47, %v10222_v46 }
0x2f59   :  { %11527 = vmatmul.mubr.msk.f32.vlgmr.msra.gmra.mrb[78].mxu1 %vm505_vm3, %v13367_v14 }
0x301c   :  { %v11490_v54 = vpop.f32.mrb[74].mxu1 }
0x301d   :  { %v6718_v55 = vpop.f32.mrb[75].mxu1 }
0x301e   :  { %11493 = vmatprep.mubr.msk.f32.mxu0 %vm745_vm4, %v6718_v55 }
0x301f   :  { %11494 = vmatmul.mubr.msk.f32.vlgmr.msra.gmra.mrb[46].mxu0 %vm745_vm4, %v11490_v54 }
0x3020   :  { %12187 = vmatpush3.bf16.msra.mxu0 %v12184_v51  ;;  %11515 = vmatprep.mubr.msk.f32.mxu0 %vm505_vm3, %v13365_v13 }
0x3021   :  { %12189 = vmatprep.subr.bf16.mxu0 %v12188_v56 }
0x3024   :  { %v11506_v57 = vpop.f32.mrb[76].mxu1  ;;  %12191 = vmatpush3.bf16.msra.mxu0 %v12188_v56 }
0x3025   :  { %v6886_v58 = vpop.f32.mrb[77].mxu1 }
0x3027   :  { %11516 = vmatmul.mubr.msk.f32.vlgmr.msra.gmra.mrb[56].mxu0 %vm505_vm3, %v13367_v14 }
0x3028   :  { %11533 = vmatprep.mubr.msk.f32.mxu0 %vm745_vm4, %v6886_v58 }
0x302c   :  { %v11528_v59 = vpop.f32.mrb[78].mxu1 }
0x302d   :  { %v7046_v60 = vpop.f32.mrb[79].mxu1 }
0x302e   :  { %v12206_v63 = vpack.c.bf16 %v11528_v59, %v7046_v60 }
0x3030   :  { %12207 = vmatprep.subr.bf16.mxu1 %v12206_v63 }
0x3031   :  { %12209 = vmatpush3.bf16.msra.mxu1 %v12206_v63 }
0x3032   :  { %12211 = vmatprep.subr.bf16.mxu1 %v12210_v31 }
0x30fa   :  { %v11517_v1 = vpop.f32.mrb[56].mxu0 }
0x30fb   :  { %v6966_v3 = vpop.f32.mrb[57].mxu0 }
0x30fc   :  { %v12200_v9 = vpack.c.bf16 %v11517_v1, %v6966_v3 }
0x30fe   :  { %12202 = vmatprep.subr.msk.bf16.mxu0 %vm13005_vm5, %v12200_v9 }
0x30ff   :  { %12205 = vmatpush3.bf16.xpose.msk.msra.mxu0 %vm13005_vm5, %v12200_v9 }
0x3100   :  { %11543 = vmatprep.subr.msk.mxu0 %vm1383_vm6, %v10182_v32 }
0x3106   :  { %11534 = vmatmul.mubr.msk.f32.vlgmr.msra.gmra.mrb[58].mxu0 %vm745_vm4, %v11506_v57 }
0x3107   :  { %11544 = vmatpush3.msk.msra.mxu0 %vm1383_vm6, %v10182_v32 }
0x3108   :  { %12219 = vmatprep.subr.bf16.mxu0 %v12218_v48 }
0x31d9   :  { %v11535_v10 = vpop.f32.mrb[58].mxu0 }
0x31da   :  { %v7143_v6 = vmul.f32 0.5, %v11535_v10  ;;  %v7133_v11 = vpop.f32.mrb[59].mxu0 }
0x31db   :  { %v7142_v15 = vmul.f32 0.5, %v7133_v11 }
0x31dc   :  { %v7145_v5 = vadd.f32 %v13566_v17, %v7143_v6 }
0x31dd   :  { %v7144_v18 = vadd.f32 %v13570_v30, %v7142_v15 }
0x31de   :  { %v7149_v12 = vsel %vm145_vm1, %v7145_v5, -inf }
0x31df   :  { %7150 = vmax.xlane.f32.xlu1 %v7149_v12  ;;  %v7146_v27 = vsel %vm145_vm1, %v7144_v18, -inf }
0x31e0   :  { %7147 = vmax.xlane.f32.xlu0 %v7146_v27 }
0x326c   :  { %v7151_v19 = vpop.xlane.xlu1 %7150 }
0x326d   :  { %v7153_v20 = vsub.f32 %v7145_v5, %v7151_v19  ;;  %v7148_v21 = vpop.xlane.xlu0 %7147 }
0x326e   :  { %v7152_v22 = vsub.f32 %v7144_v18, %v7148_v21 }
0x326f   :  { %v7156_v23 = vmul.f32 1.442695, %v7153_v20 }
0x3270   :  { %v7154_v24 = vmul.f32 1.442695, %v7152_v22 }
0x3271   :  { %12658 = vpow2.f32 %v7156_v23 }
0x3272   :  { %12660 = vpow2.f32 %v7154_v24 }
0x327b   :  { %v12659_v25 = vpop.eup %12658 }
0x327c   :  { %v12661_v26 = vpop.eup %12660  ;;  %v7161_v28 = vsel %vm145_vm1, %v12659_v25, 0.0 }
0x327d   :  { %7162 = vadd.xlane.f32.xlu1 %v7161_v28  ;;  %v7158_v61 = vsel %vm145_vm1, %v12661_v26, 0.0  ;;  %v10215_v28 = vld [vmem:[%s12843_s20 + $0x1c8] sm:$0xff] }
0x327e   :  { %7159 = vadd.xlane.f32.xlu0 %v7158_v61 }
0x330a   :  { %v7163_v33 = vpop.xlane.xlu1 %7162 }
0x330b   :  { %12662 = vrcp.f32 %v7163_v33  ;;  %v7160_v34 = vpop.xlane.xlu0 %7159  ;;  %v10216_v33 = vld [vmem:[%s12843_s20 + $0x1d0] sm:$0xff] }
0x330c   :  { %12664 = vrcp.f32 %v7160_v34  ;;  %v10217_v34 = vld [vmem:[%s12843_s20 + $0x1d8] sm:$0xff] }
0x3315   :  { %v12663_v35 = vpop.eup %12662 }
0x3316   :  { %v12665_v7 = vpop.eup %12664  ;;  %v7167_v38 = vmul.f32 %v12663_v35, %v12659_v25 }
0x3317   :  { %v7166_v37 = vmul.f32 %v12665_v7, %v12661_v26  ;;  %v10214_v26 = vld [vmem:[%s12843_s20 + $0x1c0] sm:$0xff]  ;;  %v12248_v7 = vpack.c.bf16 %v10217_v34, %v10216_v33 }
0x3318   :  { %v12244_v61 = vpack.c.bf16 %v10215_v28, %v10214_v26  ;;  %v10238_v26 = vld [vmem:[%s12858_s25 + $0x38] sm:$0xf] }
0x3319   :  { %11540 = vmatprep.mubr.msk.f32.mxu1 %vm145_vm1, %v7166_v37  ;;  %v10226_v37 = vld [vmem:[%s12853_s4 + $0x1c0] sm:$0xff] }
0x331a   :  { %11541 = vmatmul.mubr.msk.f32.vlgmr.msra.gmra.mrb[80].mxu1 %vm145_vm1, %v7167_v38  ;;  %v10227_v38 = vld [vmem:[%s12853_s4 + $0x1c8] sm:$0xff] }
0x331b   :  { %12213 = vmatpush3.bf16.msra.mxu1 %v12210_v31  ;;  %11556 = vmatprep.mubr.msk.f32.mxu1 %vm505_vm3, %v13365_v13 }
0x331c   :  { %12215 = vmatprep.subr.bf16.mxu1 %v12214_v39 }
0x331f   :  { %12217 = vmatpush3.bf16.msra.mxu1 %v12214_v39  ;;  %v12260_v39 = vpack.c.bf16 %v10227_v38, %v10226_v37  ;;  %v10256_v37 = vld [vmem:[%s12853_s4 + $0x1f0] sm:$0xff]  ;;  %v10257_v38 = vld [vmem:[%s12853_s4 + $0x1f8] sm:$0xff] }
0x3320   :  { %12227 = vmatprep.subr.bf16.mxu1 %v12226_v42 }
0x3322   :  { %11557 = vmatmul.mubr.msk.f32.vlgmr.msra.gmra.mrb[82].mxu1 %vm505_vm3, %v13367_v14 }
0x3323   :  { %12229 = vmatpush3.bf16.msra.mxu1 %v12226_v42  ;;  %11578 = vmatprep.mubr.msk.f32.mxu1 %vm505_vm3, %v13365_v13  ;;  %v12264_v42 = vpack.c.bf16 %v10229_v41, %v10228_v40  ;;  %v10248_v40 = vld [vmem:[%s12848_s27 + $0x1e0] sm:$0xff]  ;;  %v10249_v41 = vld [vmem:[%s12848_s27 + $0x1e8] sm:$0xff] }
0x3324   :  { %12231 = vmatprep.subr.bf16.mxu1 %v12230_v45 }
0x3327   :  { %12233 = vmatpush3.bf16.msra.mxu1 %v12230_v45  ;;  %v12252_v45 = vpack.c.bf16 %v10221_v44, %v10220_v43  ;;  %v10250_v43 = vld [vmem:[%s12848_s27 + $0x1f0] sm:$0xff]  ;;  %v10251_v44 = vld [vmem:[%s12848_s27 + $0x1f8] sm:$0xff]  ;;  %s13982_s27 = sld [smem:[#allocation18_spill]] }
0x3328   :  { %v12290_v47 = vpack.c.bf16 %v10251_v44, %v10250_v43 }
0x332a   :  { %11579 = vmatmul.mubr.msk.f32.vlgmr.msra.gmra.mrb[84].mxu1 %vm505_vm3, %v13367_v14 }
0x33ed   :  { %v11542_v51 = vpop.f32.mrb[80].mxu1 }
0x33ee   :  { %v7240_v52 = vpop.f32.mrb[81].mxu1 }
0x33ef   :  { %11545 = vmatprep.mubr.msk.f32.mxu0 %vm745_vm4, %v7240_v52 }
0x33f0   :  { %11546 = vmatmul.mubr.msk.f32.vlgmr.msra.gmra.mrb[46].mxu0 %vm745_vm4, %v11542_v51 }
0x33f1   :  { %12221 = vmatpush3.bf16.msra.mxu0 %v12218_v48  ;;  %11567 = vmatprep.mubr.msk.f32.mxu0 %vm505_vm3, %v13365_v13 }
0x33f2   :  { %12223 = vmatprep.subr.bf16.mxu0 %v12222_v53 }
0x33f5   :  { %v11558_v54 = vpop.f32.mrb[82].mxu1  ;;  %12225 = vmatpush3.bf16.msra.mxu0 %v12222_v53 }
0x33f6   :  { %v7408_v55 = vpop.f32.mrb[83].mxu1 }
0x33f8   :  { %11568 = vmatmul.mubr.msk.f32.vlgmr.msra.gmra.mrb[60].mxu0 %vm505_vm3, %v13367_v14 }
0x33f9   :  { %11585 = vmatprep.mubr.msk.f32.mxu0 %vm745_vm4, %v7408_v55 }
0x33fd   :  { %v11580_v56 = vpop.f32.mrb[84].mxu1 }
0x33fe   :  { %v7568_v57 = vpop.f32.mrb[85].mxu1 }
0x33ff   :  { %v12240_v58 = vpack.c.bf16 %v11580_v56, %v7568_v57 }
0x3401   :  { %12241 = vmatprep.subr.bf16.mxu1 %v12240_v58 }
0x3402   :  { %12243 = vmatpush3.bf16.msra.mxu1 %v12240_v58 }
0x3403   :  { %12245 = vmatprep.subr.bf16.mxu1 %v12244_v61 }
0x34cb   :  { %v11569_v59 = vpop.f32.mrb[60].mxu0 }
0x34cc   :  { %v7488_v60 = vpop.f32.mrb[61].mxu0 }
0x34cd   :  { %v12234_v63 = vpack.c.bf16 %v11569_v59, %v7488_v60 }
0x34cf   :  { %12236 = vmatprep.subr.msk.bf16.mxu0 %vm13005_vm5, %v12234_v63 }
0x34d0   :  { %12239 = vmatpush3.bf16.xpose.msk.msra.mxu0 %vm13005_vm5, %v12234_v63 }
0x34d1   :  { %11595 = vmatprep.subr.msk.mxu0 %vm1383_vm6, %v10210_v29 }
0x34d7   :  { %11586 = vmatmul.mubr.msk.f32.vlgmr.msra.gmra.mrb[62].mxu0 %vm745_vm4, %v11558_v54 }
0x34d8   :  { %11596 = vmatpush3.msk.msra.mxu0 %vm1383_vm6, %v10210_v29 }
0x34d9   :  { %12253 = vmatprep.subr.bf16.mxu0 %v12252_v45 }
0x35aa   :  { %v11587_v1 = vpop.f32.mrb[62].mxu0 }
0x35ab   :  { %v7665_v3 = vmul.f32 0.5, %v11587_v1  ;;  %v7655_v9 = vpop.f32.mrb[63].mxu0 }
0x35ac   :  { %v7664_v10 = vmul.f32 0.5, %v7655_v9 }
0x35ad   :  { %v7667_v6 = vadd.f32 %v13566_v17, %v7665_v3 }
0x35ae   :  { %v7666_v11 = vadd.f32 %v13570_v30, %v7664_v10 }
0x35af   :  { %v7671_v15 = vsel %vm145_vm1, %v7667_v6, -inf }
0x35b0   :  { %7672 = vmax.xlane.f32.xlu1 %v7671_v15  ;;  %v7668_v5 = vsel %vm145_vm1, %v7666_v11, -inf }
0x35b1   :  { %7669 = vmax.xlane.f32.xlu0 %v7668_v5 }
0x363d   :  { %v7673_v18 = vpop.xlane.xlu1 %7672 }
0x363e   :  { %v7675_v12 = vsub.f32 %v7667_v6, %v7673_v18  ;;  %v7670_v27 = vpop.xlane.xlu0 %7669 }
0x363f   :  { %v7674_v19 = vsub.f32 %v7666_v11, %v7670_v27 }
0x3640   :  { %v7678_v20 = vmul.f32 1.442695, %v7675_v12 }
0x3641   :  { %v7676_v21 = vmul.f32 1.442695, %v7674_v19 }
0x3642   :  { %12666 = vpow2.f32 %v7678_v20 }
0x3643   :  { %12668 = vpow2.f32 %v7676_v21 }
0x364c   :  { %v12667_v22 = vpop.eup %12666 }
0x364d   :  { %v12669_v23 = vpop.eup %12668  ;;  %v7683_v24 = vsel %vm145_vm1, %v12667_v22, 0.0 }
0x364e   :  { %7684 = vadd.xlane.f32.xlu1 %v7683_v24  ;;  %v7680_v25 = vsel %vm145_vm1, %v12669_v23, 0.0  ;;  %v10243_v24 = vld [vmem:[%s12843_s20 + $0x1e8] sm:$0xff] }
0x364f   :  { %7681 = vadd.xlane.f32.xlu0 %v7680_v25 }
0x36db   :  { %v7685_v0 = vpop.xlane.xlu1 %7684 }
0x36dc   :  { %12670 = vrcp.f32 %v7685_v0  ;;  %v7682_v31 = vpop.xlane.xlu0 %7681  ;;  %v10244_v0 = vld [vmem:[%s12843_s20 + $0x1f0] sm:$0xff] }
0x36dd   :  { %12672 = vrcp.f32 %v7682_v31  ;;  %v10245_v31 = vld [vmem:[%s12843_s20 + $0x1f8] sm:$0xff] }
0x36e6   :  { %v12671_v32 = vpop.eup %12670 }
0x36e7   :  { %v12673_v35 = vpop.eup %12672  ;;  %v7689_v8 = vmul.f32 %v12671_v32, %v12667_v22 }
0x36e8   :  { %v7688_v36 = vmul.f32 %v12673_v35, %v12669_v23  ;;  %v10242_v23 = vld [vmem:[%s12843_s20 + $0x1e0] sm:$0xff]  ;;  %v12282_v35 = vpack.c.bf16 %v10245_v31, %v10244_v0  ;;  %v9035_v0 = vld [vmem:[%s13971_s9 + $0x18] sm:$0xff]  ;;  %s13981_s20 = sld [smem:[#allocation8_spill]] }
0x36e9   :  { %v12278_v25 = vpack.c.bf16 %v10243_v24, %v10242_v23  ;;  %v9032_v24 = vld [vmem:[%s13971_s9] sm:$0xff] }
0x36ea   :  { %11592 = vmatprep.mubr.msk.f32.mxu1 %vm145_vm1, %v7688_v36  ;;  %v10254_v36 = vld [vmem:[%s12853_s4 + $0x1e0] sm:$0xff] }
0x36eb   :  { %11593 = vmatmul.mubr.msk.f32.vlgmr.msra.gmra.mrb[86].mxu1 %vm145_vm1, %v7689_v8  ;;  %v10255_v8 = vld [vmem:[%s12853_s4 + $0x1e8] sm:$0xff]  ;;  %s13983_s4 = sld [smem:[#allocation7_spill]] }
0x36ec   :  { %12247 = vmatpush3.bf16.msra.mxu1 %v12244_v61  ;;  %11608 = vmatprep.mubr.msk.f32.mxu1 %vm505_vm3, %v13365_v13 }
0x36ed   :  { %12249 = vmatprep.subr.bf16.mxu1 %v12248_v7 }
0x36f0   :  { %12251 = vmatpush3.bf16.msra.mxu1 %v12248_v7  ;;  %v12294_v7 = vpack.c.bf16 %v10255_v8, %v10254_v36 }
0x36f1   :  { %12261 = vmatprep.subr.bf16.mxu1 %v12260_v39 }
0x36f3   :  { %11609 = vmatmul.mubr.msk.f32.vlgmr.msra.gmra.mrb[88].mxu1 %vm505_vm3, %v13367_v14 }
0x36f4   :  { %12263 = vmatpush3.bf16.msra.mxu1 %v12260_v39  ;;  %11630 = vmatprep.mubr.msk.f32.mxu1 %vm505_vm3, %v13365_v13  ;;  %v12298_v39 = vpack.c.bf16 %v10257_v38, %v10256_v37 }
0x36f5   :  { %12265 = vmatprep.subr.bf16.mxu1 %v12264_v42 }
0x36f8   :  { %12267 = vmatpush3.bf16.msra.mxu1 %v12264_v42  ;;  %v12286_v42 = vpack.c.bf16 %v10249_v41, %v10248_v40 }
0x36fb   :  { %11631 = vmatmul.mubr.msk.f32.vlgmr.msra.gmra.mrb[90].mxu1 %vm505_vm3, %v13367_v14 }
0x37be   :  { %v11594_v48 = vpop.f32.mrb[86].mxu1 }
0x37bf   :  { %v7762_v49 = vpop.f32.mrb[87].mxu1 }
0x37c0   :  { %11597 = vmatprep.mubr.msk.f32.mxu0 %vm745_vm4, %v7762_v49 }
0x37c1   :  { %11598 = vmatmul.mubr.msk.f32.vlgmr.msra.gmra.mrb[46].mxu0 %vm745_vm4, %v11594_v48 }
0x37c2   :  { %12255 = vmatpush3.bf16.msra.mxu0 %v12252_v45  ;;  %11619 = vmatprep.mubr.msk.f32.mxu0 %vm505_vm3, %v13365_v13 }
0x37c3   :  { %12257 = vmatprep.subr.bf16.mxu0 %v12256_v50 }
0x37c6   :  { %v11610_v51 = vpop.f32.mrb[88].mxu1  ;;  %12259 = vmatpush3.bf16.msra.mxu0 %v12256_v50 }
0x37c7   :  { %v7930_v52 = vpop.f32.mrb[89].mxu1 }
0x37c9   :  { %11620 = vmatmul.mubr.msk.f32.vlgmr.msra.gmra.mrb[64].mxu0 %vm505_vm3, %v13367_v14 }
0x37ca   :  { %11637 = vmatprep.mubr.msk.f32.mxu0 %vm745_vm4, %v7930_v52 }
0x37ce   :  { %v11632_v53 = vpop.f32.mrb[90].mxu1 }
0x37cf   :  { %v8090_v54 = vpop.f32.mrb[91].mxu1 }
0x37d0   :  { %v12274_v55 = vpack.c.bf16 %v11632_v53, %v8090_v54 }
0x37d2   :  { %12275 = vmatprep.subr.bf16.mxu1 %v12274_v55 }
0x37d3   :  { %12277 = vmatpush3.bf16.msra.mxu1 %v12274_v55 }
0x37d4   :  { %12279 = vmatprep.subr.bf16.mxu1 %v12278_v25 }
0x389c   :  { %v11621_v56 = vpop.f32.mrb[64].mxu0 }
0x389d   :  { %v8010_v57 = vpop.f32.mrb[65].mxu0 }
0x389e   :  { %v12268_v58 = vpack.c.bf16 %v11621_v56, %v8010_v57 }
0x38a0   :  { %12270 = vmatprep.subr.msk.bf16.mxu0 %vm13005_vm5, %v12268_v58 }
0x38a1   :  { %12273 = vmatpush3.bf16.xpose.msk.msra.mxu0 %vm13005_vm5, %v12268_v58 }
0x38a2   :  { %11647 = vmatprep.subr.msk.mxu0 %vm1383_vm6, %v10238_v26 }
0x38a8   :  { %11638 = vmatmul.mubr.msk.f32.vlgmr.msra.gmra.mrb[66].mxu0 %vm745_vm4, %v11610_v51 }
0x38a9   :  { %11648 = vmatpush3.msk.msra.mxu0 %vm1383_vm6, %v10238_v26 }
0x38aa   :  { %12287 = vmatprep.subr.bf16.mxu0 %v12286_v42 }
0x397b   :  { %v11639_v59 = vpop.f32.mrb[66].mxu0 }
0x397c   :  { %v8187_v60 = vmul.f32 0.5, %v11639_v59  ;;  %v8177_v63 = vpop.f32.mrb[67].mxu0 }
0x397d   :  { %v8186_v1 = vmul.f32 0.5, %v8177_v63 }
0x397e   :  { %v8189_v3 = vadd.f32 %v13566_v17, %v8187_v60 }
0x397f   :  { %v8188_v9 = vadd.f32 %v13570_v30, %v8186_v1 }
0x3980   :  { %v8193_v10 = vsel %vm145_vm1, %v8189_v3, -inf }
0x3981   :  { %8194 = vmax.xlane.f32.xlu1 %v8193_v10  ;;  %v8190_v6 = vsel %vm145_vm1, %v8188_v9, -inf }
0x3982   :  { %8191 = vmax.xlane.f32.xlu0 %v8190_v6 }
0x3a0e   :  { %v8195_v11 = vpop.xlane.xlu1 %8194 }
0x3a0f   :  { %v8197_v15 = vsub.f32 %v8189_v3, %v8195_v11  ;;  %v8192_v5 = vpop.xlane.xlu0 %8191 }
0x3a10   :  { %v8196_v18 = vsub.f32 %v8188_v9, %v8192_v5 }
0x3a11   :  { %v8200_v12 = vmul.f32 1.442695, %v8197_v15 }
0x3a12   :  { %v8198_v27 = vmul.f32 1.442695, %v8196_v18 }
0x3a13   :  { %12674 = vpow2.f32 %v8200_v12  ;;  %v10266_v12 = vld [vmem:[%s12858_s25 + $0x3c] sm:$0xf]  ;;  %s13973_s25 = sld [smem:[#allocation5_spill]] }
0x3a14   :  { %12676 = vpow2.f32 %v8198_v27 }
0x3a1d   :  { %v12675_v19 = vpop.eup %12674 }
0x3a1e   :  { %v12677_v20 = vpop.eup %12676  ;;  %v8205_v21 = vsel %vm145_vm1, %v12675_v19, 0.0 }
0x3a1f   :  { %8206 = vadd.xlane.f32.xlu1 %v8205_v21  ;;  %v8202_v22 = vsel %vm145_vm1, %v12677_v20, 0.0 }
0x3a20   :  { %8203 = vadd.xlane.f32.xlu0 %v8202_v22 }
0x3aac   :  { %v8207_v28 = vpop.xlane.xlu1 %8206 }
0x3aad   :  { %12678 = vrcp.f32 %v8207_v28  ;;  %v8204_v61 = vpop.xlane.xlu0 %8203 }
0x3aae   :  { %12680 = vrcp.f32 %v8204_v61 }
0x3ab7   :  { %v12679_v29 = vpop.eup %12678 }
0x3ab8   :  { %v12681_v32 = vpop.eup %12680  ;;  %v8211_v34 = vmul.f32 %v12679_v29, %v12675_v19  ;;  %v9034_v29 = vld [vmem:[%s13971_s9 + $0x10] sm:$0xff] }
0x3ab9   :  { %v8210_v33 = vmul.f32 %v12681_v32, %v12677_v20  ;;  %v12325_v31 = vpack.c.bf16 %v9035_v0, %v9034_v29  ;;  %v9825_v32 = vld [vmem:[%s13972_s13] ss:$0 sm:$0xff]  ;;  %v9202_v0 = vld [vmem:[%s13975_s8 + $0x30] sm:$0xff] }
0x3aba   :  { %v9200_v29 = vld [vmem:[%s13975_s8 + $0x20] sm:$0xff] }
0x3abb   :  { %11644 = vmatprep.mubr.msk.f32.mxu1 %vm145_vm1, %v8210_v33  ;;  %v306_v33 = vadd.f32 %v9825_v32, %v12980_v62  ;;  %v9207_v32 = vld [vmem:[%s13975_s8 + $0x58] sm:$0xff] }
0x3abc   :  { %11645 = vmatmul.mubr.msk.f32.vlgmr.msra.gmra.mrb[92].mxu1 %vm145_vm1, %v8211_v34 }
0x3abd   :  { %12281 = vmatpush3.bf16.msra.mxu1 %v12278_v25  ;;  %11660 = vmatprep.mubr.msk.f32.mxu1 %vm505_vm3, %v13365_v13  ;;  %v9033_v25 = vld [vmem:[%s13971_s9 + $0x8] sm:$0xff] }
0x3abe   :  { %12283 = vmatprep.subr.bf16.mxu1 %v12282_v35  ;;  %v12322_v28 = vpack.c.bf16 %v9033_v25, %v9032_v24 }
0x3ac1   :  { %12285 = vmatpush3.bf16.msra.mxu1 %v12282_v35 }
0x3ac2   :  { %12295 = vmatprep.subr.bf16.mxu1 %v12294_v7 }
0x3ac4   :  { %11661 = vmatmul.mubr.msk.f32.vlgmr.msra.gmra.mrb[94].mxu1 %vm505_vm3, %v13367_v14 }
0x3ac5   :  { %12297 = vmatpush3.bf16.msra.mxu1 %v12294_v7  ;;  %11682 = vmatprep.mubr.msk.f32.mxu1 %vm505_vm3, %v13365_v13 }
0x3ac6   :  { %12299 = vmatprep.subr.bf16.mxu1 %v12298_v39 }
0x3ac9   :  { %12301 = vmatpush3.bf16.msra.mxu1 %v12298_v39 }
0x3acc   :  { %11683 = vmatmul.mubr.msk.f32.vlgmr.msra.gmra.mrb[96].mxu1 %vm505_vm3, %v13367_v14 }
0x3b8f   :  { %v11646_v45 = vpop.f32.mrb[92].mxu1 }
0x3b90   :  { %v8284_v46 = vpop.f32.mrb[93].mxu1 }
0x3b91   :  { %11649 = vmatprep.mubr.msk.f32.mxu0 %vm745_vm4, %v8284_v46 }
0x3b92   :  { %11650 = vmatmul.mubr.msk.f32.vlgmr.msra.gmra.mrb[46].mxu0 %vm745_vm4, %v11646_v45 }
0x3b93   :  { %12289 = vmatpush3.bf16.msra.mxu0 %v12286_v42  ;;  %11671 = vmatprep.mubr.msk.f32.mxu0 %vm505_vm3, %v13365_v13 }
0x3b94   :  { %12291 = vmatprep.subr.bf16.mxu0 %v12290_v47 }
0x3b97   :  { %v11662_v48 = vpop.f32.mrb[94].mxu1  ;;  %12293 = vmatpush3.bf16.msra.mxu0 %v12290_v47  ;;  %v8951_v47 = vld [vmem:[%s13973_s25] sm:$0x3] }
0x3b98   :  { %v8452_v49 = vpop.f32.mrb[95].mxu1 }
0x3b9a   :  { %11672 = vmatmul.mubr.msk.f32.vlgmr.msra.gmra.mrb[68].mxu0 %vm505_vm3, %v13367_v14 }
0x3b9b   :  { %11689 = vmatprep.mubr.msk.f32.mxu0 %vm745_vm4, %v8452_v49 }
0x3b9f   :  { %v11684_v50 = vpop.f32.mrb[96].mxu1 }
0x3ba0   :  { %v8612_v51 = vpop.f32.mrb[97].mxu1 }
0x3ba1   :  { %v12308_v52 = vpack.c.bf16 %v11684_v50, %v8612_v51 }
0x3ba3   :  { %12309 = vmatprep.subr.bf16.mxu1 %v12308_v52 }
0x3ba4   :  { %12311 = vmatpush3.bf16.msra.mxu1 %v12308_v52 }
0x3ba5   :  { %12312 = vmatprep.subr.bf16.mxu1 %v12756_v2 }
0x3c6d   :  { %v11673_v53 = vpop.f32.mrb[68].mxu0 }
0x3c6e   :  { %v8532_v54 = vpop.f32.mrb[69].mxu0 }
0x3c6f   :  { %v12302_v55 = vpack.c.bf16 %v11673_v53, %v8532_v54 }
0x3c71   :  { %12304 = vmatprep.subr.msk.bf16.mxu0 %vm13005_vm5, %v12302_v55 }
0x3c72   :  { %12307 = vmatpush3.bf16.xpose.msk.msra.mxu0 %vm13005_vm5, %v12302_v55 }
0x3c73   :  { %11699 = vmatprep.subr.msk.mxu0 %vm1383_vm6, %v10266_v12 }
0x3c79   :  { %11690 = vmatmul.mubr.msk.f32.vlgmr.msra.gmra.mrb[70].mxu0 %vm745_vm4, %v11662_v48  ;;  %v8953_v48 = vsel %vm8952_vm7, %v8951_v47, 0.0 }
0x3c7a   :  { %11700 = vmatpush3.msk.msra.mxu0 %vm1383_vm6, %v10266_v12 }
0x3c7b   :  { %12321 = vmatprep.subr.bf16.mxu0 %v12756_v2 }
0x3d4c   :  { %v11691_v56 = vpop.f32.mrb[70].mxu0 }
0x3d4d   :  { %v8709_v57 = vmul.f32 0.5, %v11691_v56  ;;  %v8699_v58 = vpop.f32.mrb[71].mxu0  ;;  %v10271_v56 = vld [vmem:[%s13969_s0 + $0x1] ss:$0 sm:$0xff] }
0x3d4e   :  { %v8708_v59 = vmul.f32 0.5, %v8699_v58 }
0x3d4f   :  { %v8711_v60 = vadd.f32 %v13566_v17, %v8709_v57 }
0x3d50   :  { %v8710_v63 = vadd.f32 %v13570_v30, %v8708_v59 }
0x3d51   :  { %v8715_v1 = vsel %vm145_vm1, %v8711_v60, -inf }
0x3d52   :  { %8716 = vmax.xlane.f32.xlu1 %v8715_v1  ;;  %v8712_v3 = vsel %vm145_vm1, %v8710_v63, -inf }
0x3d53   :  { %8713 = vmax.xlane.f32.xlu0 %v8712_v3 }
0x3ddf   :  { %v8717_v9 = vpop.xlane.xlu1 %8716 }
0x3de0   :  { %v8719_v16 = vsub.f32 %v8711_v60, %v8717_v9  ;;  %v8714_v10 = vpop.xlane.xlu0 %8713  ;;  %v10273_v60 = vld [vmem:[%s13970_s5 + $0x1] ss:$0 sm:$0xff] }
0x3de1   :  { %v8718_v6 = vsub.f32 %v8710_v63, %v8714_v10  ;;  %v9037_v10 = vld [vmem:[%s13974_s3 + $0x8] sm:$0xff] }
0x3de2   :  { %v8722_v11 = vmul.f32 1.442695, %v8719_v16  ;;  %v9036_v16 = vld [vmem:[%s13974_s3] sm:$0xff] }
0x3de3   :  { %v8720_v15 = vmul.f32 1.442695, %v8718_v6 }
0x3de4   :  { %12682 = vpow2.f32 %v8722_v11  ;;  %v12316_v11 = vpack.c.bf16 %v9037_v10, %v9036_v16  ;;  %v9502_v10 = vld [vmem:[%s13977_s24 + $0x8] sm:$0xff] }
0x3de5   :  { %12684 = vpow2.f32 %v8720_v15  ;;  %v9038_v15 = vld [vmem:[%s13974_s3 + $0x10] sm:$0xff] }
0x3dee   :  { %v12683_v5 = vpop.eup %12682 }
0x3def   :  { %v12685_v18 = vpop.eup %12684  ;;  %v8727_v17 = vsel %vm145_vm1, %v12683_v5, 0.0 }
0x3df0   :  { %8728 = vadd.xlane.f32.xlu1 %v8727_v17  ;;  %v8724_v30 = vsel %vm145_vm1, %v12685_v18, 0.0  ;;  %v9197_v17 = vld [vmem:[%s13975_s8 + $0x8] sm:$0xff] }
0x3df1   :  { %8725 = vadd.xlane.f32.xlu0 %v8724_v30  ;;  %v9199_v30 = vld [vmem:[%s13975_s8 + $0x18] sm:$0xff] }
0x3df2   :  { %v12327_v12 = vpack.c.bf16 %v9199_v30, %v9197_v17  ;;  %v9508_v17 = vld [vmem:[%s13977_s24 + $0x38] sm:$0xff] }
0x3e7d   :  { %v8729_v27 = vpop.xlane.xlu1 %8728 }
0x3e7e   :  { %12686 = vrcp.f32 %v8729_v27  ;;  %v8726_v19 = vpop.xlane.xlu0 %8725 }
0x3e7f   :  { %12688 = vrcp.f32 %v8726_v19 }
0x3e88   :  { %v12687_v20 = vpop.eup %12686 }
0x3e89   :  { %v12689_v21 = vpop.eup %12688  ;;  %v8733_v23 = vmul.f32 %v12687_v20, %v12683_v5  ;;  %v9039_v5 = vld [vmem:[%s13974_s3 + $0x18] sm:$0xff]  ;;  %v9196_v20 = vld [vmem:[%s13975_s8] sm:$0xff] }
0x3e8a   :  { %v8732_v22 = vmul.f32 %v12689_v21, %v12685_v18  ;;  %v12319_v18 = vpack.c.bf16 %v9039_v5, %v9038_v15  ;;  %v9198_v21 = vld [vmem:[%s13975_s8 + $0x10] sm:$0xff] }
0x3e8b   :  { %v12329_v25 = vpack.c.bf16 %v9198_v21, %v9196_v20  ;;  %v9503_v5 = vld [vmem:[%s13977_s24 + $0x10] sm:$0xff]  ;;  %v9510_v20 = vld [vmem:[%s13977_s24 + $0x48] sm:$0xff]  ;;  %v9512_v21 = vld [vmem:[%s13977_s24 + $0x58] sm:$0xff] }
0x3e8c   :  { %11696 = vmatprep.mubr.msk.f32.mxu1 %vm145_vm1, %v8732_v22 }
0x3e8d   :  { %11697 = vmatmul.mubr.msk.f32.vlgmr.msra.gmra.mrb[98].mxu1 %vm145_vm1, %v8733_v23  ;;  %v9203_v23 = vld [vmem:[%s13975_s8 + $0x38] sm:$0xff] }
0x3e8e   :  { %11708 = vmatprep.mubr.msk.f32.mxu1 %vm12757_vm0, %v12758_v4 }
0x3f60   :  { %v11698_v26 = vpop.f32.mrb[98].mxu1 }
0x3f61   :  { %v8806_v61 = vpop.f32.mrb[99].mxu1 }
0x3f62   :  { %11701 = vmatprep.mubr.msk.f32.mxu0 %vm745_vm4, %v8806_v61 }
0x3f63   :  { %11702 = vmatmul.mubr.msk.f32.vlgmr.msra.gmra.mrb[46].mxu0 %vm745_vm4, %v11698_v26 }
0x3f64   :  { %12323 = vmatpush3.bf16.msra.mxu0 %v12322_v28  ;;  %11730 = vmatprep.mubr.msk.f32.mxu0 %vm12757_vm0, %v12758_v4 }
0x3f65   :  { %12324 = vmatprep.subr.bf16.mxu0 %v12756_v2 }
0x3f68   :  { %12326 = vmatpush3.bf16.msra.mxu0 %v12325_v31  ;;  %v9205_v31 = vld [vmem:[%s13975_s8 + $0x48] sm:$0xff] }
0x3f6b   :  { %11731 = vmatmul.mubr.msk.f32.vlgmr.msra.gmra.mrb[72].mxu0 %vm505_vm3, %v306_v33  ;;  %v12333_v33 = vpack.c.bf16 %v9202_v0, %v9200_v29  ;;  %v9513_v29 = vld [vmem:[%s13977_s24 + $0x60] sm:$0xff]  ;;  %v9515_v0 = vld [vmem:[%s13977_s24 + $0x70] sm:$0xff] }
0x4036   :  { %v11703_v34 = vpop.f32.mrb[46].mxu0 }
0x4037   :  { %v8904_v35 = vadd.f32 %v11703_v34, %v13367_v14  ;;  %v8892_v36 = vpop.f32.mrb[47].mxu0  ;;  %v12335_v34 = vpack.c.bf16 %v9207_v32, %v9205_v31  ;;  %v9518_v31 = vld [vmem:[%s13977_s24 + $0x88] sm:$0xff]  ;;  %v9520_v32 = vld [vmem:[%s13977_s24 + $0x98] sm:$0xff] }
0x4038   :  { %v8903_v8 = vadd.f32 %v8892_v36, %v13365_v13  ;;  %v9206_v36 = vld [vmem:[%s13975_s8 + $0x50] sm:$0xff] }
0x4039   :  { %v8908_v7 = vsel %vm505_vm3, %v8904_v35, 0.0 }
0x403a   :  { %8909 = vadd.xlane.f32.xlu1 %v8908_v7  ;;  %v8905_v37 = vsel %vm505_vm3, %v8903_v8, 0.0  ;;  %v9211_v7 = vld [vmem:[%s13975_s8 + $0x78] sm:$0xff] }
0x403b   :  { %8906 = vadd.xlane.f32.xlu0 %v8905_v37 }
0x403e   :  { %v13731_v38 = vpop.f32.mrb[72].mxu0 }
0x403f   :  { %v11732_v39 = vpop.f32.mrb[73].mxu0 }
0x40c7   :  { %v8910_v40 = vpop.xlane.xlu1 %8909 }
0x40c8   :  { %v8912_v62 = vmul.f32 0.03125, %v8910_v40  ;;  %v8907_v41 = vpop.xlane.xlu0 %8906  ;;  %v9208_v40 = vld [vmem:[%s13975_s8 + $0x60] sm:$0xff] }
0x40c9   :  { %v8911_v42 = vmul.f32 0.03125, %v8907_v41  ;;  %v9213_v41 = vld [vmem:[%s13975_s8 + $0x88] sm:$0xff] }
0x40ca   :  { %v8914_v43 = vsub.f32 %v8904_v35, %v8912_v62  ;;  %v9204_v35 = vld [vmem:[%s13975_s8 + $0x40] sm:$0xff]  ;;  %v9210_v62 = vld [vmem:[%s13975_s8 + $0x70] sm:$0xff] }
0x40cb   :  { %v8913_v44 = vsub.f32 %v8903_v8, %v8911_v42  ;;  %v9209_v8 = vld [vmem:[%s13975_s8 + $0x68] sm:$0xff]  ;;  %v12337_v37 = vpack.c.bf16 %v9206_v36, %v9204_v35  ;;  %v9215_v42 = vld [vmem:[%s13975_s8 + $0x98] sm:$0xff]  ;;  %v9517_v35 = vld [vmem:[%s13977_s24 + $0x80] sm:$0xff] }
0x40cc   :  { %v8916_v14 = vmul.f32 %v8914_v43, %v8914_v43  ;;  %v12339_v39 = vpack.c.bf16 %v9211_v7, %v9209_v8  ;;  %v9519_v36 = vld [vmem:[%s13977_s24 + $0x90] sm:$0xff]  ;;  %v9522_v8 = vld [vmem:[%s13977_s24 + $0xa8] sm:$0xff]  ;;  %v9524_v7 = vld [vmem:[%s13977_s24 + $0xb8] sm:$0xff] }
0x40cd   :  { %v8915_v45 = vmul.f32 %v8913_v44, %v8913_v44 }
0x40ce   :  { %v8920_v13 = vsel %vm505_vm3, %v8916_v14, 0.0  ;;  %v9212_v14 = vld [vmem:[%s13975_s8 + $0x80] sm:$0xff] }
0x40cf   :  { %8921 = vadd.xlane.f32.xlu1 %v8920_v13  ;;  %v8917_v46 = vsel %vm505_vm3, %v8915_v45, 0.0  ;;  %v9214_v45 = vld [vmem:[%s13975_s8 + $0x90] sm:$0xff]  ;;  %v9217_v13 = vld [vmem:[%s13975_s8 + $0xa8] sm:$0xff] }
0x40d0   :  { %8918 = vadd.xlane.f32.xlu0 %v8917_v46  ;;  %v9219_v46 = vld [vmem:[%s13975_s8 + $0xb8] sm:$0xff] }
0x40d4   :  { %8954 = vadd.xlane.f32.xlu0 %v8953_v48  ;;  %v12347_v48 = vpack.c.bf16 %v9219_v46, %v9217_v13  ;;  %v9530_v13 = vld [vmem:[%s13977_s24 + $0xe8] sm:$0xff]  ;;  %v9532_v46 = vld [vmem:[%s13977_s24 + $0xf8] sm:$0xff] }
0x415c   :  { %v8922_v49 = vpop.xlane.xlu1 %8921 }
0x415d   :  { %v8924_v50 = vmul.f32 0.03125, %v8922_v49  ;;  %v8919_v51 = vpop.xlane.xlu0 %8918  ;;  %v9216_v49 = vld [vmem:[%s13975_s8 + $0xa0] sm:$0xff] }
0x415e   :  { %v8923_v52 = vmul.f32 0.03125, %v8919_v51  ;;  %v9221_v51 = vld [vmem:[%s13975_s8 + $0xc8] sm:$0xff] }
0x415f   :  { %v8926_v53 = vadd.f32 1e-05, %v8924_v50  ;;  %v9218_v50 = vld [vmem:[%s13975_s8 + $0xb0] sm:$0xff] }
0x4160   :  { %v8925_v54 = vadd.f32 1e-05, %v8923_v52  ;;  %v9223_v52 = vld [vmem:[%s13975_s8 + $0xd8] sm:$0xff] }
0x4161   :  { %12690 = vrsqrt.f32 %v8926_v53  ;;  %v8955_v27 = vpop.xlane.xlu0 %8954  ;;  %v12349_v53 = vpack.c.bf16 %v9218_v50, %v9216_v49  ;;  %v9529_v49 = vld [vmem:[%s13977_s24 + $0xe0] sm:$0xff]  ;;  %v9531_v50 = vld [vmem:[%s13977_s24 + $0xf0] sm:$0xff] }
0x4162   :  { %12692 = vrsqrt.f32 %v8925_v54  ;;  %v8956_v19 = vmax.f32 %v8955_v27, 1.0  ;;  %v12351_v54 = vpack.c.bf16 %v9223_v52, %v9221_v51  ;;  %v9505_v27 = vld [vmem:[%s13977_s24 + $0x20] sm:$0xff]  ;;  %v9534_v51 = vld [vmem:[%s13977_s24 + $0x108] sm:$0xff]  ;;  %v9536_v52 = vld [vmem:[%s13977_s24 + $0x118] sm:$0xff] }
0x4164   :  { %12694 = vrcp.f32 %v8956_v19  ;;  %v9507_v19 = vld [vmem:[%s13977_s24 + $0x30] sm:$0xff] }
0x416b   :  { %v12691_v55 = vpop.eup %12690 }
0x416c   :  { %v12693_v57 = vpop.eup %12692  ;;  %v8930_v58 = vmul.f32 %v12691_v55, %v8914_v43  ;;  %v12341_v43 = vpack.c.bf16 %v9210_v62, %v9208_v40  ;;  %v9220_v55 = vld [vmem:[%s13975_s8 + $0xc0] sm:$0xff]  ;;  %v9523_v62 = vld [vmem:[%s13977_s24 + $0xb0] sm:$0xff] }
0x416d   :  { %v8929_v59 = vmul.f32 %v12693_v57, %v8913_v44  ;;  %v12343_v44 = vpack.c.bf16 %v9215_v42, %v9213_v41  ;;  %v9521_v40 = vld [vmem:[%s13977_s24 + $0xa0] sm:$0xff]  ;;  %v9526_v41 = vld [vmem:[%s13977_s24 + $0xc8] sm:$0xff]  ;;  %v9528_v42 = vld [vmem:[%s13977_s24 + $0xd8] sm:$0xff] }
0x416e   :  { %v8940_v63 = vmul.f32 %v10271_v56, %v8930_v58  ;;  %v12695_v22 = vpop.eup %12694  ;;  %v9225_v58 = vld [vmem:[%s13975_s8 + $0xe8] sm:$0xff] }
0x416f   :  { %v8939_v1 = vmul.f32 %v10271_v56, %v8929_v59  ;;  %v9222_v56 = vld [vmem:[%s13975_s8 + $0xd0] sm:$0xff]  ;;  %v9227_v59 = vld [vmem:[%s13975_s8 + $0xf8] sm:$0xff] }
0x4170   :  { %v8950_v3 = vadd.f32 %v10273_v60, %v8940_v63  ;;  %v12353_v57 = vpack.c.bf16 %v9222_v56, %v9220_v55  ;;  %v9224_v63 = vld [vmem:[%s13975_s8 + $0xe0] sm:$0xff]  ;;  %v9535_v56 = vld [vmem:[%s13977_s24 + $0x110] sm:$0xff] }
0x4171   :  { %v8949_v9 = vadd.f32 %v10273_v60, %v8939_v1  ;;  %v12355_v60 = vpack.c.bf16 %v9227_v59, %v9225_v58  ;;  %v9226_v1 = vld [vmem:[%s13975_s8 + $0xf0] sm:$0xff]  ;;  %v9533_v55 = vld [vmem:[%s13977_s24 + $0x100] sm:$0xff]  ;;  %v9540_v58 = vld [vmem:[%s13977_s24 + $0x138] sm:$0xff] }
0x4172   :  { %v12425_v59 = vpack.c.bf16 %v9535_v56, %v9533_v55  ;;  %v9392_v55 = vld [vmem:[%s13979_s6 + $0x60] sm:$0xff]  ;;  %v9394_v56 = vld [vmem:[%s13979_s6 + $0x70] sm:$0xff] }
0x4173   :  { %v12313_v6 = vpack.c.bf16 %v8950_v3, %v8949_v9  ;;  %v12357_v3 = vpack.c.bf16 %v9226_v1, %v9224_v63  ;;  %v13782_v9 = vld [vmem:[%s13976_s14] sm:$0xff]  ;;  %v9539_v1 = vld [vmem:[%s13977_s24 + $0x130] sm:$0xff] }
0x4174   :  { %v9300_v16 = vcombine.high %v13782_v9, %v13782_v9  ;;  %v9537_v63 = vld [vmem:[%s13977_s24 + $0x120] sm:$0xff] }
0x4175   :  { %12314 = vmatpush3.bf16.msra.mxu1 %v12313_v6  ;;  %v9504_v6 = vld [vmem:[%s13977_s24 + $0x18] sm:$0xff] }
0x4176   :  { %12315 = vmatprep.subr.bf16.mxu1 %v12756_v2  ;;  %v12391_v15 = vpack.c.bf16 %v9504_v6, %v9502_v10  ;;  %v12429_v10 = vpack.c.bf16 %v9539_v1, %v9537_v63  ;;  %v9398_v63 = vld [vmem:[%s13979_s6 + $0x90] sm:$0xff]  ;;  %v9401_v1 = vld [vmem:[%s13979_s6 + $0xa8] sm:$0xff] }
0x4178   :  { %11709 = vmatmul.mubr.msk.f32.vlgmr.msra.gmra.mrb[100].mxu1 %vm145_vm1, %v8951_v47  ;;  %v12345_v47 = vpack.c.bf16 %v9214_v45, %v9212_v14  ;;  %12392 = vmatprep.subr.bf16.mxu0 %v12391_v15  ;;  %v9525_v14 = vld [vmem:[%s13977_s24 + $0xc0] sm:$0xff]  ;;  %v9527_v45 = vld [vmem:[%s13977_s24 + $0xd0] sm:$0xff] }
0x4179   :  { %12317 = vmatpush3.bf16.msra.mxu1 %v12316_v11  ;;  %11719 = vmatprep.mubr.msk.f32.mxu1 %vm12757_vm0, %v12758_v4  ;;  %v9501_v11 = vld [vmem:[%s13977_s24] sm:$0xff]  ;;  %v9543_v15 = vld [vmem:[%s13977_s24 + $0x150] sm:$0xff] }
0x417a   :  { %12318 = vmatprep.subr.bf16.mxu1 %v12756_v2  ;;  %v9201_v2 = vld [vmem:[%s13975_s8 + $0x28] sm:$0xff]  ;;  %v12393_v30 = vpack.c.bf16 %v9503_v5, %v9501_v11  ;;  %v9541_v11 = vld [vmem:[%s13977_s24 + $0x140] sm:$0xff] }
0x417b   :  { %v12331_v61 = vpack.c.bf16 %v9203_v23, %v9201_v2  ;;  %v12399_v2 = vpack.c.bf16 %v9512_v21, %v9510_v20  ;;  %v9509_v23 = vld [vmem:[%s13977_s24 + $0x40] sm:$0xff]  ;;  %v9546_v5 = vld [vmem:[%s13977_s24 + $0x168] sm:$0xff]  ;;  %v9552_v20 = vld [vmem:[%s13977_s24 + $0x198] sm:$0xff] }
0x417c   :  { %12394 = vmatpush1.bf16.msra.mxu0 %v12393_v30 }
0x417d   :  { %12320 = vmatpush3.bf16.msra.mxu1 %v12319_v18  ;;  %v9506_v18 = vld [vmem:[%s13977_s24 + $0x28] sm:$0xff] }
0x417e   :  { %12328 = vmatprep.subr.bf16.mxu1 %v12327_v12  ;;  %v12395_v12 = vpack.c.bf16 %v9508_v17, %v9506_v18  ;;  %v9548_v18 = vld [vmem:[%s13977_s24 + $0x178] sm:$0xff]  ;;  %v12433_v17 = vpack.c.bf16 %v9543_v15, %v9541_v11  ;;  %v9402_v11 = vld [vmem:[%s13979_s6 + $0xb0] sm:$0xff]  ;;  %v9405_v15 = vld [vmem:[%s13979_s6 + $0xc8] sm:$0xff] }
0x417f   :  { %v12435_v30 = vpack.c.bf16 %v9548_v18, %v9546_v5  ;;  %v9407_v5 = vld [vmem:[%s13979_s6 + $0xd8] sm:$0xff] }
0x4180   :  { %12396 = vmatprep.subr.bf16.mxu0 %v12395_v12  ;;  %v9545_v12 = vld [vmem:[%s13977_s24 + $0x160] sm:$0xff] }
0x424b   :  { %v9026_v24 = vpop.f32.mrb[100].mxu1 }
0x424c   :  { %v9031_v26 = vmul.f32 %v12695_v22, %v9026_v24  ;;  %v11710_v28 = vpop.f32.mrb[101].mxu1  ;;  %v12397_v22 = vpack.c.bf16 %v9507_v19, %v9505_v27  ;;  %v9511_v24 = vld [vmem:[%s13977_s24 + $0x50] sm:$0xff]  ;;  %v9550_v19 = vld [vmem:[%s13977_s24 + $0x188] sm:$0xff] }
0x424d   :  { %v12401_v28 = vpack.c.bf16 %v9511_v24, %v9509_v23  ;;  %v9547_v27 = vld [vmem:[%s13977_s24 + $0x170] sm:$0xff]  ;;  %v9554_v24 = vld [vmem:[%s13977_s24 + $0x1a8] sm:$0xff] }
0x424e   :  { %11720 = vmatmul.mubr.msk.f32.vlgmr.msra.gmra.mrb[102].mxu1 %vm505_vm3, %v9031_v26  ;;  %v9516_v26 = vld [vmem:[%s13977_s24 + $0x78] sm:$0xff]  ;;  %12398 = vmatpush1.bf16.msra.mxu0 %v12397_v22  ;;  %v12437_v21 = vpack.c.bf16 %v9547_v27, %v9545_v12  ;;  %v12439_v22 = vpack.c.bf16 %v9552_v20, %v9550_v19  ;;  %v9551_v23 = vld [vmem:[%s13977_s24 + $0x190] sm:$0xff]  ;;  %v9409_v27 = vld [vmem:[%s13979_s6 + $0xe8] sm:$0xff] }
0x424f   :  { %12330 = vmatpush1.bf16.msra.mxu1 %v12329_v25  ;;  %9292 = vmatprep.mubr.f32.mxu1 %v12758_v4  ;;  %v9514_v25 = vld [vmem:[%s13977_s24 + $0x68] sm:$0xff]  ;;  %v9406_v12 = vld [vmem:[%s13979_s6 + $0xd0] sm:$0xff]  ;;  %v9411_v19 = vld [vmem:[%s13979_s6 + $0xf8] sm:$0xff] }
0x4250   :  { %12332 = vmatprep.subr.bf16.mxu1 %v12331_v61  ;;  %12400 = vmatprep.subr.bf16.mxu0 %v12399_v2  ;;  %v12403_v61 = vpack.c.bf16 %v9516_v26, %v9514_v25  ;;  %v9549_v2 = vld [vmem:[%s13977_s24 + $0x180] sm:$0xff]  ;;  %v9556_v25 = vld [vmem:[%s13977_s24 + $0x1b8] sm:$0xff] }
0x4251   :  { %v12441_v26 = vpack.c.bf16 %v9551_v23, %v9549_v2  ;;  %v9410_v2 = vld [vmem:[%s13979_s6 + $0xf0] sm:$0xff] }
0x4252   :  { %12402 = vmatpush1.bf16.msra.mxu0 %v12401_v28  ;;  %v12443_v28 = vpack.c.bf16 %v9556_v25, %v9554_v24  ;;  %v9379_v24 = vld [vmem:[%s13981_s20] sm:$0x3] }
0x4253   :  { %12334 = vmatpush1.bf16.msra.mxu1 %v12333_v33  ;;  %v12405_v33 = vpack.c.bf16 %v9515_v0, %v9513_v29  ;;  %12404 = vmatprep.subr.bf16.mxu0 %v12403_v61  ;;  %v9553_v61 = vld [vmem:[%s13977_s24 + $0x1a0] sm:$0xff]  ;;  %v9555_v29 = vld [vmem:[%s13977_s24 + $0x1b0] sm:$0xff]  ;;  %v9558_v0 = vld [vmem:[%s13977_s24 + $0x1c8] sm:$0xff] }
0x4254   :  { %12336 = vmatprep.subr.bf16.mxu1 %v12335_v34  ;;  %v12407_v34 = vpack.c.bf16 %v9520_v32, %v9518_v31  ;;  %v9560_v31 = vld [vmem:[%s13977_s24 + $0x1d8] sm:$0xff]  ;;  %v12445_v32 = vpack.c.bf16 %v9555_v29, %v9553_v61  ;;  %v9557_v25 = vld [vmem:[%s13977_s24 + $0x1c0] sm:$0xff]  ;;  %v9562_v61 = vld [vmem:[%s13977_s24 + $0x1e8] sm:$0xff] }
0x4255   :  { %v9564_v29 = vld [vmem:[%s13977_s24 + $0x1f8] sm:$0xff] }
0x4256   :  { %12406 = vmatpush1.bf16.msra.mxu0 %v12405_v33  ;;  %v12447_v33 = vpack.c.bf16 %v9560_v31, %v9558_v0  ;;  %v12451_v0 = vpack.c.bf16 %v9564_v29, %v9562_v61  ;;  %v9561_v31 = vld [vmem:[%s13977_s24 + $0x1e0] sm:$0xff]  ;;  %v9664_v61 = vld [vmem:[%s12918_s19 + $0x70] sm:$0xff]  ;;  %v9665_v29 = vld [vmem:[%s12918_s19 + $0x78] sm:$0xff] }
0x4257   :  { %12338 = vmatpush1.bf16.msra.mxu1 %v12337_v37  ;;  %v12409_v37 = vpack.c.bf16 %v9519_v36, %v9517_v35  ;;  %12408 = vmatprep.subr.bf16.mxu0 %v12407_v34  ;;  %v10277_v35 = vld [vmem:[%s13978_s30] ss:$0 sm:$0xff]  ;;  %v9381_v36 = vld [vmem:[%s13979_s6 + $0x8] sm:$0xff] }
0x4258   :  { %12340 = vmatprep.subr.bf16.mxu1 %v12339_v39  ;;  %v12411_v39 = vpack.c.bf16 %v9524_v7, %v9522_v8  ;;  %v9383_v8 = vld [vmem:[%s13979_s6 + $0x18] sm:$0xff] }
0x425a   :  { %12410 = vmatpush1.bf16.msra.mxu0 %v12409_v37 }
0x425b   :  { %12342 = vmatpush1.bf16.msra.mxu1 %v12341_v43  ;;  %v12413_v43 = vpack.c.bf16 %v9523_v62, %v9521_v40  ;;  %12412 = vmatprep.subr.bf16.mxu0 %v12411_v39  ;;  %v12359_v40 = vpack.c.bf16 %v9383_v8, %v9381_v36  ;;  %v9380_v62 = vld [vmem:[%s13979_s6] sm:$0xff]  ;;  %v9487_v8 = vlaneseq }
0x425c   :  { %12344 = vmatprep.subr.bf16.mxu1 %v12343_v44  ;;  %v12415_v44 = vpack.c.bf16 %v9528_v42, %v9526_v41  ;;  %v9382_v41 = vld [vmem:[%s13979_s6 + $0x10] sm:$0xff]  ;;  %v9385_v42 = vld [vmem:[%s13979_s6 + $0x28] sm:$0xff] }
0x425e   :  { %12414 = vmatpush1.bf16.msra.mxu0 %v12413_v43  ;;  %v9387_v43 = vld [vmem:[%s13979_s6 + $0x38] sm:$0xff] }
0x425f   :  { %12346 = vmatpush1.bf16.msra.mxu1 %v12345_v47  ;;  %v12417_v47 = vpack.c.bf16 %v9527_v45, %v9525_v14  ;;  %12416 = vmatprep.subr.bf16.mxu0 %v12415_v44  ;;  %v12361_v44 = vpack.c.bf16 %v9382_v41, %v9380_v62  ;;  %v12363_v14 = vpack.c.bf16 %v9387_v43, %v9385_v42  ;;  %v9384_v45 = vld [vmem:[%s13979_s6 + $0x20] sm:$0xff] }
0x4260   :  { %12348 = vmatprep.subr.bf16.mxu1 %v12347_v48  ;;  %v12419_v48 = vpack.c.bf16 %v9532_v46, %v9530_v13  ;;  %v9386_v13 = vld [vmem:[%s13979_s6 + $0x30] sm:$0xff]  ;;  %v9389_v46 = vld [vmem:[%s13979_s6 + $0x48] sm:$0xff] }
0x4262   :  { %12418 = vmatpush1.bf16.msra.mxu0 %v12417_v47  ;;  %v9391_v47 = vld [vmem:[%s13979_s6 + $0x58] sm:$0xff] }
0x4263   :  { %12350 = vmatpush1.bf16.msra.mxu1 %v12349_v53  ;;  %v12421_v53 = vpack.c.bf16 %v9531_v50, %v9529_v49  ;;  %12420 = vmatprep.subr.bf16.mxu0 %v12419_v48  ;;  %v12367_v48 = vpack.c.bf16 %v9391_v47, %v9389_v46  ;;  %v9388_v49 = vld [vmem:[%s13979_s6 + $0x40] sm:$0xff]  ;;  %v9390_v50 = vld [vmem:[%s13979_s6 + $0x50] sm:$0xff]  ;;  %v9669_v46 = vld [vmem:[%s12918_s19 + $0x98] sm:$0xff] }
0x4264   :  { %12352 = vmatprep.subr.bf16.mxu1 %v12351_v54  ;;  %v12423_v54 = vpack.c.bf16 %v9536_v52, %v9534_v51  ;;  %v9393_v51 = vld [vmem:[%s13979_s6 + $0x68] sm:$0xff]  ;;  %v9395_v52 = vld [vmem:[%s13979_s6 + $0x78] sm:$0xff] }
0x4266   :  { %12422 = vmatpush1.bf16.msra.mxu0 %v12421_v53  ;;  %v12369_v53 = vpack.c.bf16 %v9390_v50, %v9388_v49  ;;  %v9652_v50 = vld [vmem:[%s12918_s19 + $0x10] sm:$0xff] }
0x4267   :  { %12354 = vmatpush1.bf16.msra.mxu1 %v12353_v57  ;;  %v9538_v57 = vld [vmem:[%s13977_s24 + $0x128] sm:$0xff]  ;;  %12424 = vmatprep.subr.bf16.mxu0 %v12423_v54  ;;  %v12371_v54 = vpack.c.bf16 %v9395_v52, %v9393_v51  ;;  %v9653_v51 = vld [vmem:[%s12918_s19 + $0x18] sm:$0xff]  ;;  %v9670_v52 = vld [vmem:[%s12918_s19 + $0xa0] sm:$0xff] }
0x4268   :  { %12356 = vmatprep.subr.bf16.mxu1 %v12355_v60  ;;  %v12427_v60 = vpack.c.bf16 %v9540_v58, %v9538_v57  ;;  %v9397_v57 = vld [vmem:[%s13979_s6 + $0x88] sm:$0xff]  ;;  %v12373_v58 = vpack.c.bf16 %v9394_v56, %v9392_v55  ;;  %v9654_v56 = vld [vmem:[%s12918_s19 + $0x20] sm:$0xff] }
0x426a   :  { %12426 = vmatpush1.bf16.msra.mxu0 %v12425_v59 }
0x426b   :  { %12358 = vmatpush1.bf16.msra.mxu1 %v12357_v3  ;;  %v9542_v3 = vld [vmem:[%s13977_s24 + $0x148] sm:$0xff]  ;;  %12428 = vmatprep.subr.bf16.mxu0 %v12427_v60  ;;  %v9396_v60 = vld [vmem:[%s13979_s6 + $0x80] sm:$0xff] }
0x426c   :  { %10278 = vmatprep.subr.msk.mxu1 %vm1383_vm6, %v9300_v16  ;;  %v9544_v16 = vld [vmem:[%s13977_s24 + $0x158] sm:$0xff] }
0x426d   :  { %v12431_v6 = vpack.c.bf16 %v9544_v16, %v9542_v3  ;;  %v9403_v3 = vld [vmem:[%s13979_s6 + $0xb8] sm:$0xff]  ;;  %v12377_v16 = vpack.c.bf16 %v9398_v63, %v9396_v60  ;;  %v9656_v63 = vld [vmem:[%s12918_s19 + $0x30] sm:$0xff] }
0x426e   :  { %12430 = vmatpush1.bf16.msra.mxu0 %v12429_v10  ;;  %v12379_v10 = vpack.c.bf16 %v9403_v3, %v9401_v1  ;;  %v9657_v1 = vld [vmem:[%s12918_s19 + $0x38] sm:$0xff]  ;;  %v9674_v3 = vld [vmem:[%s12918_s19 + $0xc0] sm:$0xff] }
0x426f   :  { %12432 = vmatprep.subr.bf16.mxu0 %v12431_v6  ;;  %v9400_v6 = vld [vmem:[%s13979_s6 + $0xa0] sm:$0xff] }
0x4270   :  { %v12381_v18 = vpack.c.bf16 %v9402_v11, %v9400_v6  ;;  %v9658_v11 = vld [vmem:[%s12918_s19 + $0x40] sm:$0xff] }
0x4272   :  { %12434 = vmatpush1.bf16.msra.mxu0 %v12433_v17  ;;  %v12383_v17 = vpack.c.bf16 %v9407_v5, %v9405_v15  ;;  %v9659_v15 = vld [vmem:[%s12918_s19 + $0x48] sm:$0xff]  ;;  %v9676_v5 = vld [vmem:[%s12918_s19 + $0xd0] sm:$0xff] }
0x4273   :  { %12436 = vmatprep.subr.bf16.mxu0 %v12435_v30  ;;  %v9404_v30 = vld [vmem:[%s13979_s6 + $0xc0] sm:$0xff] }
0x4274   :  { %v12385_v20 = vpack.c.bf16 %v9406_v12, %v9404_v30  ;;  %v9660_v12 = vld [vmem:[%s12918_s19 + $0x50] sm:$0xff] }
0x4276   :  { %12438 = vmatpush1.bf16.msra.mxu0 %v12437_v21  ;;  %v12387_v21 = vpack.c.bf16 %v9411_v19, %v9409_v27  ;;  %v9661_v27 = vld [vmem:[%s12918_s19 + $0x58] sm:$0xff]  ;;  %v9678_v19 = vld [vmem:[%s12918_s19 + $0xe0] sm:$0xff] }
0x4277   :  { %12440 = vmatprep.subr.bf16.mxu0 %v12439_v22  ;;  %v9408_v22 = vld [vmem:[%s13979_s6 + $0xe0] sm:$0xff] }
0x4278   :  { %v12389_v23 = vpack.c.bf16 %v9410_v2, %v9408_v22  ;;  %v9662_v2 = vld [vmem:[%s12918_s19 + $0x60] sm:$0xff] }
0x427a   :  { %12442 = vmatpush1.bf16.msra.mxu0 %v12441_v26  ;;  %v9559_v26 = vld [vmem:[%s13977_s24 + $0x1d0] sm:$0xff] }
0x427b   :  { %12444 = vmatprep.subr.bf16.mxu0 %v12443_v28  ;;  %v12449_v28 = vpack.c.bf16 %v9559_v26, %v9557_v25  ;;  %v9680_v25 = vld [vmem:[%s12918_s19 + $0xf0] sm:$0xff]  ;;  %v9681_v26 = vld [vmem:[%s12918_s19 + $0xf8] sm:$0xff] }
0x427e   :  { %12446 = vmatpush1.bf16.msra.mxu0 %v12445_v32  ;;  %v9563_v32 = vld [vmem:[%s13977_s24 + $0x1f0] sm:$0xff] }
0x427f   :  { %12448 = vmatprep.subr.bf16.mxu0 %v12447_v33  ;;  %v12453_v33 = vpack.c.bf16 %v9563_v32, %v9561_v31  ;;  %v9565_v31 = vld [vmem:[%s12913_s17] sm:$0x3]  ;;  %s12759_s17 = smov [#allocation2]  }
0x4282   :  { %12450 = vmatpush1.bf16.msra.mxu0 %v12449_v28  ;;  %v12483_v28 = vpack.c.bf16 %v9681_v26, %v9680_v25 }
0x4283   :  { %12452 = vmatprep.subr.bf16.mxu0 %v12451_v0  ;;  %v12485_v0 = vpack.c.bf16 %v9665_v29, %v9664_v61 }
0x4286   :  { %12454 = vmatpush1.bf16.msra.mxu0 %v12453_v33 }
0x4321   :  { %v9109_v34 = vpop.f32.mrb[102].mxu1 }
0x4322   :  { %v9183_v7 = vadd.f32 %v13731_v38, %v9109_v34  ;;  %v11721_v37 = vpop.f32.mrb[103].mxu1  ;;  %v9194_v38 = vld [vmem:[%s13980_s12] sm:$0x3] }
0x4323   :  { %v9666_v34 = vld [vmem:[%s12918_s19 + $0x80] sm:$0xff] }
0x4324   :  { %v9193_v39 = vadd.f32 %v10277_v35, %v9183_v7  ;;  %v9667_v35 = vld [vmem:[%s12918_s19 + $0x88] sm:$0xff]  ;;  %v13894_v7 = vshrl.u32 %v9487_v8, 7 }
0x4325   :  { %v12455_v36 = vpack.c.bf16 %v9667_v35, %v9666_v34 }
0x4326   :  { %9293 = vmatmul.mubr.f32.vlgmr.msra.gmra.mrb[104].mxu1 %v9193_v39  ;;  %v9489_v37 = vsub.s32 0, %v13894_v7  ;;  %v9485_v39 = vld [vmem:[%s13982_s27] sm:$0x3] }
0x4327   :  { %10279 = vmatpush1.msk.msra.mxu1 %vm1383_vm6, %v13782_v9  ;;  %9372 = vmatprep.mubr.f32.mxu1 %v12758_v4  ;;  %v12365_v9 = vpack.c.bf16 %v9386_v13, %v9384_v45  ;;  %v9668_v13 = vld [vmem:[%s12918_s19 + $0x90] sm:$0xff] }
0x4328   :  { %12360 = vmatprep.subr.bf16.mxu1 %v12359_v40  ;;  %12456 = vmatprep.subr.bf16.mxu0 %v12455_v36  ;;  %v9493_v40 = vsub.s32 1, %v13894_v7  ;;  %v9490_v62 = vrot.slane %v9485_v39, %v9489_v37  ;;  %v12459_v49 = vpack.c.bf16 %v9669_v46, %v9668_v13  ;;  %v9570_v32 = vrot.slane %v9565_v31, %v9489_v37 }
0x432a   :  { %v9494_v41 = vrot.slane %v9485_v39, %v9493_v40  ;;  %v9574_v33 = vrot.slane %v9565_v31, %v9493_v40 }
0x432e   :  { %10280 = vmatmul.mubr.msk.f32.vlgmr.msra.gmra.mrb[104].mxu1 %vm745_vm4, %v9194_v38 }
0x432f   :  { %12362 = vmatpush1.bf16.msra.mxu1 %v12361_v44  ;;  %9476 = vmatprep.mubr.f32.mxu1 %v12758_v4  ;;  %v9399_v4 = vld [vmem:[%s13979_s6 + $0x98] sm:$0xff]  ;;  %v9650_v44 = vld [vmem:[%s12918_s19] sm:$0xff] }
0x4330   :  { %12364 = vmatprep.subr.bf16.mxu1 %v12363_v14  ;;  %v12375_v59 = vpack.c.bf16 %v9399_v4, %v9397_v57  ;;  %v9651_v14 = vld [vmem:[%s12918_s19 + $0x8] sm:$0xff]  ;;  %v9672_v4 = vld [vmem:[%s12918_s19 + $0xb0] sm:$0xff] }
0x4331   :  { %v9655_v57 = vld [vmem:[%s12918_s19 + $0x28] sm:$0xff] }
0x4333   :  { %12366 = vmatpush1.bf16.msra.mxu1 %v12365_v9  ;;  %v12457_v9 = vpack.c.bf16 %v9651_v14, %v9650_v44  ;;  %v9759_v44 = vld [vmem:[%s13983_s4] sm:$0x3] }
0x4334   :  { %12368 = vmatprep.subr.bf16.mxu1 %v12367_v48 }
0x4337   :  { %12370 = vmatpush1.bf16.msra.mxu1 %v12369_v53  ;;  %v9671_v53 = vld [vmem:[%s12918_s19 + $0xa8] sm:$0xff] }
0x4338   :  { %12372 = vmatprep.subr.bf16.mxu1 %v12371_v54  ;;  %v12461_v54 = vpack.c.bf16 %v9653_v51, %v9652_v50  ;;  %v12463_v55 = vpack.c.bf16 %v9671_v53, %v9670_v52 }
0x433b   :  { %12374 = vmatpush1.bf16.msra.mxu1 %v12373_v58  ;;  %v9673_v58 = vld [vmem:[%s12918_s19 + $0xb8] sm:$0xff] }
0x433c   :  { %12376 = vmatprep.subr.bf16.mxu1 %v12375_v59  ;;  %v12465_v59 = vpack.c.bf16 %v9655_v57, %v9654_v56  ;;  %v12467_v60 = vpack.c.bf16 %v9673_v58, %v9672_v4 }
0x433f   :  { %12378 = vmatpush1.bf16.msra.mxu1 %v12377_v16  ;;  %v9675_v16 = vld [vmem:[%s12918_s19 + $0xc8] sm:$0xff] }
0x4340   :  { %12380 = vmatprep.subr.bf16.mxu1 %v12379_v10  ;;  %v12469_v10 = vpack.c.bf16 %v9657_v1, %v9656_v63  ;;  %v12471_v6 = vpack.c.bf16 %v9675_v16, %v9674_v3 }
0x4343   :  { %12382 = vmatpush1.bf16.msra.mxu1 %v12381_v18  ;;  %v9677_v18 = vld [vmem:[%s12918_s19 + $0xd8] sm:$0xff] }
0x4344   :  { %12384 = vmatprep.subr.bf16.mxu1 %v12383_v17  ;;  %v12473_v17 = vpack.c.bf16 %v9659_v15, %v9658_v11  ;;  %v12475_v30 = vpack.c.bf16 %v9677_v18, %v9676_v5 }
0x4347   :  { %12386 = vmatpush1.bf16.msra.mxu1 %v12385_v20  ;;  %v9679_v20 = vld [vmem:[%s12918_s19 + $0xe8] sm:$0xff] }
0x4348   :  { %12388 = vmatprep.subr.bf16.mxu1 %v12387_v21  ;;  %v12477_v21 = vpack.c.bf16 %v9661_v27, %v9660_v12  ;;  %v12479_v22 = vpack.c.bf16 %v9679_v20, %v9678_v19 }
0x434b   :  { %12390 = vmatpush1.bf16.msra.mxu1 %v12389_v23  ;;  %v9663_v23 = vld [vmem:[%s12918_s19 + $0x68] sm:$0xff]  ;;  %s9783_s19 = sshll.u32 %s12759_s17, 4  ;;  %s9784_s19 = int_to_ptr.vmem [resolvable:$true] %s9783_s19 }
0x434c   :  { %s12700_s28 = scalar_lea.vmem %s9784_s19, 16  ;;  %s12704_s1 = scalar_lea.vmem %s9784_s19, 32 }
0x434d   :  { %p12701_p0 = scmp.ne.s32.totalorder %s9784_s19, %s12700_s28  ;;  %p12705_p1 = scmp.lt.s32.totalorder %s9784_s19, %s9784_s19 }
0x434e   :  { %9477 = vmatmul.mubr.f32.vlgmr.msra.gmra.mrb[104].mxu1 %v9379_v24  ;;  %v12481_v24 = vpack.c.bf16 %v9663_v23, %v9662_v2  ;;  %p12706_p2 = scmp.lt.s32.totalorder %s12704_s1, %s12700_s28 }
0x4350   :  { %p12707_p3 = por %p12706_p2, %p12705_p1 }
0x4352   :  { %p12708_p4 = pnand %p12707_p3, %p12701_p0 }
0x4421   :  { %v9478_v42 = vpop.f32.mrb[104].mxu1 }
0x4422   :  { %v9497_v43 = vadd.f32 %v9490_v62, %v9478_v42  ;;  %v9480_v38 = vpop.f32.mrb[105].mxu1  ;;  %v10281_v42 = vld [vmem:[%s12923_s29] ss:$0 sm:$0xff] }
0x4423   :  { %v9498_v45 = vadd.f32 %v9494_v41, %v9480_v38 }
0x4424   :  { %v9499_v48 = vmax.f32 %v9497_v43, 0.0 }
0x4425   :  { %v9500_v47 = vmax.f32 %v9498_v45, 0.0 }
0x4427   :  { %9641 = vmatprep.mubr.f32.mxu0 %v9500_v47 }
0x4428   :  { %9642 = vmatmul.mubr.f32.vlgmr.msra.gmra.mrb[74].mxu0 %v9499_v48 }
0x4429   :  { %12458 = vmatpush3.bf16.msra.mxu0 %v12457_v9 }
0x442a   :  { %12460 = vmatprep.subr.bf16.mxu0 %v12459_v49 }
0x442d   :  { %12462 = vmatpush3.bf16.msra.mxu0 %v12461_v54 }
0x442e   :  { %12464 = vmatprep.subr.bf16.mxu0 %v12463_v55 }
0x4431   :  { %12466 = vmatpush3.bf16.msra.mxu0 %v12465_v59 }
0x4432   :  { %12468 = vmatprep.subr.bf16.mxu0 %v12467_v60 }
0x4435   :  { %12470 = vmatpush3.bf16.msra.mxu0 %v12469_v10 }
0x4436   :  { %12472 = vmatprep.subr.bf16.mxu0 %v12471_v6 }
0x4439   :  { %12474 = vmatpush3.bf16.msra.mxu0 %v12473_v17 }
0x443a   :  { %12476 = vmatprep.subr.bf16.mxu0 %v12475_v30 }
0x443d   :  { %12478 = vmatpush3.bf16.msra.mxu0 %v12477_v21 }
0x443e   :  { %12480 = vmatprep.subr.bf16.mxu0 %v12479_v22 }
0x4441   :  { %12482 = vmatpush3.bf16.msra.mxu0 %v12481_v24 }
0x4442   :  { %12484 = vmatprep.subr.bf16.mxu0 %v12483_v28 }
0x4445   :  { %12486 = vmatpush3.bf16.msra.mxu0 %v12485_v0 }
0x44fb   :  { %v9643_v34 = vpop.f32.mrb[74].mxu0 }
0x44fc   :  { %v9644_v35 = vadd.f32 %v9643_v34, %v9570_v32  ;;  %v9645_v36 = vpop.f32.mrb[75].mxu0 }
0x44fd   :  { %v9646_v8 = vadd.f32 %v9645_v36, %v9574_v33 }
0x44fe   :  { %v9648_v62 = vmax.f32 %v9644_v35, 0.0 }
0x44ff   :  { %v9649_v39 = vmax.f32 %v9646_v8, 0.0 }
0x4501   :  { %9753 = vmatprep.mubr.f32.mxu0 %v9649_v39 }
0x4502   :  { %9754 = vmatmul.mubr.f32.vlgmr.msra.gmra.mrb[76].mxu0 %v9648_v62 }
0x45d5   :  { %v10817_v41 = vpop.f32.mrb[76].mxu0 }
0x45d6   :  { %v10818_v43 = vpop.f32.mrb[77].mxu0 }
0x45d7   :  { %v10819_v38 = vadd.f32 %v10818_v43, %v10817_v41 }
0x45d9   :  { %v9756_v14 = vadd.f32 %v10819_v38, %v10281_v42 }
0x45db   :  { %v9760_v45 = vsub.f32 %v9756_v14, %v9759_v44 }
0x45dd   :  { %v9761_v37 = vmul.f32 %v9760_v45, %v9760_v45 }
0x45df   :  { %v9763_v13 = vsel %vm9762_vm8, %v9761_v37, 0.0 }
0x45e0   :  { %9764 = vadd.xlane.f32.xlu1 %v9763_v13 }
0x466d   :  { %v9765_v7 = vpop.xlane.xlu1 %9764 }
0x466e   :  { %v9766_v40 = vrot.slane %v9765_v7, 4 }
0x4670   :  { %v9767_v46 = vadd.f32 %v9766_v40, %v9765_v7 }
0x4672   :  { %v9768_v47 = vrot.slane %v9767_v46, 2 }
0x4674   :  { %v9769_v9 = vadd.f32 %v9768_v47, %v9767_v46 }
0x4676   :  { %v9770_v48 = vrot.slane %v9769_v9, 1 }
0x4678   :  { %v9771_v49 = vadd.f32 %v9770_v48, %v9769_v9 }
0x467a   :  { %12519 = vpush %v9771_v49 }
0x46ab   :  { %s12520_s29 = spop %12519 }
0x46ac   :  { %v9773_v50 = vstv %s12520_s29 }
0x46ad   :  { %v9774_v51 = vmul.f32 0.125, %v9773_v50 }
0x46af   :  { %9776 = vst.msk [vmem:[#allocation2] sm:$0x1] %vm9775_vm9, %v9774_v51 }
0x46b0   :  { %12711 = shalt.err (!%p12708_p4)
}
0x46b1   :  { %s12712_s2 = scalar_lea.hbm %s12928_s21, 16 }
0x46b2   :  { %p12713_p5 = scmp.ne.s32.totalorder %s12928_s21, %s12712_s2  ;;  %p12716_p6 = scmp.lt.u32.totalorder %s12712_s2, %s12928_s21 }
0x46b4   :  { %p12718_p7 = pnand %p12716_p6, %p12713_p5 }
0x46b6   :  { %12721 = shalt.err (!%p12718_p7)
}
0x46b7   :  { %9786 = dma.vmem_to_hbm [thread:$0]  %s9784_s19, 16, %s12928_s21, [#allocation3]  }
0x46b8   :  { %12722 = dma.done.wait [#allocation3], 16  }
0x46b9   :  { %12723 = vsyncadd [#allocation3], 4294967280 }
0x46ba   :  { %9790 = vsyncpa [#allocation3], 1 }

</bundles_post_ra>
